<compile_context>
chip_gen: v7x
topology: tpu7x:2x2x1
jax: 0.10.0
libtpu: 0.0.40
codegen_flags: <defaults>
</compile_context>

<pallas_src>
import functools

import jax
import jax.numpy as jnp
from jax.experimental import pallas as pl
from jax.experimental.pallas import tpu as pltpu

BN_EPS = 1e-5
VMEM_LIMIT = 32 * 1024 * 1024   # keep at 32 MiB: fits v7x's 64 MiB physical VMEM

# MLP tiling
TM = 512        # points per MLP row tile (HBM-bound -> big tiles)

# scatter-max tiling
TP = 256        # points per manually-DMA'd block
TV = 128        # voxels per output tile
VCHUNK = 16     # voxels handled per unrolled chunk in the masked max (bf16)


def _round_up(x, m):
    return (x + m - 1) // m * m


# ----------------------------------------------------------------------------
# PPmodel: BN(3) -> Lin(3,64) -> BN -> ReLU -> Lin(64,128) -> BN -> ReLU
#          -> Lin(128,256) -> BN -> ReLU -> Lin(256,out)
#
# Stage A (fused 1+2): relu(x @ W1f + c1f) @ W2 + c2      (+ BN2 batch stats)
#   where W1f/c1f fold BN0 and BN1 (BN1 stats derived analytically from x).
# Stage B:            relu(BN2(h2)) @ W3 + c3             (+ BN3 batch stats)
# Stage C:            relu(BN3(h3)) @ W4 + c4             (bf16, fed to scatter)
#
# Batch statistics are emitted per tile (sum / sum-of-squares of the f32
# pre-cast activations, padded rows masked) and reduced in the wrapper.
# ----------------------------------------------------------------------------
def _stats_block(y, i, n_valid, tm, st_ref):
    row = i * tm + jax.lax.broadcasted_iota(jnp.int32, (tm, 1), 0)
    yv = jnp.where(row < n_valid, y, 0.0)
    part = jnp.concatenate(
        [jnp.sum(yv, axis=0, keepdims=True),
         jnp.sum(yv * yv, axis=0, keepdims=True)], axis=0)      # (2, Cout)
    st_ref[...] = part.reshape(st_ref.shape)                    # (1, 2, Cout)


def _fused12_kernel(x_ref, w1_ref, c1_ref, w2_ref, c2_ref, out_ref, st_ref,
                    *, n_valid, tm):
    i = pl.program_id(0)
    x = x_ref[...].astype(jnp.float32)                  # (tm, 3)
    w1 = w1_ref[...]                                     # (3, 64) f32, BN0+BN1 folded
    h = x[:, 0:1] * w1[0:1, :]                           # tiny K: VPU FMAs
    for k in range(1, w1.shape[0]):
        h = h + x[:, k:k + 1] * w1[k:k + 1, :]
    h = jnp.maximum(h + c1_ref[...], 0.0)                # relu(BN1(BN0(x)@W1+c1))
    y = jnp.dot(h.astype(jnp.bfloat16), w2_ref[...],
                preferred_element_type=jnp.float32) + c2_ref[...]
    out_ref[...] = y.astype(out_ref.dtype)
    _stats_block(y, i, n_valid, tm, st_ref)


def _stage_kernel(x_ref, s_ref, t_ref, w_ref, c_ref, out_ref, *st_refs,
                  n_valid, tm):
    i = pl.program_id(0)
    h = x_ref[...].astype(jnp.float32) * s_ref[...] + t_ref[...]   # folded BN
    h = jnp.maximum(h, 0.0)
    y = jnp.dot(h.astype(jnp.bfloat16), w_ref[...],
                preferred_element_type=jnp.float32) + c_ref[...]
    out_ref[...] = y.astype(out_ref.dtype)
    if st_refs:
        _stats_block(y, i, n_valid, tm, st_refs[0])


def _run_fused12(x_pad, w1f, c1f, w2, c2, *, n_valid, tm):
    n_pad, cin = x_pad.shape
    cmid = w1f.shape[1]
    cout = w2.shape[1]
    n_tiles = n_pad // tm
    row_map = lambda i: (i, 0)
    const_map = lambda i: (0, 0)
    kern = functools.partial(_fused12_kernel, n_valid=n_valid, tm=tm)
    return pl.pallas_call(
        kern,
        grid=(n_tiles,),
        in_specs=[pl.BlockSpec((tm, cin), row_map),
                  pl.BlockSpec((cin, cmid), const_map),
                  pl.BlockSpec((1, cmid), const_map),
                  pl.BlockSpec((cmid, cout), const_map),
                  pl.BlockSpec((1, cout), const_map)],
        out_specs=(pl.BlockSpec((tm, cout), row_map),
                   pl.BlockSpec((1, 2, cout), lambda i: (i, 0, 0))),
        out_shape=(jax.ShapeDtypeStruct((n_pad, cout), jnp.bfloat16),
                   jax.ShapeDtypeStruct((n_tiles, 2, cout), jnp.float32)),
        compiler_params=pltpu.CompilerParams(
            dimension_semantics=("parallel",),
            vmem_limit_bytes=VMEM_LIMIT),
    )(x_pad, w1f, c1f, w2, c2)


def _run_stage(x, s, t, w, c, *, with_stats, n_valid, tm):
    n_pad, cin = x.shape
    cout = w.shape[1]
    n_tiles = n_pad // tm
    row_map = lambda i: (i, 0)
    const_map = lambda i: (0, 0)
    in_specs = [pl.BlockSpec((tm, cin), row_map),
                pl.BlockSpec((1, cin), const_map),
                pl.BlockSpec((1, cin), const_map),
                pl.BlockSpec((cin, cout), const_map),
                pl.BlockSpec((1, cout), const_map)]
    if with_stats:
        out_shape = (jax.ShapeDtypeStruct((n_pad, cout), jnp.bfloat16),
                     jax.ShapeDtypeStruct((n_tiles, 2, cout), jnp.float32))
        out_specs = (pl.BlockSpec((tm, cout), row_map),
                     pl.BlockSpec((1, 2, cout), lambda i: (i, 0, 0)))
    else:
        out_shape = jax.ShapeDtypeStruct((n_pad, cout), jnp.bfloat16)
        out_specs = pl.BlockSpec((tm, cout), row_map)
    kern = functools.partial(_stage_kernel, n_valid=n_valid, tm=tm)
    return pl.pallas_call(
        kern,
        grid=(n_tiles,),
        in_specs=in_specs,
        out_specs=out_specs,
        out_shape=out_shape,
        compiler_params=pltpu.CompilerParams(
            dimension_semantics=("parallel",),
            vmem_limit_bytes=VMEM_LIMIT),
    )(x, s, t, w, c)


def _bn_fold(st, n, gamma, beta):
    """Fold train-mode BatchNorm (biased batch stats) into scale / shift."""
    mu = st[0] / n
    var = jnp.maximum(st[1] / n - mu * mu, 0.0)
    s = gamma.reshape(-1) * jax.lax.rsqrt(var + BN_EPS)
    t = beta.reshape(-1) - mu * s
    return s.reshape(1, -1).astype(jnp.float32), t.reshape(1, -1).astype(jnp.float32)


def ppmodel_forward(x, params, *, tm=TM):
    n, _ = x.shape
    tm = min(tm, _round_up(n, 16))
    n_pad = _round_up(n, tm)
    x = x.astype(jnp.float32)
    x_pad = jnp.pad(x, ((0, n_pad - n), (0, 0)))

    # --- BN0 and analytic BN1 stats (y1 = BN0(x)@W1+c1 is affine in x) ------
    mu_x = jnp.mean(x, axis=0)
    xc = x - mu_x
    cov_x = (xc.T @ xc) / n                                     # biased, (3,3)
    var_x = jnp.diagonal(cov_x)
    s0 = params["g0"].reshape(-1) * jax.lax.rsqrt(var_x + BN_EPS)
    t0 = params["b0"].reshape(-1) - mu_x * s0
    w1e = s0[:, None] * params["w1"]                            # (3, 64)
    c1e = t0 @ params["w1"] + params["c1"].reshape(-1)          # (64,)
    mu1 = mu_x @ w1e + c1e
    var1 = jnp.maximum(jnp.einsum("aj,ab,bj->j", w1e, cov_x, w1e), 0.0)
    s1 = params["g1"].reshape(-1) * jax.lax.rsqrt(var1 + BN_EPS)
    t1 = params["b1"].reshape(-1) - mu1 * s1
    w1f = (w1e * s1[None, :]).astype(jnp.float32)               # BN0+BN1 folded
    c1f = (c1e * s1 + t1).reshape(1, -1).astype(jnp.float32)

    # --- fused stage (1+2): relu(x@W1f+c1f) @ W2 + c2  (+ BN2 stats) --------
    h2, st2p = _run_fused12(x_pad, w1f, c1f,
                            params["w2"].astype(jnp.bfloat16), params["c2"],
                            n_valid=n, tm=tm)
    s2, t2 = _bn_fold(jnp.sum(st2p, axis=0), n, params["g2"], params["b2"])

    # --- stage 3: relu(BN2(h2)) @ W3 + c3  (+ BN3 stats) --------------------
    h3, st3p = _run_stage(h2, s2, t2, params["w3"].astype(jnp.bfloat16),
                          params["c3"], with_stats=True, n_valid=n, tm=tm)
    s3, t3 = _bn_fold(jnp.sum(st3p, axis=0), n, params["g3"], params["b3"])

    # --- stage 4: relu(BN3(h3)) @ W4 + c4  (bf16, consumed by scatter_max) --
    out = _run_stage(h3, s3, t3, params["w4"].astype(jnp.bfloat16),
                     params["c4"], with_stats=False, n_valid=n, tm=tm)
    return out[:n]


# ----------------------------------------------------------------------------
# scatter_max: pooled[v, :] = max over points p with unq_inv[p] == v of feat[p, :]
# Points are sorted by voxel id; each voxel tile walks only its contiguous
# range of point blocks via manual double-buffered DMA (grid = voxel tiles
# only).  The masked max runs in bf16; the pooled output block is lane-dense
# (TV//2, 128): row r = [voxel v0+r | voxel v0+TV/2+r].
# ----------------------------------------------------------------------------
def _scatter_max_kernel(pstart_ref, pnum_ref, feat_hbm, inv_hbm, out_ref,
                        fbuf, ibuf, sem, *, tv, tp, d, vchunk):
    i = pl.program_id(0)
    pstart = pstart_ref[i]
    nblk = pnum_ref[i]

    out_ref[...] = jnp.full(out_ref.shape, -jnp.inf, dtype=out_ref.dtype)

    def start_fetch(b, slot):
        pltpu.make_async_copy(feat_hbm.at[pstart + b], fbuf.at[slot],
                              sem.at[0, slot]).start()
        pltpu.make_async_copy(inv_hbm.at[pstart + b], ibuf.at[slot],
                              sem.at[1, slot]).start()

    @pl.when(nblk > 0)
    def _():
        start_fetch(0, 0)

    v0 = i * tv
    neg_inf = jnp.array(-jnp.inf, dtype=out_ref.dtype)
    half_chunks = (tv // 2) // vchunk

    @pl.loop(0, nblk)
    def _(b):
        slot = b & 1
        pltpu.make_async_copy(feat_hbm.at[0], fbuf.at[slot], sem.at[0, slot]).wait()
        pltpu.make_async_copy(inv_hbm.at[0], ibuf.at[slot], sem.at[1, slot]).wait()

        @pl.when(b + 1 < nblk)
        def _():
            start_fetch(b + 1, 1 - slot)

        inv = ibuf[slot]                     # (TP, 1) int32 (padded rows = -1)
        feat = fbuf[slot]                    # (TP, D) bf16
        rows = []
        for c0 in range(0, tv, vchunk):
            vids = v0 + c0 + jax.lax.broadcasted_iota(jnp.int32, (1, vchunk), 1)
            m = inv == vids                                       # (TP, VCHUNK)
            masked = jnp.where(m[:, :, None], feat[:, None, :], neg_inf)
            rows.append(jnp.max(masked, axis=0))                  # (VCHUNK, D)
        lo = jnp.concatenate(rows[:half_chunks], axis=0)          # voxels [v0, v0+TV/2)
        hi = jnp.concatenate(rows[half_chunks:], axis=0)          # voxels [v0+TV/2, v0+TV)
        upd = jnp.concatenate([lo, hi], axis=1)                   # (TV//2, 2D) lane-dense
        out_ref[...] = jnp.maximum(out_ref[...], upd)


def scatter_max(unq_inv, feats, num_out, *, tp=TP, tv=TV):
    assert tv % (2 * VCHUNK) == 0
    n, d = feats.shape
    feats = feats.astype(jnp.bfloat16)
    order = jnp.argsort(unq_inv)
    sorted_inv = unq_inv[order].astype(jnp.int32)
    sorted_feat = feats[order]

    n_pad = _round_up(n, tp)
    v_pad = _round_up(num_out, tv)
    sorted_inv = jnp.pad(sorted_inv, (0, n_pad - n), constant_values=-1)
    sorted_feat = jnp.pad(sorted_feat, ((0, n_pad - n), (0, 0)))
    num_pblocks = n_pad // tp
    num_vtiles = v_pad // tv

    # per-voxel point ranges (sorted order) -> per-voxel-tile point-block ranges
    cnt = jnp.zeros((v_pad,), jnp.int32).at[unq_inv].add(1)
    starts = jnp.concatenate([jnp.zeros((1,), jnp.int32),
                              jnp.cumsum(cnt)[:-1].astype(jnp.int32)])
    ends = starts + cnt
    tile_start = starts.reshape(num_vtiles, tv)[:, 0]
    tile_end = ends.reshape(num_vtiles, tv)[:, -1]
    tile_cnt = tile_end - tile_start
    pstart_blk = jnp.clip(tile_start // tp, 0, num_pblocks - 1).astype(jnp.int32)
    plast_blk = jnp.clip((tile_end - 1) // tp, 0, num_pblocks - 1).astype(jnp.int32)
    pnum_blk = jnp.where(tile_cnt > 0, plast_blk - pstart_blk + 1, 0).astype(jnp.int32)

    feat_blk = sorted_feat.reshape(num_pblocks, tp, d)
    inv_blk = sorted_inv.reshape(num_pblocks, tp, 1)

    kern = functools.partial(_scatter_max_kernel, tv=tv, tp=tp, d=d, vchunk=VCHUNK)
    grid_spec = pltpu.PrefetchScalarGridSpec(
        num_scalar_prefetch=2,
        grid=(num_vtiles,),
        in_specs=[pl.BlockSpec(memory_space=pl.ANY),    # feat blocks (HBM)
                  pl.BlockSpec(memory_space=pl.ANY)],   # voxel ids   (HBM)
        out_specs=pl.BlockSpec((tv // 2, 2 * d), lambda i, ps, pn: (i, 0)),
        scratch_shapes=[pltpu.VMEM((2, tp, d), jnp.bfloat16),
                        pltpu.VMEM((2, tp, 1), jnp.int32),
                        pltpu.SemaphoreType.DMA((2, 2))])
    packed = pl.pallas_call(
        kern,
        grid_spec=grid_spec,
        out_shape=jax.ShapeDtypeStruct((v_pad // 2, 2 * d), jnp.bfloat16),
        compiler_params=pltpu.CompilerParams(
            dimension_semantics=("parallel",),
            vmem_limit_bytes=VMEM_LIMIT),
    )(pstart_blk, pnum_blk, feat_blk, inv_blk)

    # un-interleave the lane-dense packing: row r of tile t holds voxels
    # t*TV + r (lanes [0:D)) and t*TV + TV/2 + r (lanes [D:2D)).
    pooled = packed.reshape(num_vtiles, tv // 2, 2, d).transpose(0, 2, 1, 3)
    pooled = pooled.reshape(v_pad, d).astype(jnp.float32)
    return pooled[:num_out]


# ----------------------------------------------------------------------------
# parameter init (deterministic, PyTorch-default-like)
# ----------------------------------------------------------------------------
def init_params(key, fea_dim=3, out_pt_fea_dim=64):
    dims = [(fea_dim, 64), (64, 128), (128, 256), (256, out_pt_fea_dim)]
    params = {
        "g0": jnp.ones((1, fea_dim), jnp.float32),
        "b0": jnp.zeros((1, fea_dim), jnp.float32),
    }
    for i, (din, dout) in enumerate(dims, start=1):
        key, k1, k2 = jax.random.split(key, 3)
        bound = 1.0 / (din ** 0.5)
        params[f"w{i}"] = jax.random.uniform(k1, (din, dout), jnp.float32, -bound, bound)
        params[f"c{i}"] = jax.random.uniform(k2, (1, dout), jnp.float32, -bound, bound)
        if i < 4:
            params[f"g{i}"] = jnp.ones((1, dout), jnp.float32)
            params[f"b{i}"] = jnp.zeros((1, dout), jnp.float32)
    return params


# ----------------------------------------------------------------------------
# full forward (glue in plain JAX, hot paths in Pallas)
# ----------------------------------------------------------------------------
def cylinder_fea_forward(pt_fea_list, xy_ind_list, params, grid_size, max_unique):
    # F.pad(xy_ind[i], (1,0), value=i) then cat
    cat_ind = jnp.concatenate(
        [jnp.pad(ind, ((0, 0), (1, 0)), constant_values=i)
         for i, ind in enumerate(xy_ind_list)], axis=0).astype(jnp.int32)
    cat_fea = jnp.concatenate(pt_fea_list, axis=0).astype(jnp.float32)

    # torch.randperm shuffle omitted (outputs are permutation-invariant).

    gx, gy = grid_size
    key1d = (cat_ind[:, 0] * gx + cat_ind[:, 1]) * gy + cat_ind[:, 2]
    # NOTE: max_unique must upper-bound the true unique count (jnp.unique with
    # a static size truncates silently otherwise).
    unq_key, unq_inv = jnp.unique(key1d, return_inverse=True,
                                  size=max_unique, fill_value=-1)
    unq_inv = unq_inv.reshape(-1).astype(jnp.int32)

    valid = unq_key >= 0
    b_idx = jnp.where(valid, unq_key // (gx * gy), -1)
    x_idx = jnp.where(valid, (unq_key // gy) % gx, -1)
    y_idx = jnp.where(valid, unq_key % gy, -1)
    unq = jnp.stack([b_idx, x_idx, y_idx], axis=1).astype(jnp.int32)

    processed = ppmodel_forward(cat_fea, params)              # tiled Pallas MLP (bf16 out)
    pooled = scatter_max(unq_inv, processed, max_unique)      # sorted-segment Pallas max
    pooled = jnp.where(valid[:, None], pooled, 0.0)           # zero padded slots

    # fea_compre is None -> pooled data returned directly
    return unq, pooled


# ----------------------------------------------------------------------------
# pure-JAX reference (f32 end-to-end) for a loose numerical check
# ----------------------------------------------------------------------------
def _reference_forward(pt_fea_list, xy_ind_list, params, grid_size, max_unique):
    cat_ind = jnp.concatenate(
        [jnp.pad(ind, ((0, 0), (1, 0)), constant_values=i)
         for i, ind in enumerate(xy_ind_list)], axis=0).astype(jnp.int32)
    cat_fea = jnp.concatenate(pt_fea_list, axis=0).astype(jnp.float32)
    gx, gy = grid_size
    key1d = (cat_ind[:, 0] * gx + cat_ind[:, 1]) * gy + cat_ind[:, 2]
    unq_key, unq_inv = jnp.unique(key1d, return_inverse=True,
                                  size=max_unique, fill_value=-1)
    unq_inv = unq_inv.reshape(-1)
    valid = unq_key >= 0
    unq = jnp.stack([jnp.where(valid, unq_key // (gx * gy), -1),
                     jnp.where(valid, (unq_key // gy) % gx, -1),
                     jnp.where(valid, unq_key % gy, -1)], axis=1).astype(jnp.int32)

    def bn(h, g, b):
        mu = jnp.mean(h, axis=0)
        var = jnp.mean((h - mu) ** 2, axis=0)
        return (h - mu) * jax.lax.rsqrt(var + BN_EPS) * g.reshape(-1) + b.reshape(-1)

    p = params
    h = bn(cat_fea, p["g0"], p["b0"])
    h = h @ p["w1"] + p["c1"].reshape(-1)
    h = jnp.maximum(bn(h, p["g1"], p["b1"]), 0.0)
    h = h @ p["w2"] + p["c2"].reshape(-1)
    h = jnp.maximum(bn(h, p["g2"], p["b2"]), 0.0)
    h = h @ p["w3"] + p["c3"].reshape(-1)
    h = jnp.maximum(bn(h, p["g3"], p["b3"]), 0.0)
    h = h @ p["w4"] + p["c4"].reshape(-1)
    pooled = jax.ops.segment_max(h, unq_inv, num_segments=max_unique)
    pooled = jnp.where(valid[:, None], pooled, 0.0)
    return unq, pooled


if __name__ == "__main__":
    key = jax.random.PRNGKey(0)
    B, N_PER_BATCH, FEA_DIM, OUT_DIM = 2, 512, 3, 64
    GRID = (16, 16)
    MAX_UNQ = B * GRID[0] * GRID[1]   # hard upper bound on unique voxels (512)

    kp, kf, ki = jax.random.split(key, 3)
    params = init_params(kp, FEA_DIM, OUT_DIM)

    kfs = jax.random.split(kf, B)
    kis = jax.random.split(ki, B)
    pt_fea = [jax.random.normal(kfs[b], (N_PER_BATCH, FEA_DIM), jnp.float32)
              for b in range(B)]
    xy_ind = [jnp.stack(
        [jax.random.randint(kis[b], (N_PER_BATCH,), 0, GRID[0]),
         jax.random.randint(jax.random.fold_in(kis[b], 1), (N_PER_BATCH,), 0, GRID[1])],
        axis=1).astype(jnp.int32) for b in range(B)]

    unq, pooled = cylinder_fea_forward(pt_fea, xy_ind, params, GRID, MAX_UNQ)
    jax.block_until_ready((unq, pooled))

    assert unq.shape == (MAX_UNQ, 3) and unq.dtype == jnp.int32
    assert pooled.shape == (MAX_UNQ, OUT_DIM) and pooled.dtype == jnp.float32
    assert bool(jnp.all(jnp.isfinite(pooled)))

    unq_ref, pooled_ref = _reference_forward(pt_fea, xy_ind, params, GRID, MAX_UNQ)
    assert bool(jnp.all(unq == unq_ref))
    err = float(jnp.max(jnp.abs(pooled - pooled_ref)))
    assert err < 0.25, f"max abs err vs reference: {err}"
    print("KERNEL_OK")
</pallas_src>

<mosaic_0001>
module attributes {stable_mosaic.version = 11 : i64} {
  func.func @_fused12_kernel(%arg0: i32, %arg1: memref<512x3xf32, #tpu.memory_space<vmem>>, %arg2: memref<3x64xf32, #tpu.memory_space<vmem>>, %arg3: memref<1x64xf32, #tpu.memory_space<vmem>>, %arg4: memref<64x128xbf16, #tpu.memory_space<vmem>>, %arg5: memref<1x128xf32, #tpu.memory_space<vmem>>, %arg6: memref<512x128xbf16, #tpu.memory_space<vmem>>, %arg7: memref<1x2x128xf32, #tpu.memory_space<vmem>>) attributes {dimension_semantics = [#tpu.dimension_semantics<parallel>], iteration_bounds = array<i64: 2>, scalar_prefetch = 0 : i64, scratch_operands = 0 : i64, tpu.core_type = #tpu.core_type<tc>, window_params = [{transform_indices = @transform_0, window_bounds = array<i64: 512, 3>}, {pipeline_mode = #tpu.pipeline_mode<synchronous>, transform_indices = @transform_1, window_bounds = array<i64: 3, 64>}, {pipeline_mode = #tpu.pipeline_mode<synchronous>, transform_indices = @transform_2, window_bounds = array<i64: 1, 64>}, {pipeline_mode = #tpu.pipeline_mode<synchronous>, transform_indices = @transform_3, window_bounds = array<i64: 64, 128>}, {pipeline_mode = #tpu.pipeline_mode<synchronous>, transform_indices = @transform_4, window_bounds = array<i64: 1, 128>}, {transform_indices = @transform_5, window_bounds = array<i64: 512, 128>}, {transform_indices = @transform_6, window_bounds = array<i64: 1, 2, 128>}]} {
    %c0 = arith.constant 0 : index
    %c0_0 = arith.constant 0 : index
    %0 = vector.load %arg1[%c0, %c0_0] : memref<512x3xf32, #tpu.memory_space<vmem>>, vector<512x3xf32>
    %c0_1 = arith.constant 0 : index
    %c0_2 = arith.constant 0 : index
    %1 = vector.load %arg2[%c0_1, %c0_2] : memref<3x64xf32, #tpu.memory_space<vmem>>, vector<3x64xf32>
    %2 = vector.extract_strided_slice %0 {offsets = [0, 0], sizes = [512, 1], strides = [1, 1]} : vector<512x3xf32> to vector<512x1xf32>
    %3 = vector.extract_strided_slice %1 {offsets = [0, 0], sizes = [1, 64], strides = [1, 1]} : vector<3x64xf32> to vector<1x64xf32>
    %4 = vector.broadcast %2 : vector<512x1xf32> to vector<512x64xf32>
    %5 = vector.broadcast %3 : vector<1x64xf32> to vector<512x64xf32>
    %6 = arith.mulf %4, %5 : vector<512x64xf32>
    %7 = vector.extract_strided_slice %0 {offsets = [0, 1], sizes = [512, 1], strides = [1, 1]} : vector<512x3xf32> to vector<512x1xf32>
    %8 = vector.extract_strided_slice %1 {offsets = [1, 0], sizes = [1, 64], strides = [1, 1]} : vector<3x64xf32> to vector<1x64xf32>
    %9 = vector.broadcast %7 : vector<512x1xf32> to vector<512x64xf32>
    %10 = vector.broadcast %8 : vector<1x64xf32> to vector<512x64xf32>
    %11 = arith.mulf %9, %10 : vector<512x64xf32>
    %12 = arith.addf %6, %11 : vector<512x64xf32>
    %13 = vector.extract_strided_slice %0 {offsets = [0, 2], sizes = [512, 1], strides = [1, 1]} : vector<512x3xf32> to vector<512x1xf32>
    %14 = vector.extract_strided_slice %1 {offsets = [2, 0], sizes = [1, 64], strides = [1, 1]} : vector<3x64xf32> to vector<1x64xf32>
    %15 = vector.broadcast %13 : vector<512x1xf32> to vector<512x64xf32>
    %16 = vector.broadcast %14 : vector<1x64xf32> to vector<512x64xf32>
    %17 = arith.mulf %15, %16 : vector<512x64xf32>
    %18 = arith.addf %12, %17 : vector<512x64xf32>
    %c0_3 = arith.constant 0 : index
    %c0_4 = arith.constant 0 : index
    %19 = vector.load %arg3[%c0_3, %c0_4] : memref<1x64xf32, #tpu.memory_space<vmem>>, vector<1x64xf32>
    %20 = vector.broadcast %19 : vector<1x64xf32> to vector<512x64xf32>
    %21 = arith.addf %18, %20 : vector<512x64xf32>
    %cst = arith.constant 0.000000e+00 : f32
    %22 = vector.broadcast %cst : f32 to vector<512x64xf32>
    %23 = arith.maximumf %21, %22 : vector<512x64xf32>
    %24 = arith.truncf %23 : vector<512x64xf32> to vector<512x64xbf16>
    %c0_5 = arith.constant 0 : index
    %c0_6 = arith.constant 0 : index
    %25 = vector.load %arg4[%c0_5, %c0_6] : memref<64x128xbf16, #tpu.memory_space<vmem>>, vector<64x128xbf16>
    %cst_7 = arith.constant dense<0.000000e+00> : vector<512x128xf32>
    %26 = tpu.matmul %24, %25, %cst_7 {dimension_numbers = #tpu.dot_dimension_numbers<[1], [0], [0], [1], [0, 0, 1, 1], [], []>} : vector<512x64xbf16>, vector<64x128xbf16>, vector<512x128xf32> -> vector<512x128xf32>
    %c0_8 = arith.constant 0 : index
    %c0_9 = arith.constant 0 : index
    %27 = vector.load %arg5[%c0_8, %c0_9] : memref<1x128xf32, #tpu.memory_space<vmem>>, vector<1x128xf32>
    %28 = vector.broadcast %27 : vector<1x128xf32> to vector<512x128xf32>
    %29 = arith.addf %26, %28 : vector<512x128xf32>
    %30 = arith.truncf %29 : vector<512x128xf32> to vector<512x128xbf16>
    %c0_10 = arith.constant 0 : index
    %c0_11 = arith.constant 0 : index
    %31 = vector.load %arg6[%c0_10, %c0_11] : memref<512x128xbf16, #tpu.memory_space<vmem>>, vector<512x128xbf16>
    tpu.vector_store %arg6[%c0_10, %c0_11], %30 {strides = array<i32>} : memref<512x128xbf16, #tpu.memory_space<vmem>>, vector<512x128xbf16>,
    %c512_i32 = arith.constant 512 : i32
    %32 = arith.muli %arg0, %c512_i32 : i32
    %33 = tpu.iota {dimensions = array<i32: 0>} : vector<512x1xi32>
    %34 = vector.broadcast %32 : i32 to vector<512x1xi32>
    %35 = arith.addi %34, %33 : vector<512x1xi32>
    %c1024_i32 = arith.constant 1024 : i32
    %36 = vector.broadcast %c1024_i32 : i32 to vector<512x1xi32>
    %37 = arith.cmpi slt, %35, %36 : vector<512x1xi32>
    %cst_12 = arith.constant 0.000000e+00 : f32
    %38 = vector.shape_cast %37 : vector<512x1xi1> to vector<512x1xi1>
    %39 = vector.broadcast %38 : vector<512x1xi1> to vector<512x128xi1>
    %40 = vector.broadcast %cst_12 : f32 to vector<512x128xf32>
    %41 = arith.select %39, %29, %40 : vector<512x128xi1>, vector<512x128xf32>
    %cst_13 = arith.constant dense<0.000000e+00> : vector<128xf32>
    %42 = vector.multi_reduction <add>, %41, %cst_13 [0] : vector<512x128xf32> to vector<128xf32>
    %43 = vector.shape_cast %42 : vector<128xf32> to vector<1x128xf32>
    %44 = arith.mulf %41, %41 : vector<512x128xf32>
    %cst_14 = arith.constant dense<0.000000e+00> : vector<128xf32>
    %45 = vector.multi_reduction <add>, %44, %cst_14 [0] : vector<512x128xf32> to vector<128xf32>
    %46 = vector.shape_cast %45 : vector<128xf32> to vector<1x128xf32>
    %47 = tpu.concatenate %43, %46 in 0 : vector<1x128xf32>, vector<1x128xf32> -> vector<2x128xf32>
    %48 = vector.shape_cast %47 : vector<2x128xf32> to vector<1x2x128xf32>
    %c0_15 = arith.constant 0 : index
    %c0_16 = arith.constant 0 : index
    %c0_17 = arith.constant 0 : index
    %49 = vector.load %arg7[%c0_15, %c0_16, %c0_17] : memref<1x2x128xf32, #tpu.memory_space<vmem>>, vector<1x2x128xf32>
    tpu.vector_store %arg7[%c0_15, %c0_16, %c0_17], %48 {strides = array<i32>} : memref<1x2x128xf32, #tpu.memory_space<vmem>>, vector<1x2x128xf32>,
    return
  }
  func.func @transform_0(%arg0: i32) -> (i32, i32) {
    %c0_i32 = arith.constant 0 : i32
    %c0_i32_0 = arith.constant 0 : i32
    return %arg0, %c0_i32 : i32, i32
  }
  func.func @transform_1(%arg0: i32) -> (i32, i32) {
    %c0_i32 = arith.constant 0 : i32
    %c0_i32_0 = arith.constant 0 : i32
    %c0_i32_1 = arith.constant 0 : i32
    return %c0_i32, %c0_i32_0 : i32, i32
  }
  func.func @transform_2(%arg0: i32) -> (i32, i32) {
    %c0_i32 = arith.constant 0 : i32
    %c0_i32_0 = arith.constant 0 : i32
    %c0_i32_1 = arith.constant 0 : i32
    return %c0_i32, %c0_i32_0 : i32, i32
  }
  func.func @transform_3(%arg0: i32) -> (i32, i32) {
    %c0_i32 = arith.constant 0 : i32
    %c0_i32_0 = arith.constant 0 : i32
    %c0_i32_1 = arith.constant 0 : i32
    return %c0_i32, %c0_i32_0 : i32, i32
  }
  func.func @transform_4(%arg0: i32) -> (i32, i32) {
    %c0_i32 = arith.constant 0 : i32
    %c0_i32_0 = arith.constant 0 : i32
    %c0_i32_1 = arith.constant 0 : i32
    return %c0_i32, %c0_i32_0 : i32, i32
  }
  func.func @transform_5(%arg0: i32) -> (i32, i32) {
    %c0_i32 = arith.constant 0 : i32
    %c0_i32_0 = arith.constant 0 : i32
    return %arg0, %c0_i32 : i32, i32
  }
  func.func @transform_6(%arg0: i32) -> (i32, i32, i32) {
    %c0_i32 = arith.constant 0 : i32
    %c0_i32_0 = arith.constant 0 : i32
    %c0_i32_1 = arith.constant 0 : i32
    return %arg0, %c0_i32, %c0_i32_0 : i32, i32, i32
  }
}

</mosaic_0001>

<bundles_post_ra>
// kernel: tpu_custom_call.1
= control target key start
LH: loop header
LB: loop body
LE: loop exit
PB: predicated region body
PF: predicated region fallthrough
CT: control target
= control target key end

     0   :  { %12 = vsyncpa [#allocation3], 0  ;;  %s5411_s0 = inlined_call_operand.vmem [shape: f32[1024,3], index: 0, kind: input, shape index: {}]   ;;  %s5412_s1 = inlined_call_operand.vmem [shape: f32[3,64], index: 1, kind: input, shape index: {}]   ;;  %s5413_s2 = inlined_call_operand.vmem [shape: f32[1,64], index: 2, kind: input, shape index: {}]   ;;  %s5414_s3 = inlined_call_operand.vmem [shape: bf16[64,128], index: 3, kind: input, shape index: {}]   ;;  %s5415_s4 = inlined_call_operand.vmem [shape: f32[1,128], index: 4, kind: input, shape index: {}]   ;;  %s5416_s5 = inlined_call_operand.hbm [shape: bf16[1024,128], index: 5, kind: output, shape index: {0}]   ;;  %s5417_s6 = inlined_call_operand.hbm [shape: f32[2,2,128], index: 6, kind: output, shape index: {1}]  }
   0x1   :  { %14 = vsyncpa [#allocation3 + $0x1], 0 }
   0x2   :  { %15 = vsyncpa [#allocation5], 0 }
   0x3   :  { %17 = vsyncpa [#allocation5 + $0x1], 0  ;;  %s3852_s21 = smov 0   ;;  %s3854_s22 = smov 0  }
   0x4   :  { %s3856_s23 = smov 0   ;;  %s3858_s24 = smov 0  }
   0x5 LB: > { %s3873_s25 = sadd.s32 4294967295, %s3808_s24   ;;  %s3124_s26 = sadd.s32 4294967294, %s3808_s24   ;;  %s3808_s24 = sphi %s3858_s24, %s5590_s24   ;;  %s3804_s23 = sphi %s3856_s23, %s5589_s23   ;;  %s3800_s22 = sphi %s3854_s22, %s5588_s22   ;;  %s3796_s21 = sphi %s3852_s21, %s5587_s21  }
   0x6   : > { %s3877_s27 = sadd.s32 1, %s3808_s24   ;;  %s140_s28 = sadd.s32 1, %s3804_s23 }
   0x7   : > { %s137_s29 = ssub.s32 %s3808_s24, %s3877_s27  ;;  %p150_p0 = scmp.ne.s32.totalorder %s3804_s23, %s3800_s22 }
   0x8   : > { %p138_p1 = scmp.eq.s32.totalorder %s137_s29, 0  ;;  %p151_p2 = scmp.eq.s32.totalorder %s3873_s25, 1 }
   0x9   : > { %p156_p3 = scmp.ne.s32.totalorder %s3800_s22, %s3796_s21  ;;  %p157_p4 = scmp.eq.s32.totalorder %s3124_s26, 1 }
   0xa   : > { %s3888_s30 = scalar_select %p138_p1, %s3804_s23, %s140_s28  }
   0xb   : > { %p3890_p5 = por %p151_p2, %p150_p0  ;;  %p3894_p6 = por %p157_p4, %p156_p3 }
   0xc   : > { %p3127_p7 = scmp.ge.s32.totalorder %s3808_s24, 1  ;;  %p222_p8 = scmp.lt.s32.totalorder %s3808_s24, 3 }
   0xe   : > { %p223_p9 = pnand %p3127_p7, %p222_p8 }
  0x10   : > { %226 = sbr.rel (%p223_p9) target bundleno = 886 (0x376), region = 40 }
  0x17   : > { %s3130_s9 = sshll.u32 %s3873_s25, 6  ;;  %v3810_v0 = vmov 0   ;;  %vm1700_vm0 = vcmask 523264   ;;  %s5001_s14 = sand.u32 1, %s3800_s22  }
  0x18   : > { %3664 = vset.pattern.permute.xlu1 %v3810_v0  ;;  %3663 = vset.pattern.permute.xlu0 %v3810_v0  ;;  %p258_p10 = scmp.lt.s32.totalorder %s3130_s9, 127  ;;  %s3128_s17 = sshll.u32 %s5001_s14, 8 }
  0x19   : > { %s5064_s18 = scalar_lea.vmem [#allocation2], %s3128_s17  ;;  %s3306_s26 = sshll.u32 %s3873_s25, 12 }
  0x1a   : > { %s5592_s9 = smov (!%p258_p10, %s3130_s9), 127  ;;  %s3017_s28 = sshll.u32 %s5064_s18, 4  ;;  %s5335_s28 = int_to_ptr.vmem [resolvable:$true] %s3017_s28 }
  0x1b   : > { %s3131_s10 = sshll.u32 %s5592_s9, 3  ;;  %s2999_s11 = scalar_lea.sflag [#allocation3], %s5001_s14 }
  0x1c   : > { %s3904_s13 = scalar_lea.vmem %s5411_s0, %s3131_s10  ;;  %s5333_s10 = scalar_lea.hbm %s5416_s5, %s3306_s26 }
  0x1d   : > { %v3907_v1 = vld [vmem:[%s3904_s13 + $0x10] sm:$0xff]  ;;  %v3910_v2 = vld [vmem:[%s3904_s13] sm:$0xff]  ;;  %v3915_v3 = vld [vmem:[%s3904_s13 + $0x18] sm:$0xff]  ;;  %s3714_s12 = scalar_lea.vmem %s5335_s28, 4096 }
  0x1e   : > { %342 = vperm.xlu1 %3664, %v3907_v1   ;;  %332 = vperm.xlu0 %3663, %v3910_v2   ;;  %v3918_v4 = vld [vmem:[%s3904_s13 + $0x8] sm:$0xff]  ;;  %v3926_v6 = vld [vmem:[%s3904_s13 + $0x20] sm:$0xff]  ;;  %v3931_v7 = vld [vmem:[%s3904_s13 + $0x38] sm:$0xff]  ;;  %p3715_p11 = scmp.ne.s32.totalorder %s5335_s28, %s3714_s12 }
  0x1f   : > { %v3923_v5 = vld [vmem:[%s3904_s13 + $0x28] sm:$0xff]  ;;  %v3934_v8 = vld [vmem:[%s3904_s13 + $0x30] sm:$0xff]  ;;  %v3942_v10 = vld [vmem:[%s3904_s13 + $0x40] sm:$0xff] }
  0x20   : > { %v3939_v9 = vld [vmem:[%s3904_s13 + $0x48] sm:$0xff]  ;;  %v3947_v11 = vld [vmem:[%s3904_s13 + $0x58] sm:$0xff]  ;;  %v3950_v12 = vld [vmem:[%s3904_s13 + $0x50] sm:$0xff]  ;;  %p3716_p12 = pnand %p3715_p11, %p3890_p5 }
  0x21   : > { %v3955_v13 = vld [vmem:[%s3904_s13 + $0x68] sm:$0xff]  ;;  %v3958_v14 = vld [vmem:[%s3904_s13 + $0x60] sm:$0xff]  ;;  %v3963_v15 = vld [vmem:[%s3904_s13 + $0x78] sm:$0xff] }
  0x22   : > { %347 = vperm.xlu1 %3664, %v3915_v3   ;;  %337 = vperm.xlu0 %3663, %v3918_v4   ;;  %v3966_v16 = vld [vmem:[%s3904_s13 + $0x70] sm:$0xff]  ;;  %v3971_v17 = vld [vmem:[%s3904_s13 + $0x88] sm:$0xff]  ;;  %v3974_v18 = vld [vmem:[%s3904_s13 + $0x80] sm:$0xff]  ;;  %p3717_p13 = pneg %p3716_p12 }
  0x23   : > { %v3979_v19 = vld [vmem:[%s3904_s13 + $0x98] sm:$0xff]  ;;  %v3982_v20 = vld [vmem:[%s3904_s13 + $0x90] sm:$0xff]  ;;  %v3987_v21 = vld [vmem:[%s3904_s13 + $0xa8] sm:$0xff] }
  0x24   : > { %v3990_v22 = vld [vmem:[%s3904_s13 + $0xa0] sm:$0xff]  ;;  %v3995_v23 = vld [vmem:[%s3904_s13 + $0xb8] sm:$0xff]  ;;  %v3998_v24 = vld [vmem:[%s3904_s13 + $0xb0] sm:$0xff] }
  0x25   : > { %v4003_v25 = vld [vmem:[%s3904_s13 + $0xc8] sm:$0xff]  ;;  %v4006_v26 = vld [vmem:[%s3904_s13 + $0xc0] sm:$0xff]  ;;  %v4011_v27 = vld [vmem:[%s3904_s13 + $0xd8] sm:$0xff] }
  0x26   : > { %357 = vperm.xlu1 %3664, %v3923_v5   ;;  %352 = vperm.xlu0 %3663, %v3926_v6   ;;  %v4014_v28 = vld [vmem:[%s3904_s13 + $0xd0] sm:$0xff]  ;;  %v4019_v29 = vld [vmem:[%s3904_s13 + $0xe8] sm:$0xff]  ;;  %v4022_v30 = vld [vmem:[%s3904_s13 + $0xe0] sm:$0xff] }
  0x27   : > { %v4027_v31 = vld [vmem:[%s3904_s13 + $0xf8] sm:$0xff]  ;;  %v4030_v32 = vld [vmem:[%s3904_s13 + $0xf0] sm:$0xff]  ;;  %v4035_v33 = vld [vmem:[%s3904_s13 + $0x108] sm:$0xff] }
  0x28   : > { %v4038_v34 = vld [vmem:[%s3904_s13 + $0x100] sm:$0xff]  ;;  %v4043_v35 = vld [vmem:[%s3904_s13 + $0x118] sm:$0xff]  ;;  %v4046_v36 = vld [vmem:[%s3904_s13 + $0x110] sm:$0xff] }
  0x29   : > { %v4051_v37 = vld [vmem:[%s3904_s13 + $0x128] sm:$0xff]  ;;  %v4054_v38 = vld [vmem:[%s3904_s13 + $0x120] sm:$0xff]  ;;  %v4059_v39 = vld [vmem:[%s3904_s13 + $0x138] sm:$0xff] }
  0x2a   : > { %367 = vperm.xlu1 %3664, %v3931_v7   ;;  %362 = vperm.xlu0 %3663, %v3934_v8   ;;  %v4062_v40 = vld [vmem:[%s3904_s13 + $0x130] sm:$0xff]  ;;  %v4067_v41 = vld [vmem:[%s3904_s13 + $0x148] sm:$0xff]  ;;  %v4070_v42 = vld [vmem:[%s3904_s13 + $0x140] sm:$0xff] }
  0x2b   : > { %v4075_v43 = vld [vmem:[%s3904_s13 + $0x158] sm:$0xff]  ;;  %v4078_v44 = vld [vmem:[%s3904_s13 + $0x150] sm:$0xff]  ;;  %v4083_v45 = vld [vmem:[%s3904_s13 + $0x168] sm:$0xff] }
  0x2c   : > { %5433 = vst [vmem:[#allocation8_spill] sm:$0xff] %v4078_v44  ;;  %v4086_v46 = vld [vmem:[%s3904_s13 + $0x160] sm:$0xff]  ;;  %v4091_v47 = vld [vmem:[%s3904_s13 + $0x178] sm:$0xff]  ;;  %v4094_v48 = vld [vmem:[%s3904_s13 + $0x170] sm:$0xff] }
  0x2d   : > { %5434 = vst [vmem:[#allocation9_spill] sm:$0xff] %v4094_v48  ;;  %v4099_v49 = vld [vmem:[%s3904_s13 + $0x188] sm:$0xff]  ;;  %v4102_v50 = vld [vmem:[%s3904_s13 + $0x180] sm:$0xff]  ;;  %v4107_v51 = vld [vmem:[%s3904_s13 + $0x198] sm:$0xff] }
  0x2e   : > { %377 = vperm.xlu1 %3664, %v3939_v9   ;;  %372 = vperm.xlu0 %3663, %v3942_v10   ;;  %5435 = vst [vmem:[#allocation10_spill] sm:$0xff] %v4102_v50  ;;  %v4110_v52 = vld [vmem:[%s3904_s13 + $0x190] sm:$0xff]  ;;  %v4115_v53 = vld [vmem:[%s3904_s13 + $0x1a8] sm:$0xff]  ;;  %v4118_v54 = vld [vmem:[%s3904_s13 + $0x1a0] sm:$0xff] }
  0x2f   : > { %5436 = vst [vmem:[#allocation11_spill] sm:$0xff] %v4110_v52  ;;  %v4123_v55 = vld [vmem:[%s3904_s13 + $0x1b8] sm:$0xff]  ;;  %v319_v56 = vld [vmem:[%s3904_s13 + $0x1b0] sm:$0xff]  ;;  %v4128_v57 = vld [vmem:[%s3904_s13 + $0x1c8] sm:$0xff] }
  0x30   : > { %v4131_v58 = vld [vmem:[%s3904_s13 + $0x1c0] sm:$0xff]  ;;  %v4136_v59 = vld [vmem:[%s3904_s13 + $0x1d8] sm:$0xff]  ;;  %v323_v60 = vld [vmem:[%s3904_s13 + $0x1d0] sm:$0xff] }
  0x31   : > { %v4141_v61 = vld [vmem:[%s3904_s13 + $0x1e8] sm:$0xff]  ;;  %v4144_v62 = vld [vmem:[%s3904_s13 + $0x1e0] sm:$0xff]  ;;  %v4149_v63 = vld [vmem:[%s3904_s13 + $0x1f8] sm:$0xff] }
  0x32   : > { %387 = vperm.xlu1 %3664, %v3947_v11   ;;  %382 = vperm.xlu0 %3663, %v3950_v12   ;;  %5437 = vst [vmem:[#allocation12_spill] sm:$0xff] %v4141_v61  ;;  %v327_v0 = vld [vmem:[%s3904_s13 + $0x1f0] sm:$0xff] }
  0x36   : > { %397 = vperm.xlu1 %3664, %v3955_v13   ;;  %392 = vperm.xlu0 %3663, %v3958_v14  }
  0x3a   : > { %407 = vperm.xlu1 %3664, %v3963_v15   ;;  %402 = vperm.xlu0 %3663, %v3966_v16  }
  0x3e   : > { %417 = vperm.xlu1 %3664, %v3971_v17   ;;  %412 = vperm.xlu0 %3663, %v3974_v18  }
  0x42   : > { %427 = vperm.xlu1 %3664, %v3979_v19   ;;  %422 = vperm.xlu0 %3663, %v3982_v20  }
  0x46   : > { %437 = vperm.xlu1 %3664, %v3987_v21   ;;  %432 = vperm.xlu0 %3663, %v3990_v22  }
  0x4a   : > { %447 = vperm.xlu1 %3664, %v3995_v23   ;;  %442 = vperm.xlu0 %3663, %v3998_v24  }
  0x4e   : > { %457 = vperm.xlu1 %3664, %v4003_v25   ;;  %452 = vperm.xlu0 %3663, %v4006_v26  }
  0x52   : > { %467 = vperm.xlu1 %3664, %v4011_v27   ;;  %462 = vperm.xlu0 %3663, %v4014_v28  }
  0x56   : > { %477 = vperm.xlu1 %3664, %v4019_v29   ;;  %472 = vperm.xlu0 %3663, %v4022_v30  }
  0x5a   : > { %487 = vperm.xlu1 %3664, %v4027_v31   ;;  %482 = vperm.xlu0 %3663, %v4030_v32  }
  0x5e   : > { %497 = vperm.xlu1 %3664, %v4035_v33   ;;  %492 = vperm.xlu0 %3663, %v4038_v34  }
  0x62   : > { %507 = vperm.xlu1 %3664, %v4043_v35   ;;  %502 = vperm.xlu0 %3663, %v4046_v36  }
  0x66   : > { %517 = vperm.xlu1 %3664, %v4051_v37   ;;  %512 = vperm.xlu0 %3663, %v4054_v38  }
  0x6a   : > { %527 = vperm.xlu1 %3664, %v4059_v39   ;;  %522 = vperm.xlu0 %3663, %v4062_v40  }
  0x6e   : > { %537 = vperm.xlu1 %3664, %v4067_v41   ;;  %532 = vperm.xlu0 %3663, %v4070_v42  }
  0x72   : > { %547 = vperm.xlu1 %3664, %v4075_v43   ;;  %542 = vperm.xlu0 %3663, %v4078_v44  }
  0x76   : > { %557 = vperm.xlu1 %3664, %v4083_v45   ;;  %552 = vperm.xlu0 %3663, %v4086_v46  }
  0x7a   : > { %567 = vperm.xlu1 %3664, %v4091_v47   ;;  %562 = vperm.xlu0 %3663, %v4094_v48   ;;  %v5424_v48 = vmov 1  }
  0x7e   : > { %577 = vperm.xlu1 %3664, %v4099_v49   ;;  %572 = vperm.xlu0 %3663, %v4102_v50  }
  0x82   : > { %587 = vperm.xlu1 %3664, %v4107_v51   ;;  %582 = vperm.xlu0 %3663, %v4110_v52  }
  0x86   : > { %597 = vperm.xlu1 %3664, %v4115_v53   ;;  %592 = vperm.xlu0 %3663, %v4118_v54  }
  0x8a   : > { %607 = vperm.xlu1 %3664, %v4123_v55   ;;  %602 = vperm.xlu0 %3663, %v319_v56  }
  0x8e   : > { %617 = vperm.xlu1 %3664, %v4128_v57   ;;  %612 = vperm.xlu0 %3663, %v4131_v58  }
  0x92   : > { %627 = vperm.xlu1 %3664, %v4136_v59   ;;  %622 = vperm.xlu0 %3663, %v323_v60   ;;  %v5426_v60 = vmov 2  }
  0x96   : > { %637 = vperm.xlu1 %3664, %v4141_v61   ;;  %632 = vperm.xlu0 %3663, %v4144_v62  }
  0x9a   : > { %647 = vperm.xlu1 %3664, %v4149_v63   ;;  %642 = vperm.xlu0 %3663, %v327_v0  }
  0x9d   : > { %v4153_v56 = vpop.permute.xlu1 %342  ;;  %v4155_v52 = vpop.permute.xlu0 %332 }
  0x9e   : > { %5438 = vst [vmem:[#allocation13_spill] sm:$0xff] %v4153_v56  ;;  %5439 = vst [vmem:[#allocation14_spill] sm:$0xff] %v4155_v52  ;;  %3665 = vset.pattern.permute.xlu1 %v5424_v48  ;;  %3666 = vset.pattern.permute.xlu0 %v5426_v60 }
  0x9f   : > { %723 = vperm.xlu1 %3665, %v3918_v4   ;;  %1107 = vperm.xlu0 %3666, %v3910_v2  }
  0xa1   : > { %v4161_v61 = vpop.permute.xlu1 %347  ;;  %v4163_v44 = vpop.permute.xlu0 %337 }
  0xa2   : > { %5440 = vst [vmem:[#allocation15_spill] sm:$0xff] %v4161_v61  ;;  %5441 = vst [vmem:[#allocation16_spill] sm:$0xff] %v4163_v44  ;;  %v5458_v44 = vmov 2  }
  0xa3   : > { %727 = vperm.xlu1 %3665, %v3907_v1   ;;  %1119 = vperm.xlu0 %3666, %v3915_v3  }
  0xa5   : > { %v4167_v0 = vpop.permute.xlu1 %357  ;;  %v4169_v52 = vpop.permute.xlu0 %352 }
  0xa6   : > { %5442 = vst [vmem:[#allocation17_spill] sm:$0xff] %v4167_v0  ;;  %5443 = vst [vmem:[#allocation18_spill] sm:$0xff] %v4169_v52 }
  0xa7   : > { %735 = vperm.xlu1 %3665, %v3926_v6   ;;  %1127 = vperm.xlu0 %3666, %v3923_v5  }
  0xa9   : > { %v4173_v48 = vpop.permute.xlu1 %367  ;;  %v4175_v60 = vpop.permute.xlu0 %362 }
  0xaa   : > { %5444 = vst [vmem:[#allocation19_spill] sm:$0xff] %v4173_v48  ;;  %5445 = vst [vmem:[#allocation20_spill] sm:$0xff] %v4175_v60 }
  0xab   : > { %743 = vperm.xlu1 %3665, %v3934_v8   ;;  %1135 = vperm.xlu0 %3666, %v3931_v7  }
  0xad   : > { %v4179_v61 = vpop.permute.xlu1 %377  ;;  %v4181_v56 = vpop.permute.xlu0 %372 }
  0xae   : > { %5446 = vst [vmem:[#allocation21_spill] sm:$0xff] %v4179_v61  ;;  %5447 = vst [vmem:[#allocation22_spill] sm:$0xff] %v4181_v56 }
  0xaf   : > { %751 = vperm.xlu1 %3665, %v3942_v10   ;;  %1143 = vperm.xlu0 %3666, %v3939_v9  }
  0xb1   : > { %v4185_v52 = vpop.permute.xlu1 %387  ;;  %v4187_v0 = vpop.permute.xlu0 %382 }
  0xb2   : > { %5448 = vst [vmem:[#allocation23_spill] sm:$0xff] %v4185_v52  ;;  %5449 = vst [vmem:[#allocation24_spill] sm:$0xff] %v4187_v0 }
  0xb3   : > { %759 = vperm.xlu1 %3665, %v3950_v12   ;;  %1151 = vperm.xlu0 %3666, %v3947_v11  }
  0xb5   : > { %v4191_v60 = vpop.permute.xlu1 %397  ;;  %v4193_v48 = vpop.permute.xlu0 %392 }
  0xb6   : > { %5450 = vst [vmem:[#allocation25_spill] sm:$0xff] %v4191_v60  ;;  %5451 = vst [vmem:[#allocation26_spill] sm:$0xff] %v4193_v48 }
  0xb7   : > { %767 = vperm.xlu1 %3665, %v3958_v14   ;;  %1159 = vperm.xlu0 %3666, %v3955_v13  }
  0xb9   : > { %v4197_v56 = vpop.permute.xlu1 %407  ;;  %v4199_v61 = vpop.permute.xlu0 %402 }
  0xba   : > { %5452 = vst [vmem:[#allocation27_spill] sm:$0xff] %v4197_v56  ;;  %5453 = vst [vmem:[#allocation28_spill] sm:$0xff] %v4199_v61 }
  0xbb   : > { %775 = vperm.xlu1 %3665, %v3966_v16   ;;  %1167 = vperm.xlu0 %3666, %v3963_v15  }
  0xbd   : > { %v4203_v0 = vpop.permute.xlu1 %417  ;;  %v4205_v52 = vpop.permute.xlu0 %412 }
  0xbe   : > { %5454 = vst [vmem:[#allocation29_spill] sm:$0xff] %v4205_v52 }
  0xbf   : > { %783 = vperm.xlu1 %3665, %v3974_v18   ;;  %1171 = vperm.xlu0 %3666, %v3974_v18  }
  0xc1   : > { %v4209_v48 = vpop.permute.xlu1 %427  ;;  %v4211_v60 = vpop.permute.xlu0 %422 }
  0xc2   : > { %5455 = vst [vmem:[#allocation30_spill] sm:$0xff] %v4211_v60 }
  0xc3   : > { %791 = vperm.xlu1 %3665, %v3982_v20   ;;  %1179 = vperm.xlu0 %3666, %v3982_v20  }
  0xc5   : > { %v4215_v61 = vpop.permute.xlu1 %437  ;;  %v4217_v56 = vpop.permute.xlu0 %432 }
  0xc6   : > { %5456 = vst [vmem:[#allocation31_spill] sm:$0xff] %v4215_v61  ;;  %5457 = vst [vmem:[#allocation32_spill] sm:$0xff] %v4217_v56 }
  0xc7   : > { %3667 = vset.pattern.permute.xlu1 %v5458_v44  ;;  %1191 = vperm.xlu0 %3666, %v3987_v21  }
  0xc8   : > { %1111 = vperm.xlu1 %3667, %v3918_v4  }
  0xc9   : > { %v4222_v52 = vpop.permute.xlu1 %447  ;;  %v4224_v18 = vpop.permute.xlu0 %442 }
  0xca   : > { %5459 = vst [vmem:[#allocation33_spill] sm:$0xff] %v4224_v18 }
  0xcb   : > { %1207 = vperm.xlu0 %3666, %v4003_v25  }
  0xcc   : > { %1115 = vperm.xlu1 %3667, %v3907_v1  }
  0xcd   : > { %v4228_v60 = vpop.permute.xlu1 %457  ;;  %v4230_v20 = vpop.permute.xlu0 %452 }
  0xce   : > { %5460 = vst [vmem:[#allocation34_spill] sm:$0xff] %v4230_v20 }
  0xcf   : > { %1223 = vperm.xlu0 %3666, %v4019_v29  }
  0xd0   : > { %1123 = vperm.xlu1 %3667, %v3926_v6  }
  0xd1   : > { %v4234_v56 = vpop.permute.xlu1 %467  ;;  %v4236_v61 = vpop.permute.xlu0 %462 }
  0xd2   : > { %5461 = vst [vmem:[#allocation35_spill] sm:$0xff] %v4234_v56  ;;  %5462 = vst [vmem:[#allocation36_spill] sm:$0xff] %v4236_v61 }
  0xd3   : > { %1239 = vperm.xlu0 %3666, %v4035_v33  }
  0xd4   : > { %1131 = vperm.xlu1 %3667, %v3934_v8  }
  0xd5   : > { %v4240_v4 = vpop.permute.xlu1 %477  ;;  %v4242_v18 = vpop.permute.xlu0 %472 }
  0xd6   : > { %5463 = vst [vmem:[#allocation37_spill] sm:$0xff] %v4240_v4  ;;  %5464 = vst [vmem:[#allocation38_spill] sm:$0xff] %v4242_v18 }
  0xd7   : > { %1255 = vperm.xlu0 %3666, %v4051_v37  }
  0xd8   : > { %1139 = vperm.xlu1 %3667, %v3942_v10  }
  0xd9   : > { %v4246_v1 = vpop.permute.xlu1 %487  ;;  %v4248_v20 = vpop.permute.xlu0 %482 }
  0xda   : > { %5465 = vst [vmem:[#allocation39_spill] sm:$0xff] %v4246_v1  ;;  %5466 = vst [vmem:[#allocation40_spill] sm:$0xff] %v4248_v20 }
  0xdb   : > { %1271 = vperm.xlu0 %3666, %v4067_v41  }
  0xdc   : > { %1147 = vperm.xlu1 %3667, %v3950_v12   ;;  %v5473_v12 = vmov 1  }
  0xdd   : > { %v4252_v6 = vpop.permute.xlu1 %497  ;;  %v4254_v61 = vpop.permute.xlu0 %492 }
  0xde   : > { %5467 = vst [vmem:[#allocation41_spill] sm:$0xff] %v4252_v6  ;;  %5468 = vst [vmem:[#allocation42_spill] sm:$0xff] %v4254_v61 }
  0xdf   : > { %1287 = vperm.xlu0 %3666, %v4083_v45  }
  0xe0   : > { %1155 = vperm.xlu1 %3667, %v3958_v14  }
  0xe1   : > { %v4258_v8 = vpop.permute.xlu1 %507  ;;  %v4260_v18 = vpop.permute.xlu0 %502 }
  0xe2   : > { %5469 = vst [vmem:[#allocation43_spill] sm:$0xff] %v4258_v8  ;;  %5470 = vst [vmem:[#allocation44_spill] sm:$0xff] %v4260_v18 }
  0xe3   : > { %1303 = vperm.xlu0 %3666, %v4099_v49  }
  0xe4   : > { %1163 = vperm.xlu1 %3667, %v3966_v16  }
  0xe5   : > { %v4264_v10 = vpop.permute.xlu1 %517  ;;  %v4266_v1 = vpop.permute.xlu0 %512 }
  0xe6   : > { %5471 = vst [vmem:[#allocation45_spill] sm:$0xff] %v4264_v10  ;;  %5472 = vst [vmem:[#allocation46_spill] sm:$0xff] %v4266_v1  ;;  %v5509_v10 = vld [vmem:[#allocation8_spill] sm:$0xff] }
  0xe7   : > { %1319 = vperm.xlu0 %3666, %v4115_v53   ;;  %v3694_v53 = vld [vmem:[%s5414_s3] sm:$0xff]  }
  0xe8   : > { %3668 = vset.pattern.permute.xlu1 %v5473_v12  ;;  %3534 = vmatprep.subr.bf16.mxu0 %v3694_v53 }
  0xe9   : > { %v4270_v61 = vpop.permute.xlu1 %527  ;;  %795 = vperm.xlu1 %3668, %v3979_v19   ;;  %v4273_v14 = vpop.permute.xlu0 %522  ;;  %3535 = vmatpush3.bf16.msra.mxu0 %v3694_v53 }
  0xea   : > { %5474 = vst [vmem:[#allocation47_spill] sm:$0xff] %v4270_v61  ;;  %5475 = vst [vmem:[#allocation48_spill] sm:$0xff] %v4273_v14  ;;  %3606 = vmatprep.subr.bf16.mxu1 %v3694_v53 }
  0xeb   : > { %1335 = vperm.xlu0 %3666, %v4128_v57   ;;  %3610 = vmatpush3.bf16.msra.mxu1 %v3694_v53 }
  0xed   : > { %v4276_v8 = vpop.permute.xlu1 %537  ;;  %3669 = vset.pattern.permute.xlu1 %v5458_v44  ;;  %v4279_v16 = vpop.permute.xlu0 %532 }
  0xee   : > { %5476 = vst [vmem:[#allocation49_spill] sm:$0xff] %v4276_v8  ;;  %5477 = vst [vmem:[#allocation50_spill] sm:$0xff] %v4279_v16  ;;  %1175 = vperm.xlu1 %3669, %v3971_v17   ;;  %v3695_v16 = vld [vmem:[%s5414_s3 + $0x8] sm:$0xff]  }
  0xef   : > { %3690 = vset.pattern.permute.xlu0 %v5473_v12  ;;  %3536 = vmatprep.subr.bf16.mxu0 %v3695_v16 }
  0xf0   : > { %719 = vperm.xlu0 %3690, %v3910_v2   ;;  %3537 = vmatpush3.bf16.msra.mxu0 %v3695_v16 }
  0xf1   : > { %v4287_v61 = vpop.permute.xlu1 %547  ;;  %v4289_v57 = vpop.permute.xlu0 %542  ;;  %3607 = vmatprep.subr.bf16.mxu1 %v3695_v16 }
  0xf2   : > { %5478 = vst [vmem:[#allocation51_spill] sm:$0xff] %v4287_v61  ;;  %5479 = vst [vmem:[#allocation52_spill] sm:$0xff] %v4289_v57  ;;  %1183 = vperm.xlu1 %3669, %v3979_v19   ;;  %v3696_v19 = vld [vmem:[%s5414_s3 + $0x10] sm:$0xff]   ;;  %3611 = vmatpush3.bf16.msra.mxu1 %v3695_v16 }
  0xf3   : > { %3538 = vmatprep.subr.bf16.mxu0 %v3696_v19  ;;  %3608 = vmatprep.subr.bf16.mxu1 %v3696_v19 }
  0xf4   : > { %731 = vperm.xlu0 %3690, %v3915_v3   ;;  %3539 = vmatpush3.bf16.msra.mxu0 %v3696_v19 }
  0xf5   : > { %v4296_v8 = vpop.permute.xlu1 %557  ;;  %v4298_v2 = vpop.permute.xlu0 %552 }
  0xf6   : > { %5480 = vst [vmem:[#allocation53_spill] sm:$0xff] %v4296_v8  ;;  %5481 = vst [vmem:[#allocation54_spill] sm:$0xff] %v4298_v2  ;;  %3670 = vset.pattern.permute.xlu1 %v5473_v12  ;;  %v3697_v2 = vld [vmem:[%s5414_s3 + $0x18] sm:$0xff]   ;;  %3612 = vmatpush3.bf16.msra.mxu1 %v3696_v19 }
  0xf7   : > { %803 = vperm.xlu1 %3670, %v3987_v21   ;;  %3540 = vmatprep.subr.bf16.mxu0 %v3697_v2 }
  0xf8   : > { %739 = vperm.xlu0 %3690, %v3923_v5   ;;  %3541 = vmatpush3.bf16.msra.mxu0 %v3697_v2 }
  0xf9   : > { %v4306_v3 = vpop.permute.xlu1 %567  ;;  %v4308_v53 = vpop.permute.xlu0 %562  ;;  %3609 = vmatprep.subr.bf16.mxu1 %v3697_v2 }
  0xfa   : > { %5482 = vst [vmem:[#allocation55_spill] sm:$0xff] %v4306_v3  ;;  %5483 = vst [vmem:[#allocation56_spill] sm:$0xff] %v4308_v53  ;;  %3613 = vmatpush3.bf16.msra.mxu1 %v3697_v2 }
  0xfb   : > { %807 = vperm.xlu1 %3670, %v3998_v24  }
  0xfc   : > { %747 = vperm.xlu0 %3690, %v3931_v7  }
  0xfd   : > { %v4315_v21 = vpop.permute.xlu1 %577  ;;  %v4317_v5 = vpop.permute.xlu0 %572 }
  0xfe   : > { %5484 = vst [vmem:[#allocation57_spill] sm:$0xff] %v4315_v21  ;;  %5485 = vst [vmem:[#allocation58_spill] sm:$0xff] %v4317_v5 }
  0xff   : > { %3671 = vset.pattern.permute.xlu1 %v5458_v44 }
 0x100   : > { %1187 = vperm.xlu1 %3671, %v3990_v22   ;;  %755 = vperm.xlu0 %3690, %v3939_v9  }
 0x101   : > { %v4322_v16 = vpop.permute.xlu1 %587  ;;  %v4324_v19 = vpop.permute.xlu0 %582 }
 0x102   : > { %5486 = vst [vmem:[#allocation59_spill] sm:$0xff] %v4322_v16  ;;  %5487 = vst [vmem:[#allocation60_spill] sm:$0xff] %v4324_v19 }
 0x104   : > { %1195 = vperm.xlu1 %3671, %v3998_v24   ;;  %763 = vperm.xlu0 %3690, %v3947_v11  }
 0x105   : > { %v4328_v7 = vpop.permute.xlu1 %597  ;;  %v4330_v5 = vpop.permute.xlu0 %592 }
 0x106   : > { %5488 = vst [vmem:[#allocation61_spill] sm:$0xff] %v4328_v7  ;;  %5489 = vst [vmem:[#allocation62_spill] sm:$0xff] %v4330_v5 }
 0x108   : > { %1199 = vperm.xlu1 %3671, %v3995_v23   ;;  %771 = vperm.xlu0 %3690, %v3955_v13  }
 0x109   : > { %v4334_v2 = vpop.permute.xlu1 %607  ;;  %v4336_v21 = vpop.permute.xlu0 %602 }
 0x10a   : > { %5490 = vst [vmem:[#allocation63_spill] sm:$0xff] %v4334_v2  ;;  %5491 = vst [vmem:[#allocation64_spill] sm:$0xff] %v4336_v21 }
 0x10c   : > { %3672 = vset.pattern.permute.xlu1 %v5473_v12  ;;  %779 = vperm.xlu0 %3690, %v3963_v15  }
 0x10d   : > { %v4340_v9 = vpop.permute.xlu1 %617  ;;  %819 = vperm.xlu1 %3672, %v4003_v25   ;;  %v4343_v11 = vpop.permute.xlu0 %612 }
 0x10e   : > { %5492 = vst [vmem:[#allocation65_spill] sm:$0xff] %v4340_v9  ;;  %5493 = vst [vmem:[#allocation66_spill] sm:$0xff] %v4343_v11 }
 0x110   : > { %787 = vperm.xlu0 %3690, %v3971_v17  }
 0x111   : > { %v4346_v24 = vpop.permute.xlu1 %627  ;;  %823 = vperm.xlu1 %3672, %v4014_v28   ;;  %v4349_v13 = vpop.permute.xlu0 %622 }
 0x112   : > { %5494 = vst [vmem:[#allocation67_spill] sm:$0xff] %v4346_v24  ;;  %5495 = vst [vmem:[#allocation68_spill] sm:$0xff] %v4349_v13 }
 0x114   : > { %799 = vperm.xlu0 %3690, %v3990_v22  }
 0x115   : > { %v4352_v2 = vpop.permute.xlu1 %637  ;;  %3673 = vset.pattern.permute.xlu1 %v5458_v44  ;;  %v4355_v15 = vpop.permute.xlu0 %632 }
 0x116   : > { %5496 = vst [vmem:[#allocation69_spill] sm:$0xff] %v4352_v2  ;;  %5497 = vst [vmem:[#allocation70_spill] sm:$0xff] %v4355_v15  ;;  %1203 = vperm.xlu1 %3673, %v4006_v26  }
 0x118   : > { %811 = vperm.xlu0 %3690, %v3995_v23  }
 0x119   : > { %v4359_v25 = vpop.permute.xlu1 %647  ;;  %v4361_v17 = vpop.permute.xlu0 %642 }
 0x11a   : > { %5498 = vst [vmem:[#allocation71_spill] sm:$0xff] %v4359_v25  ;;  %5499 = vst [vmem:[#allocation72_spill] sm:$0xff] %v4361_v17  ;;  %1211 = vperm.xlu1 %3673, %v4014_v28  }
 0x11c   : > { %815 = vperm.xlu0 %3690, %v4006_v26  }
 0x11e   : > { %1215 = vperm.xlu1 %3673, %v4011_v27   ;;  %v4366_v22 = vpop.permute.xlu1 %723  ;;  %v4368_v2 = vpop.permute.xlu0 %1107 }
 0x120   : > { %827 = vperm.xlu0 %3690, %v4011_v27  }
 0x122   : > { %3674 = vset.pattern.permute.xlu1 %v5473_v12  ;;  %v4372_v15 = vpop.permute.xlu1 %727  ;;  %v4374_v23 = vpop.permute.xlu0 %1119 }
 0x123   : > { %835 = vperm.xlu1 %3674, %v4019_v29  }
 0x124   : > { %831 = vperm.xlu0 %3690, %v4022_v30  }
 0x126   : > { %v4378_v28 = vpop.permute.xlu1 %735  ;;  %v4380_v26 = vpop.permute.xlu0 %1127 }
 0x127   : > { %839 = vperm.xlu1 %3674, %v4030_v32  }
 0x128   : > { %843 = vperm.xlu0 %3690, %v4027_v31  }
 0x12a   : > { %v4384_v17 = vpop.permute.xlu1 %743  ;;  %v4386_v27 = vpop.permute.xlu0 %1135 }
 0x12b   : > { %3675 = vset.pattern.permute.xlu1 %v5458_v44 }
 0x12c   : > { %1219 = vperm.xlu1 %3675, %v4022_v30   ;;  %847 = vperm.xlu0 %3690, %v4038_v34  }
 0x12e   : > { %v4391_v29 = vpop.permute.xlu1 %751  ;;  %v4393_v25 = vpop.permute.xlu0 %1143 }
 0x130   : > { %1227 = vperm.xlu1 %3675, %v4030_v32   ;;  %859 = vperm.xlu0 %3690, %v4043_v35  }
 0x132   : > { %v4397_v24 = vpop.permute.xlu1 %759  ;;  %v4399_v13 = vpop.permute.xlu0 %1151 }
 0x134   : > { %1231 = vperm.xlu1 %3675, %v4027_v31   ;;  %863 = vperm.xlu0 %3690, %v4054_v38  }
 0x136   : > { %v4403_v11 = vpop.permute.xlu1 %767  ;;  %v4405_v30 = vpop.permute.xlu0 %1159 }
 0x138   : > { %3676 = vset.pattern.permute.xlu1 %v5473_v12  ;;  %875 = vperm.xlu0 %3690, %v4059_v39  }
 0x139   : > { %851 = vperm.xlu1 %3676, %v4035_v33  }
 0x13a   : > { %v4410_v32 = vpop.permute.xlu1 %775  ;;  %v4412_v9 = vpop.permute.xlu0 %1167 }
 0x13c   : > { %879 = vperm.xlu0 %3690, %v4070_v42  }
 0x13d   : > { %855 = vperm.xlu1 %3676, %v4046_v36  }
 0x13e   : > { %v4416_v31 = vpop.permute.xlu1 %783  ;;  %v4418_v21 = vpop.permute.xlu0 %1171 }
 0x140   : > { %891 = vperm.xlu0 %3690, %v4075_v43  }
 0x141   : > { %3677 = vset.pattern.permute.xlu1 %v5458_v44 }
 0x142   : > { %1235 = vperm.xlu1 %3677, %v4038_v34   ;;  %v4423_v5 = vpop.permute.xlu1 %791  ;;  %v4425_v33 = vpop.permute.xlu0 %1179 }
 0x144   : > { %895 = vperm.xlu0 %3690, %v4086_v46  }
 0x146   : > { %1243 = vperm.xlu1 %3677, %v4046_v36   ;;  %v4429_v7 = vpop.permute.xlu0 %1191 }
 0x147   : > { %v1112_v16 = vpop.permute.xlu1 %1111 }
 0x148   : > { %907 = vperm.xlu0 %3690, %v4091_v47  }
 0x14a   : > { %1247 = vperm.xlu1 %3677, %v4043_v35   ;;  %v4433_v19 = vpop.permute.xlu0 %1207 }
 0x14b   : > { %5500 = vst [vmem:[#allocation73_spill] sm:$0xff] %v4433_v19  ;;  %v1116_v3 = vpop.permute.xlu1 %1115  ;;  %v5522_v19 = vld [vmem:[#allocation22_spill] sm:$0xff] }
 0x14c   : > { %911 = vperm.xlu0 %3690, %v4102_v50  }
 0x14e   : > { %3678 = vset.pattern.permute.xlu1 %v5473_v12  ;;  %v4437_v34 = vpop.permute.xlu0 %1223 }
 0x14f   : > { %5501 = vst [vmem:[#allocation74_spill] sm:$0xff] %v4437_v34  ;;  %867 = vperm.xlu1 %3678, %v4051_v37   ;;  %v4440_v53 = vpop.permute.xlu1 %1123 }
 0x150   : > { %923 = vperm.xlu0 %3690, %v4107_v51   ;;  %v650_v51 = vlaneseq }
 0x152   : > { %v4443_v36 = vpop.permute.xlu0 %1239  ;;  %v4464_v14 = vshrl.u32 %v650_v51, 7 }
 0x153   : > { %5502 = vst [vmem:[#allocation75_spill] sm:$0xff] %v4443_v36  ;;  %871 = vperm.xlu1 %3678, %v4062_v40   ;;  %v4446_v35 = vpop.permute.xlu1 %1131 }
 0x154   : > { %927 = vperm.xlu0 %3690, %v4118_v54   ;;  %5506 = vst [vmem:[#allocation79_spill] sm:$0xff] %v4464_v14 }
 0x156   : > { %v4449_v8 = vpop.permute.xlu0 %1255 }
 0x157   : > { %5503 = vst [vmem:[#allocation76_spill] sm:$0xff] %v4449_v8  ;;  %3679 = vset.pattern.permute.xlu1 %v5458_v44  ;;  %v4452_v61 = vpop.permute.xlu1 %1139 }
 0x158   : > { %1251 = vperm.xlu1 %3679, %v4054_v38   ;;  %939 = vperm.xlu0 %3690, %v4123_v55   ;;  %v976_v38 = vsub.s32 1, %v4464_v14 }
 0x15a   : > { %v4456_v37 = vpop.permute.xlu0 %1271 }
 0x15b   : > { %5504 = vst [vmem:[#allocation77_spill] sm:$0xff] %v4456_v37  ;;  %v4458_v57 = vpop.permute.xlu1 %1147 }
 0x15c   : > { %1259 = vperm.xlu1 %3679, %v4062_v40   ;;  %943 = vperm.xlu0 %3690, %v4131_v58   ;;  %v329_v40 = vld [vmem:[%s5412_s1] sm:$0x7]  ;;  %v652_v58 = vsub.s32 0, %v4464_v14 }
 0x15d   : > { %v4481_v51 = vrot.slane %v329_v40, %v976_v38 }
 0x15e   : > { %v4462_v54 = vpop.permute.xlu0 %1287 }
 0x15f   : > { %5505 = vst [vmem:[#allocation78_spill] sm:$0xff] %v4462_v54  ;;  %v4466_v1 = vpop.permute.xlu1 %1155  ;;  %v4490_v54 = vrot.slane %v329_v40, %v652_v58  ;;  %v979_v8 = vmul.f32 %v4481_v51, %v4366_v22  ;;  %v5513_v58 = vld [vmem:[#allocation12_spill] sm:$0xff]  ;;  %v980_v22 = vmul.f32 %v4481_v51, %v4372_v15  ;;  %v982_v15 = vmul.f32 %v4481_v51, %v4378_v28 }
 0x160   : > { %1263 = vperm.xlu1 %3679, %v4059_v39   ;;  %955 = vperm.xlu0 %3690, %v4136_v59   ;;  %v1364_v39 = vsub.s32 2, %v4464_v14  ;;  %v5511_v14 = vld [vmem:[#allocation16_spill] sm:$0xff] }
 0x162   : > { %v4471_v55 = vpop.permute.xlu0 %1303 }
 0x163   : > { %5507 = vst [vmem:[#allocation80_spill] sm:$0xff] %v4471_v55  ;;  %v4473_v37 = vpop.permute.xlu1 %1163 }
 0x164   : > { %3680 = vset.pattern.permute.xlu1 %v5473_v12  ;;  %959 = vperm.xlu0 %3690, %v4144_v62   ;;  %v4494_v62 = vrot.slane %v329_v40, %v1364_v39  ;;  %v5514_v40 = vld [vmem:[#allocation13_spill] sm:$0xff] }
 0x165   : > { %883 = vperm.xlu1 %3680, %v4067_v41   ;;  %v655_v41 = vmul.f32 %v4490_v54, %v5511_v14  ;;  %v656_v39 = vmul.f32 %v4490_v54, %v5514_v40 }
 0x166   : > { %v4485_v59 = vpop.permute.xlu0 %1319 }
 0x167   : > { %5508 = vst [vmem:[#allocation81_spill] sm:$0xff] %v4485_v59  ;;  %v1367_v59 = vmul.f32 %v4494_v62, %v1112_v16  ;;  %v1043_v18 = vadd.f32 %v979_v8, %v655_v41  ;;  %v5515_v16 = vld [vmem:[#allocation14_spill] sm:$0xff]  ;;  %v1366_v8 = vmul.f32 %v4494_v62, %v4368_v2  ;;  %v1368_v41 = vmul.f32 %v4494_v62, %v1116_v3  ;;  %v4529_v2 = vld [vmem:[%s5413_s2] ss:$0 sm:$0xff] }
 0x168   : > { %v4487_v55 = vpop.permute.xlu1 %795  ;;  %971 = vperm.xlu0 %3690, %v4149_v63   ;;  %v654_v36 = vmul.f32 %v4490_v54, %v5515_v16  ;;  %v1044_v20 = vadd.f32 %v980_v22, %v656_v39  ;;  %v5519_v16 = vld [vmem:[#allocation19_spill] sm:$0xff]  ;;  %v1369_v39 = vmul.f32 %v4494_v62, %v4374_v23 }
 0x169   : > { %887 = vperm.xlu1 %3680, %v5509_v10   ;;  %v1431_v14 = vadd.f32 %v1367_v59, %v1043_v18  ;;  %v5517_v18 = vld [vmem:[#allocation17_spill] sm:$0xff]  ;;  %v661_v34 = vmul.f32 %v4490_v54, %v5519_v16 }
 0x16a   : > { %v4497_v38 = vpop.permute.xlu0 %1335  ;;  %v659_v59 = vmul.f32 %v4490_v54, %v5517_v18  ;;  %v1432_v18 = vadd.f32 %v1368_v41, %v1044_v20  ;;  %v1371_v41 = vmul.f32 %v4494_v62, %v4380_v26  ;;  %v5525_v26 = vld [vmem:[#allocation25_spill] sm:$0xff] }
 0x16b   : > { %5510 = vst [vmem:[#allocation8_spill] sm:$0xff] %v4497_v38  ;;  %v1502_v22 = vadd.f32 %v4529_v2, %v1431_v14  ;;  %v662_v14 = vmul.f32 %v4490_v54, %v5522_v19 }
 0x16c   : > { %3693 = vset.pattern.permute.xlu0 %v5458_v44 }
 0x16d   : > { %3681 = vset.pattern.permute.xlu1 %v5458_v44  ;;  %v4504_v63 = vpop.permute.xlu1 %1175  ;;  %1351 = vperm.xlu0 %3693, %v5513_v58   ;;  %v1566_v19 = vmax.f32 %v1502_v22, 0.0 }
 0x16e   : > { %5512 = vst [vmem:[#allocation16_spill] sm:$0xff] %v4504_v63  ;;  %1267 = vperm.xlu1 %3681, %v4070_v42   ;;  %v5516_v42 = vld [vmem:[#allocation15_spill] sm:$0xff] }
 0x16f   : > { %v720_v38 = vpop.permute.xlu0 %719  ;;  %v657_v40 = vmul.f32 %v4490_v54, %v5516_v42  ;;  %v1370_v42 = vmul.f32 %v4494_v62, %v4440_v53  ;;  %v984_v53 = vmul.f32 %v4481_v51, %v4384_v17  ;;  %v5523_v63 = vld [vmem:[#allocation23_spill] sm:$0xff]  ;;  %v1372_v17 = vmul.f32 %v4494_v62, %v4446_v35 }
 0x170   : > { %v978_v58 = vmul.f32 %v4481_v51, %v720_v38  ;;  %v5518_v38 = vld [vmem:[#allocation18_spill] sm:$0xff]  ;;  %v4554_v20 = vmul.f32 %v4490_v54, %v5523_v63 }
 0x171   : > { %v4520_v6 = vpop.permute.xlu1 %1183  ;;  %v658_v28 = vmul.f32 %v4490_v54, %v5518_v38  ;;  %v5521_v38 = vld [vmem:[#allocation21_spill] sm:$0xff] }
 0x172   : > { %v1042_v3 = vadd.f32 %v978_v58, %v654_v36  ;;  %1275 = vperm.xlu1 %3681, %v5509_v10   ;;  %v5520_v10 = vld [vmem:[#allocation20_spill] sm:$0xff]  ;;  %v4546_v50 = vmul.f32 %v4490_v54, %v5521_v38 }
 0x173   : > { %v732_v4 = vpop.permute.xlu0 %731  ;;  %v660_v58 = vmul.f32 %v4490_v54, %v5520_v10  ;;  %v1046_v16 = vadd.f32 %v982_v15, %v658_v28  ;;  %v1503_v28 = vadd.f32 %v4529_v2, %v1432_v18 }
 0x174   : > { %v1430_v56 = vadd.f32 %v1366_v8, %v1042_v3  ;;  %v981_v36 = vmul.f32 %v4481_v51, %v732_v4 }
 0x175   : > { %v1434_v15 = vadd.f32 %v1370_v42, %v1046_v16  ;;  %v1048_v38 = vadd.f32 %v984_v53, %v660_v58  ;;  %v4572_v42 = vmul.f32 %v4490_v54, %v5525_v26  ;;  %v1373_v16 = vmul.f32 %v4494_v62, %v4386_v27  ;;  %v5527_v27 = vld [vmem:[#allocation27_spill] sm:$0xff] }
 0x176   : > { %v1045_v23 = vadd.f32 %v981_v36, %v657_v40  ;;  %1279 = vperm.xlu1 %3681, %v4075_v43   ;;  %v4557_v4 = vpop.permute.xlu1 %803  ;;  %v1501_v8 = vadd.f32 %v4529_v2, %v1430_v56  ;;  %v5524_v43 = vld [vmem:[#allocation24_spill] sm:$0xff]  ;;  %v986_v56 = vmul.f32 %v4481_v51, %v4391_v29  ;;  %v1374_v29 = vmul.f32 %v4494_v62, %v4452_v61 }
 0x177   : > { %v740_v3 = vpop.permute.xlu0 %739  ;;  %v664_v10 = vmul.f32 %v4490_v54, %v5524_v43  ;;  %v1505_v58 = vadd.f32 %v4529_v2, %v1434_v15  ;;  %v1436_v53 = vadd.f32 %v1372_v17, %v1048_v38  ;;  %v4590_v15 = vmul.f32 %v4490_v54, %v5527_v27  ;;  %v5528_v17 = vld [vmem:[#allocation28_spill] sm:$0xff] }
 0x178   : > { %v1433_v63 = vadd.f32 %v1369_v39, %v1045_v23  ;;  %v983_v40 = vmul.f32 %v4481_v51, %v740_v3  ;;  %v1565_v36 = vmax.f32 %v1501_v8, 0.0  ;;  %v1567_v8 = vmax.f32 %v1503_v28, 0.0 }
 0x179   : > { %v668_v61 = vmul.f32 %v4490_v54, %v5528_v17  ;;  %v1375_v38 = vmul.f32 %v4494_v62, %v4393_v25  ;;  %v1569_v26 = vmax.f32 %v1505_v58, 0.0  ;;  %v4609_v25 = vmul.f32 %v4490_v54, %v4203_v0  ;;  %v5530_v58 = vld [vmem:[#allocation29_spill] sm:$0xff] }
 0x17a   : > { %v1504_v35 = vadd.f32 %v4529_v2, %v1433_v63  ;;  %v1047_v22 = vadd.f32 %v983_v40, %v659_v59  ;;  %3682 = vset.pattern.permute.xlu1 %v5473_v12  ;;  %v4576_v39 = vpop.permute.xlu1 %807  ;;  %v1629_v18 = vpack.c.bf16 %v1566_v19, %v1565_v36  ;;  %v5526_v19 = vld [vmem:[#allocation26_spill] sm:$0xff]  ;;  %v1050_v36 = vadd.f32 %v986_v56, %v662_v14 }
 0x17b   : > { %899 = vperm.xlu1 %3682, %v4083_v45   ;;  %v748_v23 = vpop.permute.xlu0 %747  ;;  %v666_v40 = vmul.f32 %v4490_v54, %v5526_v19  ;;  %v988_v45 = vmul.f32 %v4481_v51, %v4397_v24  ;;  %v1376_v14 = vmul.f32 %v4494_v62, %v4458_v57  ;;  %v1377_v0 = vmul.f32 %v4494_v62, %v4399_v13  ;;  %v5532_v13 = vld [vmem:[#allocation31_spill] sm:$0xff] }
 0x17c   : > { %v1568_v3 = vmax.f32 %v1504_v35, 0.0  ;;  %v1435_v59 = vadd.f32 %v1371_v41, %v1047_v22  ;;  %v985_v63 = vmul.f32 %v4481_v51, %v748_v23  ;;  %3542 = vmatprep.mubr.msk.bf16.mxu0 %vm1700_vm0, %v1629_v18  ;;  %v1507_v35 = vadd.f32 %v4529_v2, %v1436_v53  ;;  %v5529_v18 = vld [vmem:[#allocation9_spill] sm:$0xff] }
 0x17d   : > { %v1438_v22 = vadd.f32 %v1374_v29, %v1050_v36  ;;  %v670_v53 = vmul.f32 %v4490_v54, %v5530_v58  ;;  %v4615_v29 = vmul.f32 %v4490_v54, %v4209_v48  ;;  %v990_v27 = vmul.f32 %v4481_v51, %v4403_v11 }
 0x17e   : > { %v1506_v41 = vadd.f32 %v4529_v2, %v1435_v59  ;;  %v1049_v28 = vadd.f32 %v985_v63, %v661_v34  ;;  %v1630_v43 = vpack.c.bf16 %v1568_v3, %v1567_v8  ;;  %v5531_v8 = vld [vmem:[#allocation30_spill] sm:$0xff]  ;;  %v1571_v17 = vmax.f32 %v1507_v35, 0.0 }
 0x17f   : > { %903 = vperm.xlu1 %3682, %v5529_v18   ;;  %v4601_v23 = vpop.permute.xlu1 %1187  ;;  %v756_v19 = vpop.permute.xlu0 %755  ;;  %v4619_v57 = vmul.f32 %v4490_v54, %v5531_v8  ;;  %v1509_v48 = vadd.f32 %v4529_v2, %v1438_v22  ;;  %v675_v11 = vmul.f32 %v4490_v54, %v5532_v13  ;;  %v992_v35 = vmul.f32 %v4481_v51, %v4410_v32 }
 0x180   : > { %v1570_v24 = vmax.f32 %v1506_v41, 0.0  ;;  %v1437_v56 = vadd.f32 %v1373_v16, %v1049_v28  ;;  %v987_v34 = vmul.f32 %v4481_v51, %v756_v19  ;;  %3543 = vmatmul.mubr.msk.bf16.vlgmr.msra.gmra.mrb[0].mxu0 %vm1700_vm0, %v1630_v43  ;;  %v1052_v16 = vadd.f32 %v988_v45, %v664_v10  ;;  %v5533_v43 = vld [vmem:[#allocation32_spill] sm:$0xff] }
 0x181   : > { %v1378_v22 = vmul.f32 %v4494_v62, %v4466_v1  ;;  %v1054_v32 = vadd.f32 %v990_v27, %v666_v40  ;;  %v1380_v1 = vmul.f32 %v4494_v62, %v4473_v37  ;;  %v1573_v8 = vmax.f32 %v1509_v48, 0.0 }
 0x182   : > { %v1508_v3 = vadd.f32 %v4529_v2, %v1437_v56  ;;  %v1051_v59 = vadd.f32 %v987_v34, %v4546_v50  ;;  %v1631_v63 = vpack.c.bf16 %v1570_v24, %v1569_v26  ;;  %v1440_v10 = vadd.f32 %v1376_v14, %v1052_v16  ;;  %v5534_v56 = vld [vmem:[#allocation33_spill] sm:$0xff] }
 0x183   : > { %3683 = vset.pattern.permute.xlu1 %v5458_v44  ;;  %v4629_v36 = vpop.permute.xlu1 %1195  ;;  %v764_v41 = vpop.permute.xlu0 %763  ;;  %v4638_v26 = vmul.f32 %v4490_v54, %v5533_v43  ;;  %v4650_v24 = vmul.f32 %v4490_v54, %v4222_v52  ;;  %v4654_v34 = vmul.f32 %v4490_v54, %v5534_v56  ;;  %v1379_v52 = vmul.f32 %v4494_v62, %v4405_v30 }
 0x184   : > { %v1572_v45 = vmax.f32 %v1508_v3, 0.0  ;;  %v1439_v28 = vadd.f32 %v1375_v38, %v1051_v59  ;;  %v989_v50 = vmul.f32 %v4481_v51, %v764_v41  ;;  %1283 = vperm.xlu1 %3683, %v4086_v46   ;;  %3546 = vmatprep.mubr.msk.bf16.mxu0 %vm1700_vm0, %v1631_v63  ;;  %v994_v38 = vmul.f32 %v4481_v51, %v4416_v31 }
 0x185   : > { %v1511_v16 = vadd.f32 %v4529_v2, %v1440_v10  ;;  %v1056_v59 = vadd.f32 %v992_v35, %v668_v61  ;;  %v1442_v40 = vadd.f32 %v1378_v22, %v1054_v32  ;;  %v1382_v27 = vmul.f32 %v4494_v62, %v4418_v21 }
 0x186   : > { %v1510_v46 = vadd.f32 %v4529_v2, %v1439_v28  ;;  %v1053_v19 = vadd.f32 %v989_v50, %v4554_v20  ;;  %v1632_v14 = vpack.c.bf16 %v1572_v45, %v1571_v17  ;;  %v1058_v37 = vadd.f32 %v994_v38, %v670_v53 }
 0x187   : > { %v4658_v58 = vpop.permute.xlu1 %1199  ;;  %v772_v31 = vpop.permute.xlu0 %771  ;;  %v997_v41 = vmul.f32 %v4481_v51, %v4487_v55  ;;  %v1381_v10 = vmul.f32 %v4494_v62, %v4412_v9  ;;  %v1575_v53 = vmax.f32 %v1511_v16, 0.0  ;;  %v1385_v55 = vmul.f32 %v4494_v62, %v4520_v6 }
 0x188   : > { %v1574_v20 = vmax.f32 %v1510_v46, 0.0  ;;  %v1441_v3 = vadd.f32 %v1377_v0, %v1053_v19  ;;  %1291 = vperm.xlu1 %3683, %v5529_v18   ;;  %3547 = vmatmul.mubr.msk.bf16.gmra.mrb[4].mxu0 %vm1700_vm0, %v1632_v14  ;;  %v991_v63 = vmul.f32 %v4481_v51, %v772_v31  ;;  %v996_v0 = vmul.f32 %v4481_v51, %v4423_v5 }
 0x189   : > { %v1444_v18 = vadd.f32 %v1380_v1, %v1056_v59  ;;  %v1513_v5 = vadd.f32 %v4529_v2, %v1442_v40  ;;  %v1446_v13 = vadd.f32 %v1382_v27, %v1058_v37  ;;  %v1384_v9 = vmul.f32 %v4494_v62, %v4425_v33  ;;  %v5535_v1 = vld [vmem:[#allocation16_spill] sm:$0xff] }
 0x18a   : > { %v1512_v17 = vadd.f32 %v4529_v2, %v1441_v3  ;;  %v1633_v48 = vpack.c.bf16 %v1574_v20, %v1573_v8  ;;  %v1055_v30 = vadd.f32 %v991_v63, %v4572_v42  ;;  %v999_v42 = vmul.f32 %v4481_v51, %v4557_v4 }
 0x18b   : > { %v780_v61 = vpop.permute.xlu0 %779  ;;  %v1515_v22 = vadd.f32 %v4529_v2, %v1444_v18  ;;  %v1061_v38 = vadd.f32 %v997_v41, %v4615_v29  ;;  %v1387_v4 = vmul.f32 %v4494_v62, %v4429_v7  ;;  %v679_v29 = vmul.f32 %v4490_v54, %v4228_v60 }
 0x18c   : > { %v1576_v45 = vmax.f32 %v1512_v17, 0.0  ;;  %v993_v21 = vmul.f32 %v4481_v51, %v780_v61  ;;  %1295 = vperm.xlu1 %3683, %v4091_v47   ;;  %v820_v28 = vpop.permute.xlu1 %819  ;;  %3550 = vmatprep.mubr.msk.bf16.mxu0 %vm1700_vm0, %v1633_v48  ;;  %v1443_v50 = vadd.f32 %v1379_v52, %v1055_v30  ;;  %v1060_v47 = vadd.f32 %v996_v0, %v4619_v57 }
 0x18d   : > { %v1449_v57 = vadd.f32 %v1385_v55, %v1061_v38  ;;  %v1063_v56 = vadd.f32 %v999_v42, %v675_v11  ;;  %v1383_v7 = vmul.f32 %v4494_v62, %v5535_v1  ;;  %v1517_v16 = vadd.f32 %v4529_v2, %v1446_v13 }
 0x18e   : > { %v1057_v43 = vadd.f32 %v993_v21, %v4590_v15  ;;  %v1634_v35 = vpack.c.bf16 %v1576_v45, %v1575_v53  ;;  %v1514_v46 = vadd.f32 %v4529_v2, %v1443_v50  ;;  %v1577_v15 = vmax.f32 %v1513_v5, 0.0 }
 0x18f   : > { %v788_v6 = vpop.permute.xlu0 %787  ;;  %v1448_v20 = vadd.f32 %v1384_v9, %v1060_v47  ;;  %v1579_v3 = vmax.f32 %v1515_v22, 0.0  ;;  %v1003_v40 = vmul.f32 %v4481_v51, %v820_v28  ;;  %v1520_v60 = vadd.f32 %v4529_v2, %v1449_v57  ;;  %v5539_v47 = vld [vmem:[#allocation34_spill] sm:$0xff] }
 0x190   : > { %v1445_v19 = vadd.f32 %v1381_v10, %v1057_v43  ;;  %v995_v14 = vmul.f32 %v4481_v51, %v788_v6  ;;  %3684 = vset.pattern.permute.xlu1 %v5473_v12  ;;  %v824_v33 = vpop.permute.xlu1 %823  ;;  %3551 = vmatmul.mubr.msk.bf16.gmra.mrb[8].mxu0 %vm1700_vm0, %v1634_v35  ;;  %v1578_v32 = vmax.f32 %v1514_v46, 0.0  ;;  %v1451_v37 = vadd.f32 %v1387_v4, %v1063_v56  ;;  %v5537_v10 = vld [vmem:[#allocation73_spill] sm:$0xff]  ;;  %v5538_v43 = vld [vmem:[#allocation10_spill] sm:$0xff] }
 0x191   : > { %915 = vperm.xlu1 %3684, %v4099_v49   ;;  %v1000_v27 = vmul.f32 %v4481_v51, %v4576_v39  ;;  %v1386_v48 = vmul.f32 %v4494_v62, %v4601_v23  ;;  %v1581_v30 = vmax.f32 %v1517_v16, 0.0  ;;  %v1519_v61 = vadd.f32 %v4529_v2, %v1448_v20 }
 0x192   : > { %v1516_v31 = vadd.f32 %v4529_v2, %v1445_v19  ;;  %v1059_v8 = vadd.f32 %v995_v14, %v4609_v25  ;;  %v1635_v59 = vpack.c.bf16 %v1578_v32, %v1577_v15  ;;  %v5536_v25 = vld [vmem:[#allocation11_spill] sm:$0xff]  ;;  %v1391_v53 = vmul.f32 %v4494_v62, %v5537_v10 }
 0x193   : > { %v800_v52 = vpop.permute.xlu0 %799  ;;  %v1388_v39 = vmul.f32 %v4494_v62, %v4629_v36  ;;  %v1067_v21 = vadd.f32 %v1003_v40, %v679_v29  ;;  %v1584_v55 = vmax.f32 %v1520_v60, 0.0  ;;  %v1064_v42 = vadd.f32 %v1000_v27, %v4654_v34  ;;  %v3698_v29 = vld [vmem:[%s3904_s13 + $0x190] sm:$0xff] }
 0x194   : > { %v1580_v11 = vmax.f32 %v1516_v31, 0.0  ;;  %v1447_v49 = vadd.f32 %v1383_v7, %v1059_v8  ;;  %v998_v63 = vmul.f32 %v4481_v51, %v800_v52  ;;  %3554 = vmatprep.mubr.msk.bf16.mxu0 %vm1700_vm0, %v1635_v59  ;;  %v1389_v13 = vmul.f32 %v4494_v62, %v4658_v58  ;;  %v5540_v7 = vld [vmem:[#allocation35_spill] sm:$0xff]  ;;  %v5541_v8 = vld [vmem:[#allocation36_spill] sm:$0xff] }
 0x195   : > { %919 = vperm.xlu1 %3684, %v5536_v25   ;;  %v1204_v17 = vpop.permute.xlu1 %1203  ;;  %v678_v22 = vmul.f32 %v4490_v54, %v5539_v47  ;;  %v1583_v38 = vmax.f32 %v1519_v61, 0.0  ;;  %v1452_v46 = vadd.f32 %v1388_v39, %v1064_v42  ;;  %v1455_v6 = vadd.f32 %v1391_v53, %v1067_v21  ;;  %v3699_v25 = vld [vmem:[%s3904_s13 + $0x198] sm:$0xff]  ;;  %v3701_v47 = vld [vmem:[%s3904_s13 + $0x1b0] sm:$0xff] }
 0x196   : > { %v1518_v0 = vadd.f32 %v4529_v2, %v1447_v49  ;;  %v1062_v18 = vadd.f32 %v998_v63, %v4638_v26  ;;  %v1636_v41 = vpack.c.bf16 %v1580_v11, %v1579_v3  ;;  %v1522_v26 = vadd.f32 %v4529_v2, %v1451_v37 }
 0x197   : > { %v812_v45 = vpop.permute.xlu0 %811  ;;  %v1390_v57 = vmul.f32 %v4494_v62, %v1204_v17  ;;  %v1638_v1 = vpack.c.bf16 %v1584_v55, %v1583_v38  ;;  %v681_v31 = vmul.f32 %v4490_v54, %v5540_v7  ;;  %v680_v16 = vmul.f32 %v4490_v54, %v5541_v8  ;;  %v3700_v55 = vld [vmem:[%s3904_s13 + $0x1a8] sm:$0xff]  ;;  %v3702_v7 = vld [vmem:[%s3904_s13 + $0x1a0] sm:$0xff] }
 0x198   : > { %v1582_v28 = vmax.f32 %v1518_v0, 0.0  ;;  %v1450_v5 = vadd.f32 %v1386_v48, %v1062_v18  ;;  %v1001_v23 = vmul.f32 %v4481_v51, %v812_v45  ;;  %3555 = vmatmul.mubr.msk.bf16.gmra.mrb[12].mxu0 %vm1700_vm0, %v1636_v41  ;;  %v1586_v58 = vmax.f32 %v1522_v26, 0.0  ;;  %v5542_v48 = vld [vmem:[#allocation37_spill] sm:$0xff]  ;;  %v5543_v26 = vld [vmem:[#allocation74_spill] sm:$0xff] }
 0x199   : > { %3685 = vset.pattern.permute.xlu1 %v5458_v44  ;;  %v1212_v50 = vpop.permute.xlu1 %1211  ;;  %v1523_v20 = vadd.f32 %v4529_v2, %v1452_v46  ;;  %v1526_v52 = vadd.f32 %v4529_v2, %v1455_v6  ;;  %v683_v0 = vmul.f32 %v4490_v54, %v5542_v48  ;;  %v1395_v42 = vmul.f32 %v4494_v62, %v5543_v26 }
 0x19a   : > { %v1521_v36 = vadd.f32 %v4529_v2, %v1450_v5  ;;  %v1065_v9 = vadd.f32 %v1001_v23, %v4650_v24  ;;  %1299 = vperm.xlu1 %3685, %v5538_v43   ;;  %v1637_v35 = vpack.c.bf16 %v1582_v28, %v1581_v30  ;;  %v1004_v24 = vmul.f32 %v4481_v51, %v824_v33 }
 0x19b   : > { %v816_v34 = vpop.permute.xlu0 %815  ;;  %v1392_v59 = vmul.f32 %v4494_v62, %v1212_v50  ;;  %v1587_v18 = vmax.f32 %v1523_v20, 0.0  ;;  %v1590_v30 = vmax.f32 %v1526_v52, 0.0 }
 0x19c   : > { %v1585_v4 = vmax.f32 %v1521_v36, 0.0  ;;  %v1453_v19 = vadd.f32 %v1389_v13, %v1065_v9  ;;  %v1002_v14 = vmul.f32 %v4481_v51, %v816_v34  ;;  %3558 = vmatprep.mubr.msk.bf16.mxu0 %vm1700_vm0, %v1637_v35  ;;  %v1068_v49 = vadd.f32 %v1004_v24, %v680_v16  ;;  %v5544_v36 = vld [vmem:[#allocation38_spill] sm:$0xff] }
 0x19d   : > { %v1216_v15 = vpop.permute.xlu1 %1215  ;;  %v682_v9 = vmul.f32 %v4490_v54, %v5544_v36  ;;  %v5550_v36 = vld [vmem:[#allocation44_spill] sm:$0xff] }
 0x19e   : > { %v1524_v56 = vadd.f32 %v4529_v2, %v1453_v19  ;;  %v1066_v32 = vadd.f32 %v1002_v14, %v678_v22  ;;  %1307 = vperm.xlu1 %3685, %v3698_v29   ;;  %v1639_v33 = vpack.c.bf16 %v1586_v58, %v1585_v4  ;;  %v1393_v37 = vmul.f32 %v4494_v62, %v1216_v15  ;;  %v5545_v19 = vld [vmem:[#allocation40_spill] sm:$0xff] }
 0x19f   : > { %v828_v3 = vpop.permute.xlu0 %827  ;;  %v1456_v61 = vadd.f32 %v1392_v59, %v1068_v49  ;;  %v684_v14 = vmul.f32 %v4490_v54, %v5545_v19 }
 0x1a0   : > { %v1454_v11 = vadd.f32 %v1390_v57, %v1066_v32  ;;  %v1005_v40 = vmul.f32 %v4481_v51, %v828_v3  ;;  %3559 = vmatmul.mubr.msk.bf16.gmra.mrb[16].mxu0 %vm1700_vm0, %v1638_v1  ;;  %v1588_v63 = vmax.f32 %v1524_v56, 0.0 }
 0x1a1   : > { %3562 = vmatprep.mubr.msk.bf16.mxu0 %vm1700_vm0, %v1639_v33  ;;  %v1527_v50 = vadd.f32 %v4529_v2, %v1456_v61 }
 0x1a2   : > { %v1525_v60 = vadd.f32 %v4529_v2, %v1454_v11  ;;  %v1069_v27 = vadd.f32 %v1005_v40, %v681_v31  ;;  %1311 = vperm.xlu1 %3685, %v3699_v25   ;;  %v836_v17 = vpop.permute.xlu1 %835  ;;  %v1640_v5 = vpack.c.bf16 %v1588_v63, %v1587_v18  ;;  %v5546_v31 = vld [vmem:[#allocation39_spill] sm:$0xff]  ;;  %v5547_v25 = vld [vmem:[#allocation41_spill] sm:$0xff] }
 0x1a3   : > { %v1007_v41 = vmul.f32 %v4481_v51, %v836_v17  ;;  %v832_v39 = vpop.permute.xlu0 %831  ;;  %v1591_v38 = vmax.f32 %v1527_v50, 0.0  ;;  %v685_v8 = vmul.f32 %v4490_v54, %v5546_v31  ;;  %v687_v17 = vmul.f32 %v4490_v54, %v5547_v25  ;;  %v3707_v31 = vld [vmem:[%s3904_s13 + $0x1d8] sm:$0xff] }
 0x1a4   : > { %v1589_v10 = vmax.f32 %v1525_v60, 0.0  ;;  %v1457_v53 = vadd.f32 %v1393_v37, %v1069_v27  ;;  %v1006_v13 = vmul.f32 %v4481_v51, %v832_v39  ;;  %v3703_v60 = vld [vmem:[%s3904_s13 + $0x1b8] sm:$0xff] }
 0x1a5   : > { %v1071_v21 = vadd.f32 %v1007_v41, %v683_v0  ;;  %v5554_v25 = vld [vmem:[#allocation46_spill] sm:$0xff] }
 0x1a6   : > { %v1528_v45 = vadd.f32 %v4529_v2, %v1457_v53  ;;  %3686 = vset.pattern.permute.xlu1 %v5473_v12  ;;  %v840_v28 = vpop.permute.xlu1 %839  ;;  %v1641_v23 = vpack.c.bf16 %v1590_v30, %v1589_v10  ;;  %v1070_v46 = vadd.f32 %v1006_v13, %v682_v9  ;;  %v3704_v10 = vld [vmem:[%s3904_s13 + $0x1c8] sm:$0xff]  ;;  %v5548_v53 = vld [vmem:[#allocation75_spill] sm:$0xff]  ;;  %v688_v9 = vmul.f32 %v4490_v54, %v5550_v36 }
 0x1a7   : > { %931 = vperm.xlu1 %3686, %v3700_v55   ;;  %v1459_v35 = vadd.f32 %v1395_v42, %v1071_v21  ;;  %v1008_v34 = vmul.f32 %v4481_v51, %v840_v28  ;;  %v844_v6 = vpop.permute.xlu0 %843  ;;  %v1399_v39 = vmul.f32 %v4494_v62, %v5548_v53  ;;  %v5549_v21 = vld [vmem:[#allocation42_spill] sm:$0xff] }
 0x1a8   : > { %3563 = vmatmul.mubr.msk.bf16.gmra.mrb[20].mxu0 %vm1700_vm0, %v1640_v5  ;;  %v1592_v43 = vmax.f32 %v1528_v45, 0.0  ;;  %v1009_v57 = vmul.f32 %v4481_v51, %v844_v6  ;;  %v686_v28 = vmul.f32 %v4490_v54, %v5549_v21 }
 0x1a9   : > { %3566 = vmatprep.mubr.msk.bf16.mxu0 %vm1700_vm0, %v1641_v23  ;;  %v1530_v58 = vadd.f32 %v4529_v2, %v1459_v35  ;;  %v1072_v32 = vadd.f32 %v1008_v34, %v684_v14  ;;  %v3705_v23 = vld [vmem:[%s3904_s13 + $0x1d0] sm:$0xff]  ;;  %v3706_v34 = vld [vmem:[%s3904_s13 + $0x1c0] sm:$0xff] }
 0x1aa   : > { %v1642_v15 = vpack.c.bf16 %v1592_v43, %v1591_v38  ;;  %v1073_v52 = vadd.f32 %v1009_v57, %v685_v8 }
 0x1ab   : > { %935 = vperm.xlu1 %3686, %v3701_v47   ;;  %v1220_v22 = vpop.permute.xlu1 %1219  ;;  %v1594_v16 = vmax.f32 %v1530_v58, 0.0  ;;  %v848_v18 = vpop.permute.xlu0 %847 }
 0x1ac   : > { %v1394_v4 = vmul.f32 %v4494_v62, %v1220_v22  ;;  %v1010_v45 = vmul.f32 %v4481_v51, %v848_v18 }
 0x1ae   : > { %v1458_v24 = vadd.f32 %v1394_v4, %v1070_v46  ;;  %v1074_v26 = vadd.f32 %v1010_v45, %v686_v28  ;;  %v5551_v4 = vld [vmem:[#allocation43_spill] sm:$0xff] }
 0x1af   : > { %3687 = vset.pattern.permute.xlu1 %v5458_v44  ;;  %v1228_v56 = vpop.permute.xlu1 %1227  ;;  %v860_v13 = vpop.permute.xlu0 %859  ;;  %v689_v19 = vmul.f32 %v4490_v54, %v5551_v4 }
 0x1b0   : > { %v1529_v29 = vadd.f32 %v4529_v2, %v1458_v24  ;;  %v1396_v1 = vmul.f32 %v4494_v62, %v1228_v56  ;;  %1315 = vperm.xlu1 %3687, %v3702_v7   ;;  %3567 = vmatmul.mubr.msk.bf16.gmra.mrb[24].mxu0 %vm1700_vm0, %v1642_v15  ;;  %v1013_v22 = vmul.f32 %v4481_v51, %v860_v13 }
 0x1b2   : > { %v1593_v20 = vmax.f32 %v1529_v29, 0.0  ;;  %v1460_v3 = vadd.f32 %v1396_v1, %v1072_v32  ;;  %v1077_v57 = vadd.f32 %v1013_v22, %v689_v19  ;;  %v5557_v19 = vld [vmem:[#allocation49_spill] sm:$0xff] }
 0x1b3   : > { %v1232_v33 = vpop.permute.xlu1 %1231 }
 0x1b4   : > { %v1643_v59 = vpack.c.bf16 %v1594_v16, %v1593_v20  ;;  %v1397_v11 = vmul.f32 %v4494_v62, %v1232_v33  ;;  %1323 = vperm.xlu1 %3687, %v3701_v47   ;;  %v1531_v40 = vadd.f32 %v4529_v2, %v1460_v3  ;;  %v5552_v20 = vld [vmem:[#allocation45_spill] sm:$0xff] }
 0x1b5   : > { %v691_v3 = vmul.f32 %v4490_v54, %v5552_v20 }
 0x1b6   : > { %v1461_v49 = vadd.f32 %v1397_v11, %v1073_v52  ;;  %3570 = vmatprep.mubr.msk.bf16.mxu0 %vm1700_vm0, %v1643_v59  ;;  %v1595_v48 = vmax.f32 %v1531_v40, 0.0  ;;  %v864_v59 = vpop.permute.xlu0 %863 }
 0x1b8   : > { %v1532_v63 = vadd.f32 %v4529_v2, %v1461_v49  ;;  %1327 = vperm.xlu1 %3687, %v3703_v60   ;;  %v852_v37 = vpop.permute.xlu1 %851  ;;  %v5553_v60 = vld [vmem:[#allocation76_spill] sm:$0xff] }
 0x1b9   : > { %v1011_v27 = vmul.f32 %v4481_v51, %v852_v37  ;;  %v1403_v37 = vmul.f32 %v4494_v62, %v5553_v60 }
 0x1ba   : > { %v1596_v0 = vmax.f32 %v1532_v63, 0.0  ;;  %v3708_v63 = vld [vmem:[%s3904_s13 + $0x1e8] sm:$0xff] }
 0x1bb   : > { %v1075_v30 = vadd.f32 %v1011_v27, %v687_v17  ;;  %v1014_v27 = vmul.f32 %v4481_v51, %v864_v59  ;;  %v690_v17 = vmul.f32 %v4490_v54, %v5554_v25 }
 0x1bc   : > { %v1644_v41 = vpack.c.bf16 %v1596_v0, %v1595_v48  ;;  %3688 = vset.pattern.permute.xlu1 %v5473_v12  ;;  %v856_v61 = vpop.permute.xlu1 %855  ;;  %v3709_v0 = vld [vmem:[%s3904_s13 + $0x1f0] sm:$0xff] }
 0x1bd   : > { %947 = vperm.xlu1 %3688, %v3704_v10   ;;  %v1463_v5 = vadd.f32 %v1399_v39, %v1075_v30  ;;  %v1012_v42 = vmul.f32 %v4481_v51, %v856_v61  ;;  %v876_v61 = vpop.permute.xlu0 %875  ;;  %v5555_v10 = vld [vmem:[#allocation48_spill] sm:$0xff] }
 0x1be   : > { %3571 = vmatmul.mubr.msk.bf16.gmra.mrb[28].mxu0 %vm1700_vm0, %v1644_v41  ;;  %v1078_v41 = vadd.f32 %v1014_v27, %v690_v17  ;;  %v692_v53 = vmul.f32 %v4490_v54, %v5555_v10  ;;  %v1017_v28 = vmul.f32 %v4481_v51, %v876_v61 }
 0x1bf   : > { %v1534_v35 = vadd.f32 %v4529_v2, %v1463_v5  ;;  %v1076_v38 = vadd.f32 %v1012_v42, %v688_v9  ;;  %v5556_v42 = vld [vmem:[#allocation47_spill] sm:$0xff] }
 0x1c1   : > { %951 = vperm.xlu1 %3688, %v3705_v23   ;;  %v1236_v55 = vpop.permute.xlu1 %1235  ;;  %v1598_v24 = vmax.f32 %v1534_v35, 0.0 }
 0x1c2   : > { %v1398_v50 = vmul.f32 %v4494_v62, %v1236_v55 }
 0x1c4   : > { %v1462_v43 = vadd.f32 %v1398_v50, %v1074_v26  ;;  %v3710_v26 = vld [vmem:[%s3904_s13 + $0x1e0] sm:$0xff]  ;;  %v693_v50 = vmul.f32 %v4490_v54, %v5556_v42 }
 0x1c5   : > { %3689 = vset.pattern.permute.xlu1 %v5458_v44  ;;  %v1244_v47 = vpop.permute.xlu1 %1243 }
 0x1c6   : > { %v1400_v46 = vmul.f32 %v4494_v62, %v1244_v47  ;;  %1331 = vperm.xlu1 %3689, %v3706_v34   ;;  %v1533_v6 = vadd.f32 %v4529_v2, %v1462_v43  ;;  %v1081_v35 = vadd.f32 %v1017_v28, %v693_v50  ;;  %v3711_v34 = vld [vmem:[%s3904_s13 + $0x1f8] sm:$0xff]  ;;  %s3234_s13 = sshll.u32 %s3873_s25, 9 }
 0x1c8   : > { %v1464_v14 = vadd.f32 %v1400_v46, %v1076_v38  ;;  %v1597_v58 = vmax.f32 %v1533_v6, 0.0 }
 0x1c9   : > { %v1248_v15 = vpop.permute.xlu1 %1247 }
 0x1ca   : > { %v1401_v56 = vmul.f32 %v4494_v62, %v1248_v15  ;;  %1339 = vperm.xlu1 %3689, %v3705_v23   ;;  %v1645_v32 = vpack.c.bf16 %v1598_v24, %v1597_v58  ;;  %v1535_v29 = vadd.f32 %v4529_v2, %v1464_v14  ;;  %v695_v14 = vmul.f32 %v4490_v54, %v5557_v19  ;;  %v880_v15 = vpop.permute.xlu0 %879 }
 0x1cc   : > { %v1465_v1 = vadd.f32 %v1401_v56, %v1077_v57  ;;  %3574 = vmatprep.mubr.msk.bf16.mxu1 %vm1700_vm0, %v1645_v32  ;;  %v1599_v33 = vmax.f32 %v1535_v29, 0.0  ;;  %v5558_v29 = vld [vmem:[#allocation77_spill] sm:$0xff] }
 0x1ce   : > { %v1536_v7 = vadd.f32 %v4529_v2, %v1465_v1  ;;  %1343 = vperm.xlu1 %3689, %v3707_v31   ;;  %v868_v8 = vpop.permute.xlu1 %867  ;;  %v1407_v1 = vmul.f32 %v4494_v62, %v5558_v29  ;;  %v5559_v31 = vld [vmem:[#allocation50_spill] sm:$0xff]  ;;  %v892_v59 = vpop.permute.xlu0 %891 }
 0x1cf   : > { %v1015_v16 = vmul.f32 %v4481_v51, %v868_v8  ;;  %v694_v8 = vmul.f32 %v4490_v54, %v5559_v31 }
 0x1d0   : > { %v1600_v52 = vmax.f32 %v1536_v7, 0.0  ;;  %v1018_v7 = vmul.f32 %v4481_v51, %v880_v15 }
 0x1d1   : > { %v1079_v40 = vadd.f32 %v1015_v16, %v691_v3 }
 0x1d2   : > { %v1646_v11 = vpack.c.bf16 %v1600_v52, %v1599_v33  ;;  %3691 = vset.pattern.permute.xlu1 %v5473_v12  ;;  %v872_v49 = vpop.permute.xlu1 %871  ;;  %v1082_v3 = vadd.f32 %v1018_v7, %v694_v8  ;;  %v896_v50 = vpop.permute.xlu0 %895  ;;  %v5566_v7 = vld [vmem:[#allocation55_spill] sm:$0xff] }
 0x1d3   : > { %963 = vperm.xlu1 %3691, %v3708_v63   ;;  %v1467_v48 = vadd.f32 %v1403_v37, %v1079_v40  ;;  %v1016_v12 = vmul.f32 %v4481_v51, %v872_v49  ;;  %v1021_v37 = vmul.f32 %v4481_v51, %v892_v59  ;;  %v701_v31 = vmul.f32 %v4490_v54, %v5566_v7 }
 0x1d4   : > { %3575 = vmatmul.mubr.msk.bf16.vlgmr.msra.gmra.mrb[0].mxu1 %vm1700_vm0, %v1646_v11  ;;  %v5560_v11 = vld [vmem:[#allocation52_spill] sm:$0xff] }
 0x1d5   : > { %v1538_v39 = vadd.f32 %v4529_v2, %v1467_v48  ;;  %v1080_v5 = vadd.f32 %v1016_v12, %v692_v53  ;;  %v696_v40 = vmul.f32 %v4490_v54, %v5560_v11  ;;  %v5561_v48 = vld [vmem:[#allocation51_spill] sm:$0xff] }
 0x1d6   : > { %v908_v19 = vpop.permute.xlu0 %907 }
 0x1d7   : > { %967 = vperm.xlu1 %3691, %v3709_v0   ;;  %v1252_v18 = vpop.permute.xlu1 %1251  ;;  %v1602_v13 = vmax.f32 %v1538_v39, 0.0 }
 0x1d8   : > { %v1402_v30 = vmul.f32 %v4494_v62, %v1252_v18 }
 0x1da   : > { %v1466_v45 = vadd.f32 %v1402_v30, %v1078_v41 }
 0x1db   : > { %3692 = vset.pattern.permute.xlu1 %v5458_v44  ;;  %v1260_v21 = vpop.permute.xlu1 %1259 }
 0x1dc   : > { %v1537_v23 = vadd.f32 %v4529_v2, %v1466_v45  ;;  %v1404_v55 = vmul.f32 %v4494_v62, %v1260_v21  ;;  %1347 = vperm.xlu1 %3692, %v3710_v26  }
 0x1de   : > { %v1601_v36 = vmax.f32 %v1537_v23, 0.0  ;;  %v1468_v9 = vadd.f32 %v1404_v55, %v1080_v5  ;;  %v5562_v23 = vld [vmem:[#allocation53_spill] sm:$0xff] }
 0x1df   : > { %v1264_v43 = vpop.permute.xlu1 %1263  ;;  %v699_v55 = vmul.f32 %v4490_v54, %v5562_v23 }
 0x1e0   : > { %v1647_v44 = vpack.c.bf16 %v1602_v13, %v1601_v36  ;;  %v1405_v47 = vmul.f32 %v4494_v62, %v1264_v43  ;;  %1355 = vperm.xlu1 %3692, %v3709_v0   ;;  %v1539_v22 = vadd.f32 %v4529_v2, %v1468_v9  ;;  %v697_v0 = vmul.f32 %v4490_v54, %v5561_v48  ;;  %v5563_v43 = vld [vmem:[#allocation78_spill] sm:$0xff]  ;;  %v912_v48 = vpop.permute.xlu0 %911 }
 0x1e2   : > { %v1469_v38 = vadd.f32 %v1405_v47, %v1081_v35  ;;  %3578 = vmatprep.mubr.msk.bf16.mxu1 %vm1700_vm0, %v1647_v44  ;;  %v1603_v58 = vmax.f32 %v1539_v22, 0.0  ;;  %v1085_v61 = vadd.f32 %v1021_v37, %v697_v0  ;;  %v1411_v35 = vmul.f32 %v4494_v62, %v5563_v43  ;;  %v5564_v47 = vld [vmem:[#allocation54_spill] sm:$0xff]  ;;  %v5567_v37 = vld [vmem:[#allocation57_spill] sm:$0xff] }
 0x1e3   : > { %v1022_v44 = vmul.f32 %v4481_v51, %v896_v50  ;;  %v698_v22 = vmul.f32 %v4490_v54, %v5564_v47 }
 0x1e4   : > { %v1540_v46 = vadd.f32 %v4529_v2, %v1469_v38  ;;  %1359 = vperm.xlu1 %3692, %v3711_v34   ;;  %v884_v6 = vpop.permute.xlu1 %883  ;;  %v924_v23 = vpop.permute.xlu0 %923 }
 0x1e5   : > { %v1019_v4 = vmul.f32 %v4481_v51, %v884_v6  ;;  %v1086_v34 = vadd.f32 %v1022_v44, %v698_v22  ;;  %v5571_v44 = vld [vmem:[#allocation59_spill] sm:$0xff] }
 0x1e6   : > { %v1604_v24 = vmax.f32 %v1540_v46, 0.0  ;;  %v705_v47 = vmul.f32 %v4490_v54, %v5571_v44 }
 0x1e7   : > { %v1083_v56 = vadd.f32 %v1019_v4, %v695_v14  ;;  %v5565_v14 = vld [vmem:[#allocation56_spill] sm:$0xff] }
 0x1e8   : > { %v1648_v57 = vpack.c.bf16 %v1604_v24, %v1603_v58  ;;  %v888_v32 = vpop.permute.xlu1 %887  ;;  %v700_v58 = vmul.f32 %v4490_v54, %v5565_v14  ;;  %v928_v7 = vpop.permute.xlu0 %927 }
 0x1e9   : > { %v1471_v16 = vadd.f32 %v1407_v1, %v1083_v56  ;;  %v1020_v33 = vmul.f32 %v4481_v51, %v888_v32  ;;  %v1025_v56 = vmul.f32 %v4481_v51, %v908_v19 }
 0x1ea   : > { %3579 = vmatmul.mubr.msk.bf16.gmra.mrb[4].mxu1 %vm1700_vm0, %v1648_v57 }
 0x1eb   : > { %v1542_v49 = vadd.f32 %v4529_v2, %v1471_v16  ;;  %v1084_v27 = vadd.f32 %v1020_v33, %v696_v40  ;;  %v1089_v33 = vadd.f32 %v1025_v56, %v701_v31  ;;  %v5572_v56 = vld [vmem:[#allocation61_spill] sm:$0xff] }
 0x1ed   : > { %v1268_v20 = vpop.permute.xlu1 %1267  ;;  %v1606_v18 = vmax.f32 %v1542_v49, 0.0 }
 0x1ee   : > { %v1406_v52 = vmul.f32 %v4494_v62, %v1268_v20 }
 0x1f0   : > { %v1470_v63 = vadd.f32 %v1406_v52, %v1082_v3 }
 0x1f1   : > { %v1276_v60 = vpop.permute.xlu1 %1275 }
 0x1f2   : > { %v1541_v25 = vadd.f32 %v4529_v2, %v1470_v63  ;;  %v1408_v17 = vmul.f32 %v4494_v62, %v1276_v60 }
 0x1f4   : > { %v1605_v41 = vmax.f32 %v1541_v25, 0.0  ;;  %v1472_v12 = vadd.f32 %v1408_v17, %v1084_v27  ;;  %v703_v27 = vmul.f32 %v4490_v54, %v5567_v37  ;;  %v5575_v37 = vld [vmem:[#allocation64_spill] sm:$0xff] }
 0x1f5   : > { %v1280_v30 = vpop.permute.xlu1 %1279 }
 0x1f6   : > { %v1649_v10 = vpack.c.bf16 %v1606_v18, %v1605_v41  ;;  %v1409_v53 = vmul.f32 %v4494_v62, %v1280_v30  ;;  %v1543_v39 = vadd.f32 %v4529_v2, %v1472_v12  ;;  %v5568_v12 = vld [vmem:[#allocation80_spill] sm:$0xff] }
 0x1f7   : > { %v1415_v30 = vmul.f32 %v4494_v62, %v5568_v12 }
 0x1f8   : > { %v1473_v45 = vadd.f32 %v1409_v53, %v1085_v61  ;;  %3582 = vmatprep.mubr.msk.bf16.mxu1 %vm1700_vm0, %v1649_v10  ;;  %v1607_v26 = vmax.f32 %v1543_v39, 0.0  ;;  %v1026_v61 = vmul.f32 %v4481_v51, %v912_v48  ;;  %v5569_v10 = vld [vmem:[#allocation58_spill] sm:$0xff] }
 0x1f9   : > { %v702_v53 = vmul.f32 %v4490_v54, %v5569_v10 }
 0x1fa   : > { %v1544_v21 = vadd.f32 %v4529_v2, %v1473_v45  ;;  %v900_v28 = vpop.permute.xlu1 %899 }
 0x1fb   : > { %v1023_v5 = vmul.f32 %v4481_v51, %v900_v28 }
 0x1fc   : > { %v1608_v42 = vmax.f32 %v1544_v21, 0.0  ;;  %v1090_v21 = vadd.f32 %v1026_v61, %v702_v53  ;;  %v5576_v61 = vld [vmem:[#allocation63_spill] sm:$0xff] }
 0x1fd   : > { %v1087_v36 = vadd.f32 %v1023_v5, %v699_v55  ;;  %v5570_v55 = vld [vmem:[#allocation60_spill] sm:$0xff]  ;;  %v709_v10 = vmul.f32 %v4490_v54, %v5576_v61 }
 0x1fe   : > { %v1650_v13 = vpack.c.bf16 %v1608_v42, %v1607_v26  ;;  %v904_v9 = vpop.permute.xlu1 %903  ;;  %v704_v26 = vmul.f32 %v4490_v54, %v5570_v55 }
 0x1ff   : > { %v1475_v38 = vadd.f32 %v1411_v35, %v1087_v36  ;;  %v1024_v6 = vmul.f32 %v4481_v51, %v904_v9  ;;  %v1029_v36 = vmul.f32 %v4481_v51, %v924_v23 }
 0x200   : > { %3583 = vmatmul.mubr.msk.bf16.gmra.mrb[8].mxu1 %vm1700_vm0, %v1650_v13 }
 0x201   : > { %v1546_v24 = vadd.f32 %v4529_v2, %v1475_v38  ;;  %v1088_v32 = vadd.f32 %v1024_v6, %v700_v58  ;;  %v1093_v6 = vadd.f32 %v1029_v36, %v705_v47 }
 0x203   : > { %v1284_v46 = vpop.permute.xlu1 %1283  ;;  %v1610_v8 = vmax.f32 %v1546_v24, 0.0 }
 0x204   : > { %v1410_v4 = vmul.f32 %v4494_v62, %v1284_v46 }
 0x206   : > { %v1474_v15 = vadd.f32 %v1410_v4, %v1086_v34 }
 0x207   : > { %v1292_v57 = vpop.permute.xlu1 %1291 }
 0x208   : > { %v1545_v29 = vadd.f32 %v4529_v2, %v1474_v15  ;;  %v1412_v1 = vmul.f32 %v4494_v62, %v1292_v57 }
 0x20a   : > { %v1609_v16 = vmax.f32 %v1545_v29, 0.0  ;;  %v1476_v20 = vadd.f32 %v1412_v1, %v1088_v32  ;;  %v707_v32 = vmul.f32 %v4490_v54, %v5572_v56 }
 0x20b   : > { %v1296_v3 = vpop.permute.xlu1 %1295 }
 0x20c   : > { %v1651_v52 = vpack.c.bf16 %v1610_v8, %v1609_v16  ;;  %v1413_v59 = vmul.f32 %v4494_v62, %v1296_v3  ;;  %v1547_v11 = vadd.f32 %v4529_v2, %v1476_v20  ;;  %v5573_v20 = vld [vmem:[#allocation81_spill] sm:$0xff] }
 0x20d   : > { %v1419_v3 = vmul.f32 %v4494_v62, %v5573_v20  ;;  %v4955_v20 = vstv %s3234_s13  ;;  %s3813_s13 = smov [#allocation2]  }
 0x20e   : > { %v1477_v40 = vadd.f32 %v1413_v59, %v1089_v33  ;;  %3586 = vmatprep.mubr.msk.bf16.mxu1 %vm1700_vm0, %v1651_v52  ;;  %v1611_v25 = vmax.f32 %v1547_v11, 0.0  ;;  %v1030_v33 = vmul.f32 %v4481_v51, %v928_v7  ;;  %s3718_s15 = sshll.u32 %s3813_s13, 4  ;;  %s3719_s15 = int_to_ptr.vmem [resolvable:$false] %s3718_s15 }
 0x20f   : > { %s3720_s16 = scalar_lea.vmem %s3719_s15, 8192  ;;  %p3721_p0 = scmp.lt.s32.totalorder %s5335_s28, %s3719_s15 }
 0x210   : > { %v1548_v49 = vadd.f32 %v4529_v2, %v1477_v40  ;;  %v916_v63 = vpop.permute.xlu1 %915  ;;  %p3722_p1 = scmp.lt.s32.totalorder %s3720_s16, %s3714_s12 }
 0x211   : > { %v1027_v60 = vmul.f32 %v4481_v51, %v916_v63 }
 0x212   : > { %v1612_v17 = vmax.f32 %v1548_v49, 0.0  ;;  %p3723_p2 = por %p3722_p1, %p3721_p0 }
 0x213   : > { %v1091_v18 = vadd.f32 %v1027_v60, %v703_v27  ;;  %v940_v60 = vpop.permute.xlu0 %939  ;;  %v708_v27 = vmul.f32 %v4490_v54, %v5575_v37 }
 0x214   : > { %v1652_v0 = vpack.c.bf16 %v1612_v17, %v1611_v25  ;;  %v920_v41 = vpop.permute.xlu1 %919  ;;  %v4927_v25 = vld [vmem:[%s5413_s2] ss:$0 sm:$0xff]  ;;  %p3724_p3 = pnand %p3723_p2, %p3717_p13 }
 0x215   : > { %v1479_v39 = vadd.f32 %v1415_v30, %v1091_v18  ;;  %v1028_v28 = vmul.f32 %v4481_v51, %v920_v41  ;;  %v1033_v18 = vmul.f32 %v4481_v51, %v940_v60  ;;  %v5583_v60 = vld [vmem:[#allocation69_spill] sm:$0xff] }
 0x216   : > { %3587 = vmatmul.mubr.msk.bf16.gmra.mrb[12].mxu1 %vm1700_vm0, %v1652_v0  ;;  %v715_v37 = vmul.f32 %v4490_v54, %v5583_v60 }
 0x217   : > { %v1550_v42 = vadd.f32 %v4529_v2, %v1479_v39  ;;  %v1092_v9 = vadd.f32 %v1028_v28, %v704_v26  ;;  %v1097_v28 = vadd.f32 %v1033_v18, %v709_v10 }
 0x219   : > { %v1300_v45 = vpop.permute.xlu1 %1299  ;;  %v1614_v22 = vmax.f32 %v1550_v42, 0.0  ;;  %v944_v42 = vpop.permute.xlu0 %943 }
 0x21a   : > { %v1414_v5 = vmul.f32 %v4494_v62, %v1300_v45 }
 0x21c   : > { %v1478_v50 = vadd.f32 %v1414_v5, %v1090_v21 }
 0x21d   : > { %v1308_v13 = vpop.permute.xlu1 %1307 }
 0x21e   : > { %v1549_v43 = vadd.f32 %v4529_v2, %v1478_v50  ;;  %v1416_v35 = vmul.f32 %v4494_v62, %v1308_v13 }
 0x220   : > { %v1613_v38 = vmax.f32 %v1549_v43, 0.0  ;;  %v1480_v46 = vadd.f32 %v1416_v35, %v1092_v9  ;;  %v5577_v9 = vld [vmem:[#allocation65_spill] sm:$0xff] }
 0x221   : > { %v1312_v34 = vpop.permute.xlu1 %1311  ;;  %v711_v43 = vmul.f32 %v4490_v54, %v5577_v9 }
 0x222   : > { %v1653_v4 = vpack.c.bf16 %v1614_v22, %v1613_v38  ;;  %v1417_v19 = vmul.f32 %v4494_v62, %v1312_v34  ;;  %v1551_v14 = vadd.f32 %v4529_v2, %v1480_v46  ;;  %v5578_v46 = vld [vmem:[#allocation8_spill] sm:$0xff] }
 0x223   : > { %v1423_v34 = vmul.f32 %v4494_v62, %v5578_v46  ;;  %v5016_v46 = vld [vmem:[%s5415_s4] ss:$0 sm:$0xff] }
 0x224   : > { %v1481_v58 = vadd.f32 %v1417_v19, %v1093_v6  ;;  %3590 = vmatprep.mubr.msk.bf16.mxu1 %vm1700_vm0, %v1653_v4  ;;  %v1615_v29 = vmax.f32 %v1551_v14, 0.0  ;;  %v1034_v6 = vmul.f32 %v4481_v51, %v944_v42  ;;  %v956_v4 = vpop.permute.xlu0 %955  ;;  %v5579_v19 = vld [vmem:[#allocation66_spill] sm:$0xff] }
 0x225   : > { %v710_v14 = vmul.f32 %v4490_v54, %v5579_v19 }
 0x226   : > { %v1552_v24 = vadd.f32 %v4529_v2, %v1481_v58  ;;  %v932_v15 = vpop.permute.xlu1 %931  ;;  %v5574_v2 = vld [vmem:[#allocation62_spill] sm:$0xff] }
 0x227   : > { %v1031_v57 = vmul.f32 %v4481_v51, %v932_v15  ;;  %v706_v52 = vmul.f32 %v4490_v54, %v5574_v2  ;;  %v1098_v15 = vadd.f32 %v1034_v6, %v710_v14 }
 0x228   : > { %v1616_v1 = vmax.f32 %v1552_v24, 0.0 }
 0x229   : > { %v1095_v8 = vadd.f32 %v1031_v57, %v707_v32  ;;  %v1094_v40 = vadd.f32 %v1030_v33, %v706_v52  ;;  %v5580_v32 = vld [vmem:[#allocation79_spill] sm:$0xff] }
 0x22a   : > { %v1654_v31 = vpack.c.bf16 %v1616_v1, %v1615_v29  ;;  %v936_v16 = vpop.permute.xlu1 %935  ;;  %v2410_v29 = vadd.s32 16, %v5580_v32  ;;  %v5581_v1 = vld [vmem:[#allocation68_spill] sm:$0xff]  ;;  %v2411_v52 = vadd.s32 24, %v5580_v32 }
 0x22b   : > { %v1483_v59 = vadd.f32 %v1419_v3, %v1095_v8  ;;  %v1032_v49 = vmul.f32 %v4481_v51, %v936_v16  ;;  %v712_v7 = vmul.f32 %v4490_v54, %v5581_v1  ;;  %v5582_v3 = vld [vmem:[#allocation67_spill] sm:$0xff] }
 0x22c   : > { %3591 = vmatmul.mubr.msk.bf16.gmra.mrb[16].mxu1 %vm1700_vm0, %v1654_v31  ;;  %v960_v31 = vpop.permute.xlu0 %959  ;;  %v713_v33 = vmul.f32 %v4490_v54, %v5582_v3  ;;  %v4977_v10 = vadd.s32 %v4955_v20, %v2411_v52 }
 0x22d   : > { %v1554_v17 = vadd.f32 %v4927_v25, %v1483_v59  ;;  %v1096_v41 = vadd.f32 %v1032_v49, %v708_v27  ;;  %v2409_v59 = vadd.s32 8, %v5580_v32  ;;  %v5584_v27 = vld [vmem:[#allocation70_spill] sm:$0xff] }
 0x22e   : > { %vm2540_vm3 = vcmp.lt.s32.totalorder %v4977_v10, 1024 }
 0x22f   : > { %v1316_v11 = vpop.permute.xlu1 %1315  ;;  %v1618_v53 = vmax.f32 %v1554_v17, 0.0  ;;  %v714_v17 = vmul.f32 %v4490_v54, %v5584_v27 }
 0x230   : > { %v1418_v63 = vmul.f32 %v4494_v62, %v1316_v11  ;;  %v1037_v11 = vmul.f32 %v4481_v51, %v956_v4  ;;  %v2416_v4 = vadd.s32 64, %v5580_v32 }
 0x232   : > { %v1482_v48 = vadd.f32 %v1418_v63, %v1094_v40  ;;  %v5040_v60 = vadd.s32 %v4955_v20, %v2416_v4 }
 0x233   : > { %v1324_v0 = vpop.permute.xlu1 %1323 }
 0x234   : > { %v1553_v12 = vadd.f32 %v4927_v25, %v1482_v48  ;;  %v1420_v30 = vmul.f32 %v4494_v62, %v1324_v0  ;;  %v4969_v48 = vadd.s32 %v4955_v20, %v2410_v29  ;;  %v4973_v0 = vadd.s32 %v4955_v20, %v5580_v32 }
 0x235   : > { %vm2545_vm9 = vcmp.lt.s32.totalorder %v5040_v60, 1024  ;;  %v2425_v60 = vadd.s32 136, %v5580_v32 }
 0x236   : > { %v1617_v39 = vmax.f32 %v1553_v12, 0.0  ;;  %v1484_v45 = vadd.f32 %v1420_v30, %v1096_v41  ;;  %v2412_v30 = vadd.s32 32, %v5580_v32  ;;  %vm2539_vm1 = vcmp.lt.s32.totalorder %v4969_v48, 1024 }
 0x237   : > { %v1328_v21 = vpop.permute.xlu1 %1327  ;;  %vm2537_vm2 = vcmp.lt.s32.totalorder %v4973_v0, 1024 }
 0x238   : > { %v1655_v5 = vpack.c.bf16 %v1618_v53, %v1617_v39  ;;  %v1421_v23 = vmul.f32 %v4494_v62, %v1328_v21  ;;  %v1555_v55 = vadd.f32 %v4927_v25, %v1484_v45  ;;  %v4980_v53 = vadd.s32 %v4955_v20, %v2409_v59 }
 0x239   : > { %v2414_v39 = vadd.s32 48, %v5580_v32  ;;  %v2415_v45 = vadd.s32 56, %v5580_v32  ;;  %v1101_v21 = vadd.f32 %v1037_v11, %v713_v33  ;;  %v2420_v33 = vadd.s32 96, %v5580_v32 }
 0x23a   : > { %v1485_v26 = vadd.f32 %v1421_v23, %v1097_v28  ;;  %3594 = vmatprep.mubr.msk.bf16.mxu1 %vm1700_vm0, %v1655_v5  ;;  %v1619_v35 = vmax.f32 %v1555_v55, 0.0  ;;  %v972_v28 = vpop.permute.xlu0 %971  ;;  %v2413_v55 = vadd.s32 40, %v5580_v32  ;;  %vm2538_vm4 = vcmp.lt.s32.totalorder %v4980_v53, 1024 }
 0x23b   : > { %v5062_v0 = vadd.s32 %v4955_v20, %v2420_v33 }
 0x23c   : > { %v1556_v50 = vadd.f32 %v4927_v25, %v1485_v26  ;;  %v948_v13 = vpop.permute.xlu1 %947  ;;  %v5585_v26 = vld [vmem:[#allocation71_spill] sm:$0xff]  ;;  %v5019_v6 = vadd.s32 %v4955_v20, %v2413_v55 }
 0x23d   : > { %v1035_v36 = vmul.f32 %v4481_v51, %v948_v13  ;;  %v717_v42 = vmul.f32 %v4490_v54, %v5585_v26  ;;  %vm2549_vm13 = vcmp.lt.s32.totalorder %v5062_v0, 1024  ;;  %v2428_v0 = vadd.s32 160, %v5580_v32 }
 0x23e   : > { %v1620_v44 = vmax.f32 %v1556_v50, 0.0  ;;  %v5586_v50 = vld [vmem:[#allocation72_spill] sm:$0xff]  ;;  %vm2542_vm7 = vcmp.lt.s32.totalorder %v5019_v6, 1024 }
 0x23f   : > { %v1099_v22 = vadd.f32 %v1035_v36, %v711_v43  ;;  %v4990_v13 = vmul.f32 %v4490_v54, %v5586_v50  ;;  %v2418_v36 = vadd.s32 80, %v5580_v32  ;;  %v5006_v54 = vadd.s32 %v4955_v20, %v2414_v39 }
 0x240   : > { %v1656_v47 = vpack.c.bf16 %v1620_v44, %v1619_v35  ;;  %v952_v38 = vpop.permute.xlu1 %951  ;;  %v4998_v35 = vadd.s32 %v4955_v20, %v2412_v30  ;;  %v5009_v44 = vadd.s32 %v4955_v20, %v2415_v45 }
 0x241   : > { %v1487_v58 = vadd.f32 %v1423_v34, %v1099_v22  ;;  %v1036_v57 = vmul.f32 %v4481_v51, %v952_v38  ;;  %v1352_v34 = vpop.permute.xlu0 %1351  ;;  %vm2543_vm6 = vcmp.lt.s32.totalorder %v5006_v54, 1024 }
 0x242   : > { %3595 = vmatmul.mubr.msk.bf16.gmra.mrb[20].mxu1 %vm1700_vm0, %v1656_v47  ;;  %v1038_v47 = vmul.f32 %v4481_v51, %v960_v31  ;;  %vm2541_vm5 = vcmp.lt.s32.totalorder %v4998_v35, 1024  ;;  %vm2544_vm8 = vcmp.lt.s32.totalorder %v5009_v44, 1024 }
 0x243   : > { %v1558_v8 = vadd.f32 %v4927_v25, %v1487_v58  ;;  %v1100_v40 = vadd.f32 %v1036_v57, %v712_v7  ;;  %v5024_v58 = vadd.s32 %v4955_v20, %v2418_v36  ;;  %v1041_v57 = vmul.f32 %v4481_v51, %v972_v28 }
 0x244   : > { %v2422_v7 = vadd.s32 112, %v5580_v32 }
 0x245   : > { %v1332_v24 = vpop.permute.xlu1 %1331  ;;  %v1622_v18 = vmax.f32 %v1558_v8, 0.0  ;;  %v5054_v30 = vadd.f32 %v1041_v57, %v717_v42  ;;  %vm2547_vm10 = vcmp.lt.s32.totalorder %v5024_v58, 1024 }
 0x246   : > { %v1422_v56 = vmul.f32 %v4494_v62, %v1332_v24  ;;  %v2419_v24 = vadd.s32 88, %v5580_v32  ;;  %v5059_v39 = vadd.s32 %v4955_v20, %v2422_v7 }
 0x248   : > { %v1486_v16 = vadd.f32 %v1422_v56, %v1098_v15  ;;  %v2417_v15 = vadd.s32 72, %v5580_v32  ;;  %v5043_v27 = vadd.s32 %v4955_v20, %v2419_v24  ;;  %vm2551_vm15 = vcmp.lt.s32.totalorder %v5059_v39, 1024 }
 0x249   : > { %v1340_v2 = vpop.permute.xlu1 %1339 }
 0x24a   : > { %v1557_v49 = vadd.f32 %v4927_v25, %v1486_v16  ;;  %v1424_v63 = vmul.f32 %v4494_v62, %v1340_v2  ;;  %v1427_v16 = vmul.f32 %v4494_v62, %v1352_v34  ;;  %vm2548_vm12 = vcmp.lt.s32.totalorder %v5043_v27, 1024 }
 0x24c   : > { %v1621_v41 = vmax.f32 %v1557_v49, 0.0  ;;  %v1488_v12 = vadd.f32 %v1424_v63, %v1100_v40  ;;  %v2423_v49 = vadd.s32 120, %v5580_v32  ;;  %v1102_v63 = vadd.f32 %v1038_v47, %v714_v17 }
 0x24d   : > { %v1344_v61 = vpop.permute.xlu1 %1343  ;;  %v5052_v17 = vadd.s32 %v4955_v20, %v2417_v15  ;;  %v2426_v47 = vadd.s32 144, %v5580_v32 }
 0x24e   : > { %v1657_v5 = vpack.c.bf16 %v1622_v18, %v1621_v41  ;;  %v1425_v23 = vmul.f32 %v4494_v62, %v1344_v61  ;;  %v1559_v9 = vadd.f32 %v4927_v25, %v1488_v12  ;;  %v2421_v18 = vadd.s32 104, %v5580_v32 }
 0x24f   : > { %v5071_v48 = vadd.s32 %v4955_v20, %v2423_v49  ;;  %vm2546_vm11 = vcmp.lt.s32.totalorder %v5052_v17, 1024 }
 0x250   : > { %v1489_v43 = vadd.f32 %v1425_v23, %v1101_v21  ;;  %3598 = vmatprep.mubr.msk.bf16.mxu1 %vm1700_vm0, %v1657_v5  ;;  %v1623_v56 = vmax.f32 %v1559_v9, 0.0  ;;  %v5074_v50 = vadd.s32 %v4955_v20, %v2421_v18 }
 0x252   : > { %v1560_v22 = vadd.f32 %v4927_v25, %v1489_v43  ;;  %v964_v38 = vpop.permute.xlu1 %963  ;;  %vm2550_vm14 = vcmp.lt.s32.totalorder %v5074_v50, 1024  ;;  %v2429_v50 = vadd.s32 168, %v5580_v32 }
 0x253   : > { %v1039_v19 = vmul.f32 %v4481_v51, %v964_v38  ;;  %v3544_v14 = vpop.f32.mrb[0].mxu0 }
 0x254   : > { %v1624_v29 = vmax.f32 %v1560_v22, 0.0  ;;  %v1831_v1 = vpop.f32.mrb[1].mxu0  ;;  %v1840_v31 = vadd.f32 %v3544_v14, %v5016_v46 }
 0x255   : > { %v1832_v8 = vadd.f32 %v5016_v46, %v1831_v1  ;;  %v3545_v3 = vpop.f32.mrb[2].mxu0  ;;  %v1103_v52 = vadd.f32 %v1039_v19, %v715_v37 }
 0x256   : > { %v1658_v2 = vpack.c.bf16 %v1624_v29, %v1623_v56  ;;  %v1843_v59 = vadd.f32 %v3545_v3, %v5016_v46  ;;  %v968_v11 = vpop.permute.xlu1 %967  ;;  %v1834_v40 = vpop.f32.mrb[3].mxu0  ;;  %v2731_v61 = vsel %vm2539_vm1, %v1840_v31, 0.0  ;;  %v2424_v3 = vadd.s32 128, %v5580_v32 }
 0x257   : > { %v2729_v37 = vsel %vm2537_vm2, %v1832_v8, 0.0  ;;  %v1835_v12 = vadd.f32 %v5016_v46, %v1834_v40  ;;  %v1491_v45 = vadd.f32 %v1427_v16, %v1103_v52  ;;  %v2864_v36 = vmul.f32 %v2731_v61, %v2731_v61 }
 0x258   : > { %v3315_v41 = vpack.c.bf16 %v1843_v59, %v1840_v31  ;;  %3599 = vmatmul.mubr.msk.bf16.gmra.mrb[24].mxu1 %vm1700_vm0, %v1658_v2  ;;  %v2862_v5 = vmul.f32 %v2729_v37, %v2729_v37  ;;  %v2732_v9 = vsel %vm2540_vm3, %v1843_v59, 0.0  ;;  %v1040_v22 = vmul.f32 %v4481_v51, %v968_v11 }
 0x259   : > { %v3310_v21 = vpack.c.bf16 %v1835_v12, %v1832_v8  ;;  %v2730_v28 = vsel %vm2538_vm4, %v1835_v12, 0.0  ;;  %v1562_v14 = vadd.f32 %v4927_v25, %v1491_v45  ;;  %v2865_v56 = vmul.f32 %v2732_v9, %v2732_v9 }
 0x25a   : > { %3467 = vst [vmem:[%s5064_s18 + $0x8] sm:$0xff] %v3315_v41   ;;  %v2793_v23 = vadd.f32 %v2730_v28, %v2729_v37  ;;  %v2863_v55 = vmul.f32 %v2730_v28, %v2730_v28  ;;  %v1104_v33 = vadd.f32 %v1040_v22, %v4990_v13  ;;  %v5103_v12 = vadd.s32 %v4955_v20, %v2426_v47 }
 0x25b   : > { %v1348_v26 = vpop.permute.xlu1 %1347  ;;  %v3548_v42 = vpop.f32.mrb[4].mxu0  ;;  %3311 = vst [vmem:[%s5064_s18] sm:$0xff] %v3310_v21   ;;  %v1626_v59 = vmax.f32 %v1562_v14, 0.0  ;;  %vm2552_vm1 = vcmp.lt.s32.totalorder %v5071_v48, 1024 }
 0x25c   : > { %v1426_v53 = vmul.f32 %v4494_v62, %v1348_v26  ;;  %v1847_v43 = vpop.f32.mrb[5].mxu0  ;;  %v2794_v38 = vadd.f32 %v2793_v23, %v2731_v61  ;;  %v2926_v34 = vadd.f32 %v2863_v55, %v2862_v5  ;;  %v1856_v10 = vadd.f32 %v3548_v42, %v5016_v46 }
 0x25d   : > { %v1848_v4 = vadd.f32 %v5016_v46, %v1847_v43  ;;  %v3549_v19 = vpop.f32.mrb[6].mxu0  ;;  %vm2555_vm2 = vcmp.lt.s32.totalorder %v5103_v12, 1024 }
 0x25e   : > { %v1490_v24 = vadd.f32 %v1426_v53, %v1102_v63  ;;  %v1859_v15 = vadd.f32 %v3549_v19, %v5016_v46  ;;  %v1850_v57 = vpop.f32.mrb[7].mxu0  ;;  %v2927_v29 = vadd.f32 %v2926_v34, %v2864_v36  ;;  %v2795_v7 = vadd.f32 %v2794_v38, %v2732_v9 }
 0x25f   : > { %v2733_v1 = vsel %vm2541_vm5, %v1848_v4, 0.0  ;;  %v1356_v51 = vpop.permute.xlu1 %1355  ;;  %v1851_v35 = vadd.f32 %v5016_v46, %v1850_v57  ;;  %v2735_v40 = vsel %vm2543_vm6, %v1856_v10, 0.0  ;;  %v2427_v19 = vadd.s32 152, %v5580_v32 }
 0x260   : > { %v1561_v31 = vadd.f32 %v4927_v25, %v1490_v24  ;;  %v2866_v8 = vmul.f32 %v2733_v1, %v2733_v1  ;;  %v3325_v16 = vpack.c.bf16 %v1859_v15, %v1856_v10  ;;  %v2796_v2 = vadd.f32 %v2795_v7, %v2733_v1 }
 0x261   : > { %v2928_v52 = vadd.f32 %v2927_v29, %v2865_v56  ;;  %v1428_v49 = vmul.f32 %v4494_v62, %v1356_v51  ;;  %v3320_v18 = vpack.c.bf16 %v1851_v35, %v1848_v4  ;;  %v2734_v13 = vsel %vm2542_vm7, %v1851_v35, 0.0 }
 0x262   : > { %v1625_v11 = vmax.f32 %v1561_v31, 0.0  ;;  %3469 = vst [vmem:[%s5064_s18 + $0x18] sm:$0xff] %v3325_v16   ;;  %v2797_v45 = vadd.f32 %v2796_v2, %v2734_v13  ;;  %v2867_v21 = vmul.f32 %v2734_v13, %v2734_v13  ;;  %v2868_v5 = vmul.f32 %v2735_v40, %v2735_v40 }
 0x263   : > { %v2929_v63 = vadd.f32 %v2928_v52, %v2866_v8  ;;  %v1360_v37 = vpop.permute.xlu1 %1359  ;;  %v3552_v41 = vpop.f32.mrb[8].mxu0  ;;  %v1492_v28 = vadd.f32 %v1428_v49, %v1104_v33  ;;  %v2736_v23 = vsel %vm2544_vm8, %v1859_v15, 0.0  ;;  %3468 = vst [vmem:[%s5064_s18 + $0x10] sm:$0xff] %v3320_v18   ;;  %v2489_v51 = vadd.s32 %v4955_v20, %v2424_v3 }
 0x264   : > { %v1659_v61 = vpack.c.bf16 %v1626_v59, %v1625_v11  ;;  %v1863_v54 = vpop.f32.mrb[9].mxu0  ;;  %v1429_v6 = vmul.f32 %v4494_v62, %v1360_v37  ;;  %v2798_v42 = vadd.f32 %v2797_v45, %v2735_v40  ;;  %v1872_v9 = vadd.f32 %v3552_v41, %v5016_v46 }
 0x265   : > { %v1864_v55 = vadd.f32 %v5016_v46, %v1863_v54  ;;  %v3553_v26 = vpop.f32.mrb[10].mxu0  ;;  %v2930_v36 = vadd.f32 %v2929_v63, %v2867_v21  ;;  %v1563_v44 = vadd.f32 %v4927_v25, %v1492_v28  ;;  %v2869_v38 = vmul.f32 %v2736_v23, %v2736_v23 }
 0x266   : > { %v1875_v53 = vadd.f32 %v3553_v26, %v5016_v46  ;;  %v1866_v43 = vpop.f32.mrb[11].mxu0  ;;  %3602 = vmatprep.mubr.msk.bf16.mxu1 %vm1700_vm0, %v1659_v61  ;;  %v1493_v47 = vadd.f32 %v1429_v6, %v5054_v30  ;;  %v2799_v4 = vadd.f32 %v2798_v42, %v2736_v23  ;;  %v2739_v30 = vsel %vm2547_vm10, %v1872_v9, 0.0 }
 0x267   : > { %v2737_v62 = vsel %vm2545_vm9, %v1864_v55, 0.0  ;;  %v1867_v22 = vadd.f32 %v5016_v46, %v1866_v43  ;;  %v2931_v34 = vadd.f32 %v2930_v36, %v2868_v5  ;;  %v1627_v29 = vmax.f32 %v1563_v44, 0.0 }
 0x268   : > { %v1564_v14 = vadd.f32 %v4927_v25, %v1493_v47  ;;  %v2870_v24 = vmul.f32 %v2737_v62, %v2737_v62  ;;  %v3335_v10 = vpack.c.bf16 %v1875_v53, %v1872_v9  ;;  %v2800_v15 = vadd.f32 %v2799_v4, %v2737_v62 }
 0x269   : > { %v2932_v57 = vadd.f32 %v2931_v34, %v2869_v38  ;;  %v3330_v56 = vpack.c.bf16 %v1867_v22, %v1864_v55  ;;  %v2738_v7 = vsel %vm2546_vm11, %v1867_v22, 0.0  ;;  %v2740_v8 = vsel %vm2548_vm12, %v1875_v53, 0.0 }
 0x26a   : > { %v1628_v1 = vmax.f32 %v1564_v14, 0.0  ;;  %3471 = vst [vmem:[%s5064_s18 + $0x28] sm:$0xff] %v3335_v10   ;;  %v2801_v16 = vadd.f32 %v2800_v15, %v2738_v7  ;;  %v2871_v58 = vmul.f32 %v2738_v7, %v2738_v7  ;;  %v2872_v52 = vmul.f32 %v2739_v30, %v2739_v30 }
 0x26b   : > { %v3556_v25 = vpop.f32.mrb[12].mxu0  ;;  %v2933_v31 = vadd.f32 %v2932_v57, %v2870_v24  ;;  %3470 = vst [vmem:[%s5064_s18 + $0x20] sm:$0xff] %v3330_v56   ;;  %v2490_v11 = vadd.s32 %v4955_v20, %v2425_v60  ;;  %v2873_v27 = vmul.f32 %v2740_v8, %v2740_v8  ;;  %v2430_v37 = vadd.s32 176, %v5580_v32 }
 0x26c   : > { %v1879_v33 = vpop.f32.mrb[13].mxu0  ;;  %v1660_v2 = vpack.c.bf16 %v1628_v1, %v1627_v29  ;;  %v2802_v17 = vadd.f32 %v2801_v16, %v2739_v30  ;;  %v1888_v49 = vadd.f32 %v3556_v25, %v5016_v46  ;;  %v2431_v5 = vadd.s32 184, %v5580_v32 }
 0x26d   : > { %v1880_v35 = vadd.f32 %v5016_v46, %v1879_v33  ;;  %v3557_v59 = vpop.f32.mrb[14].mxu0  ;;  %v2934_v40 = vadd.f32 %v2933_v31, %v2871_v58  ;;  %v2492_v36 = vadd.s32 %v4955_v20, %v2427_v19  ;;  %vm2554_vm3 = vcmp.lt.s32.totalorder %v2490_v11, 1024 }
 0x26e   : > { %v1891_v3 = vadd.f32 %v3557_v59, %v5016_v46  ;;  %v1882_v63 = vpop.f32.mrb[15].mxu0  ;;  %3603 = vmatmul.mubr.msk.bf16.gmra.mrb[28].mxu1 %vm1700_vm0, %v1660_v2  ;;  %v2803_v61 = vadd.f32 %v2802_v17, %v2740_v8  ;;  %v2743_v23 = vsel %vm2551_vm15, %v1888_v49, 0.0  ;;  %vm2553_vm0 = vcmp.lt.s32.totalorder %v2489_v51, 1024 }
 0x26f   : > { %v2741_v18 = vsel %vm2549_vm13, %v1880_v35, 0.0  ;;  %v1883_v13 = vadd.f32 %v5016_v46, %v1882_v63  ;;  %v2935_v41 = vadd.f32 %v2934_v40, %v2872_v52  ;;  %v2495_v39 = vadd.s32 %v4955_v20, %v2430_v37 }
 0x270   : > { %v2874_v45 = vmul.f32 %v2741_v18, %v2741_v18  ;;  %v3345_v21 = vpack.c.bf16 %v1891_v3, %v1888_v49  ;;  %v2804_v6 = vadd.f32 %v2803_v61, %v2741_v18  ;;  %v2744_v53 = vsel %vm2552_vm1, %v1891_v3, 0.0 }
 0x271   : > { %v3340_v28 = vpack.c.bf16 %v1883_v13, %v1880_v35  ;;  %v2742_v54 = vsel %vm2550_vm14, %v1883_v13, 0.0  ;;  %v2936_v55 = vadd.f32 %v2935_v41, %v2873_v27  ;;  %v2876_v47 = vmul.f32 %v2743_v23, %v2743_v23 }
 0x272   : > { %3473 = vst [vmem:[%s5064_s18 + $0x38] sm:$0xff] %v3345_v21   ;;  %v2875_v26 = vmul.f32 %v2742_v54, %v2742_v54  ;;  %v2805_v43 = vadd.f32 %v2804_v6, %v2742_v54  ;;  %v2493_v38 = vadd.s32 %v4955_v20, %v2428_v0  ;;  %v5160_v34 = vadd.s32 %v4955_v20, %v2431_v5 }
 0x273   : > { %3472 = vst [vmem:[%s5064_s18 + $0x30] sm:$0xff] %v3340_v28   ;;  %v3560_v42 = vpop.f32.mrb[16].mxu0  ;;  %v2937_v9 = vadd.f32 %v2936_v55, %v2874_v45  ;;  %v2877_v10 = vmul.f32 %v2744_v53, %v2744_v53  ;;  %v2494_v15 = vadd.s32 %v4955_v20, %v2429_v50  ;;  %vm2556_vm4 = vcmp.lt.s32.totalorder %v2492_v36, 1024 }
 0x274   : > { %v1895_v44 = vpop.f32.mrb[17].mxu0  ;;  %v2806_v4 = vadd.f32 %v2805_v43, %v2743_v23  ;;  %v1904_v14 = vadd.f32 %v3560_v42, %v5016_v46  ;;  %vm2559_vm5 = vcmp.lt.s32.totalorder %v2495_v39, 1024  ;;  %vm2557_vm6 = vcmp.lt.s32.totalorder %v2493_v38, 1024 }
 0x275   : > { %v1896_v62 = vadd.f32 %v5016_v46, %v1895_v44  ;;  %v3561_v22 = vpop.f32.mrb[18].mxu0  ;;  %v2938_v19 = vadd.f32 %v2937_v9, %v2875_v26  ;;  %vm2560_vm7 = vcmp.lt.s32.totalorder %v5160_v34, 1024  ;;  %v2432_v33 = vadd.s32 192, %v5580_v32 }
 0x276   : > { %v1907_v48 = vadd.f32 %v3561_v22, %v5016_v46  ;;  %v1898_v24 = vpop.f32.mrb[19].mxu0  ;;  %v2807_v56 = vadd.f32 %v2806_v4, %v2744_v53  ;;  %v2747_v31 = vsel %vm2555_vm2, %v1904_v14, 0.0  ;;  %vm2558_vm8 = vcmp.lt.s32.totalorder %v2494_v15, 1024 }
 0x277   : > { %v2745_v60 = vsel %vm2553_vm0, %v1896_v62, 0.0  ;;  %v1899_v30 = vadd.f32 %v5016_v46, %v1898_v24  ;;  %v2939_v57 = vadd.f32 %v2938_v19, %v2876_v47  ;;  %v2880_v11 = vmul.f32 %v2747_v31, %v2747_v31 }
 0x278   : > { %v2878_v29 = vmul.f32 %v2745_v60, %v2745_v60  ;;  %v3355_v1 = vpack.c.bf16 %v1907_v48, %v1904_v14  ;;  %v2808_v8 = vadd.f32 %v2807_v56, %v2745_v60  ;;  %v2748_v52 = vsel %vm2556_vm4, %v1907_v48, 0.0 }
 0x279   : > { %v3350_v7 = vpack.c.bf16 %v1899_v30, %v1896_v62  ;;  %v2746_v25 = vsel %vm2554_vm3, %v1899_v30, 0.0  ;;  %v2940_v16 = vadd.f32 %v2939_v57, %v2877_v10  ;;  %v2434_v40 = vadd.s32 208, %v5580_v32 }
 0x27a   : > { %3475 = vst [vmem:[%s5064_s18 + $0x48] sm:$0xff] %v3355_v1   ;;  %v2879_v51 = vmul.f32 %v2746_v25, %v2746_v25  ;;  %v2809_v35 = vadd.f32 %v2808_v8, %v2746_v25  ;;  %v2433_v49 = vadd.s32 200, %v5580_v32  ;;  %v2881_v37 = vmul.f32 %v2748_v52, %v2748_v52 }
 0x27b   : > { %3474 = vst [vmem:[%s5064_s18 + $0x40] sm:$0xff] %v3350_v7   ;;  %v3564_v58 = vpop.f32.mrb[20].mxu0  ;;  %v2941_v2 = vadd.f32 %v2940_v16, %v2878_v29  ;;  %v2497_v45 = vadd.s32 %v4955_v20, %v2432_v33  ;;  %v2435_v6 = vadd.s32 216, %v5580_v32  ;;  %v2499_v53 = vadd.s32 %v4955_v20, %v2434_v40 }
 0x27c   : > { %v1911_v59 = vpop.f32.mrb[21].mxu0  ;;  %v2810_v3 = vadd.f32 %v2809_v35, %v2747_v31  ;;  %v1920_v27 = vadd.f32 %v3564_v58, %v5016_v46  ;;  %v2498_v55 = vadd.s32 %v4955_v20, %v2433_v49  ;;  %v2436_v16 = vadd.s32 224, %v5580_v32 }
 0x27d   : > { %v1912_v12 = vadd.f32 %v5016_v46, %v1911_v59  ;;  %v3565_v17 = vpop.f32.mrb[22].mxu0  ;;  %v2942_v63 = vadd.f32 %v2941_v2, %v2879_v51  ;;  %vm2561_vm9 = vcmp.lt.s32.totalorder %v2497_v45, 1024  ;;  %v2500_v4 = vadd.s32 %v4955_v20, %v2435_v6 }
 0x27e   : > { %v1923_v18 = vadd.f32 %v3565_v17, %v5016_v46  ;;  %v1914_v13 = vpop.f32.mrb[23].mxu0  ;;  %v2811_v28 = vadd.f32 %v2810_v3, %v2748_v52  ;;  %v2751_v26 = vsel %vm2559_vm5, %v1920_v27, 0.0  ;;  %vm2562_vm10 = vcmp.lt.s32.totalorder %v2498_v55, 1024 }
 0x27f   : > { %v2749_v41 = vsel %vm2557_vm6, %v1912_v12, 0.0  ;;  %v1915_v61 = vadd.f32 %v5016_v46, %v1914_v13  ;;  %v2943_v21 = vadd.f32 %v2942_v63, %v2880_v11  ;;  %v2884_v22 = vmul.f32 %v2751_v26, %v2751_v26 }
 0x280   : > { %v2882_v54 = vmul.f32 %v2749_v41, %v2749_v41  ;;  %v3365_v0 = vpack.c.bf16 %v1923_v18, %v1920_v27  ;;  %v2812_v42 = vadd.f32 %v2811_v28, %v2749_v41  ;;  %v2752_v44 = vsel %vm2560_vm7, %v1923_v18, 0.0 }
 0x281   : > { %v3360_v5 = vpack.c.bf16 %v1915_v61, %v1912_v12  ;;  %v2750_v23 = vsel %vm2558_vm8, %v1915_v61, 0.0  ;;  %v2944_v36 = vadd.f32 %v2943_v21, %v2881_v37  ;;  %v2885_v34 = vmul.f32 %v2752_v44, %v2752_v44 }
 0x282   : > { %3477 = vst [vmem:[%s5064_s18 + $0x58] sm:$0xff] %v3365_v0   ;;  %v2883_v50 = vmul.f32 %v2750_v23, %v2750_v23  ;;  %v2813_v47 = vadd.f32 %v2812_v42, %v2750_v23  ;;  %vm2563_vm11 = vcmp.lt.s32.totalorder %v2499_v53, 1024  ;;  %vm2564_vm12 = vcmp.lt.s32.totalorder %v2500_v4, 1024 }
 0x283   : > { %3476 = vst [vmem:[%s5064_s18 + $0x50] sm:$0xff] %v3360_v5   ;;  %v3568_v9 = vpop.f32.mrb[24].mxu0  ;;  %v2945_v43 = vadd.f32 %v2944_v36, %v2882_v54  ;;  %v2438_v58 = vadd.s32 240, %v5580_v32  ;;  %v2437_v52 = vadd.s32 232, %v5580_v32  ;;  %v2439_v59 = vadd.s32 248, %v5580_v32 }
 0x284   : > { %v1927_v62 = vpop.f32.mrb[25].mxu0  ;;  %v2814_v19 = vadd.f32 %v2813_v47, %v2751_v26  ;;  %v1936_v48 = vadd.f32 %v3568_v9, %v5016_v46  ;;  %v2501_v40 = vadd.s32 %v4955_v20, %v2436_v16 }
 0x285   : > { %v1928_v38 = vadd.f32 %v5016_v46, %v1927_v62  ;;  %v3569_v39 = vpop.f32.mrb[26].mxu0  ;;  %v2946_v14 = vadd.f32 %v2945_v43, %v2883_v50  ;;  %v2503_v49 = vadd.s32 %v4955_v20, %v2438_v58  ;;  %v2502_v18 = vadd.s32 %v4955_v20, %v2437_v52 }
 0x286   : > { %v1939_v24 = vadd.f32 %v3569_v39, %v5016_v46  ;;  %v1930_v10 = vpop.f32.mrb[27].mxu0  ;;  %v2815_v57 = vadd.f32 %v2814_v19, %v2752_v44  ;;  %v2755_v51 = vsel %vm2563_vm11, %v1936_v48, 0.0  ;;  %vm2565_vm13 = vcmp.lt.s32.totalorder %v2501_v40, 1024 }
 0x287   : > { %v2753_v60 = vsel %vm2561_vm9, %v1928_v38, 0.0  ;;  %v1931_v30 = vadd.f32 %v5016_v46, %v1930_v10  ;;  %v2947_v15 = vadd.f32 %v2946_v14, %v2884_v22  ;;  %v2888_v11 = vmul.f32 %v2755_v51, %v2755_v51 }
 0x288   : > { %v2886_v56 = vmul.f32 %v2753_v60, %v2753_v60  ;;  %v3375_v29 = vpack.c.bf16 %v1939_v24, %v1936_v48  ;;  %v2816_v25 = vadd.f32 %v2815_v57, %v2753_v60  ;;  %v2756_v35 = vsel %vm2564_vm12, %v1939_v24, 0.0 }
 0x289   : > { %v3370_v1 = vpack.c.bf16 %v1931_v30, %v1928_v38  ;;  %v2754_v7 = vsel %vm2562_vm10, %v1931_v30, 0.0  ;;  %v2948_v31 = vadd.f32 %v2947_v15, %v2885_v34  ;;  %v2889_v3 = vmul.f32 %v2756_v35, %v2756_v35 }
 0x28a   : > { %3479 = vst [vmem:[%s5064_s18 + $0x68] sm:$0xff] %v3375_v29   ;;  %v2887_v8 = vmul.f32 %v2754_v7, %v2754_v7  ;;  %v2817_v2 = vadd.f32 %v2816_v25, %v2754_v7  ;;  %v2504_v61 = vadd.s32 %v4955_v20, %v2439_v59  ;;  %vm2567_vm14 = vcmp.lt.s32.totalorder %v2503_v49, 1024 }
 0x28b   : > { %3478 = vst [vmem:[%s5064_s18 + $0x60] sm:$0xff] %v3370_v1   ;;  %v2949_v33 = vadd.f32 %v2948_v31, %v2886_v56  ;;  %vm2566_vm15 = vcmp.lt.s32.totalorder %v2502_v18, 1024  ;;  %v2440_v14 = vadd.s32 256, %v5580_v32  ;;  %v2442_v48 = vadd.s32 272, %v5580_v32 }
 0x28c   : > { %v2818_v12 = vadd.f32 %v2817_v2, %v2755_v51  ;;  %vm2568_vm1 = vcmp.lt.s32.totalorder %v2504_v61, 1024  ;;  %v2441_v24 = vadd.s32 264, %v5580_v32  ;;  %v2443_v34 = vadd.s32 280, %v5580_v32 }
 0x28d   : > { %v2950_v17 = vadd.f32 %v2949_v33, %v2887_v8  ;;  %v2505_v10 = vadd.s32 %v4955_v20, %v2440_v14  ;;  %v2507_v60 = vadd.s32 %v4955_v20, %v2442_v48  ;;  %v2445_v61 = vadd.s32 296, %v5580_v32 }
 0x28e   : > { %v2819_v27 = vadd.f32 %v2818_v12, %v2756_v35  ;;  %v2506_v30 = vadd.s32 %v4955_v20, %v2441_v24  ;;  %v2508_v56 = vadd.s32 %v4955_v20, %v2443_v34 }
 0x28f   : > { %v2951_v63 = vadd.f32 %v2950_v17, %v2888_v11  ;;  %vm2569_vm2 = vcmp.lt.s32.totalorder %v2505_v10, 1024  ;;  %vm2571_vm0 = vcmp.lt.s32.totalorder %v2507_v60, 1024 }
 0x290   : > { %vm2570_vm3 = vcmp.lt.s32.totalorder %v2506_v30, 1024  ;;  %vm2572_vm4 = vcmp.lt.s32.totalorder %v2508_v56, 1024  ;;  %v2449_v56 = vadd.s32 328, %v5580_v32 }
 0x291   : > { %v3572_v13 = vpop.f32.mrb[28].mxu0  ;;  %v2952_v41 = vadd.f32 %v2951_v63, %v2889_v3 }
 0x292   : > { %v1943_v37 = vpop.f32.mrb[29].mxu0  ;;  %v1952_v45 = vadd.f32 %v3572_v13, %v5016_v46 }
 0x293   : > { %v1944_v21 = vadd.f32 %v5016_v46, %v1943_v37  ;;  %v3573_v28 = vpop.f32.mrb[30].mxu0  ;;  %v2444_v37 = vadd.s32 288, %v5580_v32 }
 0x294   : > { %v1955_v54 = vadd.f32 %v3573_v28, %v5016_v46  ;;  %v1946_v0 = vpop.f32.mrb[31].mxu0  ;;  %v2759_v42 = vsel %vm2567_vm14, %v1952_v45, 0.0 }
 0x295   : > { %v2757_v5 = vsel %vm2565_vm13, %v1944_v21, 0.0  ;;  %v1947_v23 = vadd.f32 %v5016_v46, %v1946_v0  ;;  %v2892_v47 = vmul.f32 %v2759_v42, %v2759_v42 }
 0x296   : > { %v2820_v6 = vadd.f32 %v2819_v27, %v2757_v5  ;;  %v2890_v55 = vmul.f32 %v2757_v5, %v2757_v5  ;;  %v3385_v26 = vpack.c.bf16 %v1955_v54, %v1952_v45  ;;  %v2760_v44 = vsel %vm2568_vm1, %v1955_v54, 0.0 }
 0x297   : > { %v3380_v36 = vpack.c.bf16 %v1947_v23, %v1944_v21  ;;  %v2758_v50 = vsel %vm2566_vm15, %v1947_v23, 0.0  ;;  %v2893_v38 = vmul.f32 %v2760_v44, %v2760_v44  ;;  %v2509_v45 = vadd.s32 %v4955_v20, %v2444_v37 }
 0x298   : > { %v2953_v9 = vadd.f32 %v2952_v41, %v2890_v55  ;;  %3481 = vst [vmem:[%s5064_s18 + $0x78] sm:$0xff] %v3385_v26   ;;  %v2821_v53 = vadd.f32 %v2820_v6, %v2758_v50  ;;  %v2891_v43 = vmul.f32 %v2758_v50, %v2758_v50  ;;  %v2446_v41 = vadd.s32 304, %v5580_v32 }
 0x299   : > { %3480 = vst [vmem:[%s5064_s18 + $0x70] sm:$0xff] %v3380_v36   ;;  %v2447_v21 = vadd.s32 312, %v5580_v32  ;;  %v2510_v54 = vadd.s32 %v4955_v20, %v2445_v61  ;;  %vm2573_vm5 = vcmp.lt.s32.totalorder %v2509_v45, 1024 }
 0x29a   : > { %v2822_v62 = vadd.f32 %v2821_v53, %v2759_v42  ;;  %v2954_v22 = vadd.f32 %v2953_v9, %v2891_v43  ;;  %v2511_v28 = vadd.s32 %v4955_v20, %v2446_v41 }
 0x29b   : > { %v2512_v23 = vadd.s32 %v4955_v20, %v2447_v21  ;;  %vm2574_vm7 = vcmp.lt.s32.totalorder %v2510_v54, 1024 }
 0x29c   : > { %v2955_v39 = vadd.f32 %v2954_v22, %v2892_v47  ;;  %v2823_v4 = vadd.f32 %v2822_v62, %v2760_v44  ;;  %vm2575_vm6 = vcmp.lt.s32.totalorder %v2511_v28, 1024 }
 0x29d   : > { %vm2576_vm8 = vcmp.lt.s32.totalorder %v2512_v23, 1024  ;;  %v2453_v23 = vadd.s32 360, %v5580_v32 }
 0x29e   : > { %v2956_v19 = vadd.f32 %v2955_v39, %v2893_v38 }
 0x2a7   : > { %v3576_v15 = vpop.f32.mrb[0].mxu1 }
 0x2a8   : > { %v1959_v57 = vpop.f32.mrb[1].mxu1  ;;  %v1968_v29 = vadd.f32 %v3576_v15, %v5016_v46  ;;  %v2448_v15 = vadd.s32 320, %v5580_v32 }
 0x2a9   : > { %v1960_v1 = vadd.f32 %v5016_v46, %v1959_v57  ;;  %v3577_v7 = vpop.f32.mrb[2].mxu1  ;;  %v2450_v57 = vadd.s32 336, %v5580_v32 }
 0x2aa   : > { %v1971_v25 = vadd.f32 %v3577_v7, %v5016_v46  ;;  %v1962_v31 = vpop.f32.mrb[3].mxu1  ;;  %v2763_v2 = vsel %vm2571_vm0, %v1968_v29, 0.0 }
 0x2ab   : > { %v2761_v8 = vsel %vm2569_vm2, %v1960_v1, 0.0  ;;  %v1963_v16 = vadd.f32 %v5016_v46, %v1962_v31  ;;  %v2896_v40 = vmul.f32 %v2763_v2, %v2763_v2  ;;  %v2515_v7 = vadd.s32 %v4955_v20, %v2450_v57 }
 0x2ac   : > { %v2824_v51 = vadd.f32 %v2823_v4, %v2761_v8  ;;  %v2894_v58 = vmul.f32 %v2761_v8, %v2761_v8  ;;  %v3395_v33 = vpack.c.bf16 %v1971_v25, %v1968_v29  ;;  %v2764_v17 = vsel %vm2572_vm4, %v1971_v25, 0.0 }
 0x2ad   : > { %v3390_v52 = vpack.c.bf16 %v1963_v16, %v1960_v1  ;;  %v2762_v35 = vsel %vm2570_vm3, %v1963_v16, 0.0  ;;  %v2897_v63 = vmul.f32 %v2764_v17, %v2764_v17  ;;  %v2513_v29 = vadd.s32 %v4955_v20, %v2448_v15 }
 0x2ae   : > { %v2957_v59 = vadd.f32 %v2956_v19, %v2894_v58  ;;  %3483 = vst [vmem:[%s5064_s18 + $0x88] sm:$0xff] %v3395_v33   ;;  %v2825_v11 = vadd.f32 %v2824_v51, %v2762_v35  ;;  %v2895_v12 = vmul.f32 %v2762_v35, %v2762_v35  ;;  %v2451_v1 = vadd.s32 344, %v5580_v32 }
 0x2af   : > { %3482 = vst [vmem:[%s5064_s18 + $0x80] sm:$0xff] %v3390_v52   ;;  %v2514_v25 = vadd.s32 %v4955_v20, %v2449_v56  ;;  %vm2577_vm9 = vcmp.lt.s32.totalorder %v2513_v29, 1024  ;;  %vm2579_vm10 = vcmp.lt.s32.totalorder %v2515_v7, 1024 }
 0x2b0   : > { %v2826_v49 = vadd.f32 %v2825_v11, %v2763_v2  ;;  %v2958_v3 = vadd.f32 %v2957_v59, %v2895_v12  ;;  %v2516_v16 = vadd.s32 %v4955_v20, %v2451_v1 }
 0x2b1   : > { %vm2578_vm11 = vcmp.lt.s32.totalorder %v2514_v25, 1024 }
 0x2b2   : > { %v2959_v27 = vadd.f32 %v2958_v3, %v2896_v40  ;;  %v2827_v18 = vadd.f32 %v2826_v49, %v2764_v17  ;;  %vm2580_vm12 = vcmp.lt.s32.totalorder %v2516_v16, 1024  ;;  %v2457_v16 = vadd.s32 392, %v5580_v32 }
 0x2b4   : > { %v2960_v13 = vadd.f32 %v2959_v27, %v2897_v63 }
 0x2bd   : > { %v3580_v0 = vpop.f32.mrb[4].mxu1 }
 0x2be   : > { %v1975_v5 = vpop.f32.mrb[5].mxu1  ;;  %v1984_v6 = vadd.f32 %v3580_v0, %v5016_v46  ;;  %v2452_v0 = vadd.s32 352, %v5580_v32 }
 0x2bf   : > { %v1976_v55 = vadd.f32 %v5016_v46, %v1975_v5  ;;  %v3581_v26 = vpop.f32.mrb[6].mxu1  ;;  %v2454_v5 = vadd.s32 368, %v5580_v32 }
 0x2c0   : > { %v1987_v42 = vadd.f32 %v3581_v26, %v5016_v46  ;;  %v1978_v36 = vpop.f32.mrb[7].mxu1  ;;  %v2767_v47 = vsel %vm2575_vm6, %v1984_v6, 0.0 }
 0x2c1   : > { %v2765_v50 = vsel %vm2573_vm5, %v1976_v55, 0.0  ;;  %v1979_v9 = vadd.f32 %v5016_v46, %v1978_v36  ;;  %v2900_v14 = vmul.f32 %v2767_v47, %v2767_v47  ;;  %v2519_v26 = vadd.s32 %v4955_v20, %v2454_v5 }
 0x2c2   : > { %v2828_v53 = vadd.f32 %v2827_v18, %v2765_v50  ;;  %v2898_v43 = vmul.f32 %v2765_v50, %v2765_v50  ;;  %v3405_v44 = vpack.c.bf16 %v1987_v42, %v1984_v6  ;;  %v2768_v19 = vsel %vm2576_vm8, %v1987_v42, 0.0 }
 0x2c3   : > { %v3400_v62 = vpack.c.bf16 %v1979_v9, %v1976_v55  ;;  %v2766_v22 = vsel %vm2574_vm7, %v1979_v9, 0.0  ;;  %v2901_v10 = vmul.f32 %v2768_v19, %v2768_v19  ;;  %v2517_v6 = vadd.s32 %v4955_v20, %v2452_v0 }
 0x2c4   : > { %v2961_v38 = vadd.f32 %v2960_v13, %v2898_v43  ;;  %3485 = vst [vmem:[%s5064_s18 + $0x98] sm:$0xff] %v3405_v44   ;;  %v2829_v39 = vadd.f32 %v2828_v53, %v2766_v22  ;;  %v2899_v4 = vmul.f32 %v2766_v22, %v2766_v22  ;;  %v2455_v55 = vadd.s32 376, %v5580_v32 }
 0x2c5   : > { %3484 = vst [vmem:[%s5064_s18 + $0x90] sm:$0xff] %v3400_v62   ;;  %v2518_v42 = vadd.s32 %v4955_v20, %v2453_v23  ;;  %vm2581_vm13 = vcmp.lt.s32.totalorder %v2517_v6, 1024  ;;  %vm2583_vm14 = vcmp.lt.s32.totalorder %v2519_v26, 1024 }
 0x2c6   : > { %v2830_v48 = vadd.f32 %v2829_v39, %v2767_v47  ;;  %v2962_v24 = vadd.f32 %v2961_v38, %v2899_v4  ;;  %v2520_v9 = vadd.s32 %v4955_v20, %v2455_v55 }
 0x2c7   : > { %vm2582_vm15 = vcmp.lt.s32.totalorder %v2518_v42, 1024 }
 0x2c8   : > { %v2963_v34 = vadd.f32 %v2962_v24, %v2900_v14  ;;  %v2831_v60 = vadd.f32 %v2830_v48, %v2768_v19  ;;  %vm2584_vm1 = vcmp.lt.s32.totalorder %v2520_v9, 1024  ;;  %v2461_v9 = vadd.s32 424, %v5580_v32 }
 0x2ca   : > { %v2964_v30 = vadd.f32 %v2963_v34, %v2901_v10 }
 0x2d3   : > { %v3584_v31 = vpop.f32.mrb[8].mxu1 }
 0x2d4   : > { %v1991_v8 = vpop.f32.mrb[9].mxu1  ;;  %v2000_v51 = vadd.f32 %v3584_v31, %v5016_v46  ;;  %v2456_v31 = vadd.s32 384, %v5580_v32 }
 0x2d5   : > { %v1992_v58 = vadd.f32 %v5016_v46, %v1991_v8  ;;  %v3585_v33 = vpop.f32.mrb[10].mxu1  ;;  %v2458_v8 = vadd.s32 400, %v5580_v32 }
 0x2d6   : > { %v2003_v2 = vadd.f32 %v3585_v33, %v5016_v46  ;;  %v1994_v52 = vpop.f32.mrb[11].mxu1  ;;  %v2771_v40 = vsel %vm2579_vm10, %v2000_v51, 0.0 }
 0x2d7   : > { %v2769_v35 = vsel %vm2577_vm9, %v1992_v58, 0.0  ;;  %v1995_v59 = vadd.f32 %v5016_v46, %v1994_v52  ;;  %v2904_v37 = vmul.f32 %v2771_v40, %v2771_v40  ;;  %v2523_v33 = vadd.s32 %v4955_v20, %v2458_v8 }
 0x2d8   : > { %v2832_v11 = vadd.f32 %v2831_v60, %v2769_v35  ;;  %v2902_v12 = vmul.f32 %v2769_v35, %v2769_v35  ;;  %v3415_v17 = vpack.c.bf16 %v2003_v2, %v2000_v51  ;;  %v2772_v13 = vsel %vm2580_vm12, %v2003_v2, 0.0 }
 0x2d9   : > { %v3410_v49 = vpack.c.bf16 %v1995_v59, %v1992_v58  ;;  %v2770_v3 = vsel %vm2578_vm11, %v1995_v59, 0.0  ;;  %v2905_v45 = vmul.f32 %v2772_v13, %v2772_v13  ;;  %v2521_v51 = vadd.s32 %v4955_v20, %v2456_v31 }
 0x2da   : > { %v2965_v63 = vadd.f32 %v2964_v30, %v2902_v12  ;;  %3487 = vst [vmem:[%s5064_s18 + $0xa8] sm:$0xff] %v3415_v17   ;;  %v2833_v27 = vadd.f32 %v2832_v11, %v2770_v3  ;;  %v2903_v18 = vmul.f32 %v2770_v3, %v2770_v3  ;;  %v2459_v58 = vadd.s32 408, %v5580_v32 }
 0x2db   : > { %3486 = vst [vmem:[%s5064_s18 + $0xa0] sm:$0xff] %v3410_v49   ;;  %v2522_v2 = vadd.s32 %v4955_v20, %v2457_v16  ;;  %vm2585_vm2 = vcmp.lt.s32.totalorder %v2521_v51, 1024  ;;  %vm2587_vm0 = vcmp.lt.s32.totalorder %v2523_v33, 1024 }
 0x2dc   : > { %v2834_v41 = vadd.f32 %v2833_v27, %v2771_v40  ;;  %v2966_v61 = vadd.f32 %v2965_v63, %v2903_v18  ;;  %v2524_v59 = vadd.s32 %v4955_v20, %v2459_v58  ;;  %v5282_v40 = vld [vmem:[%s5415_s4] ss:$0 sm:$0xff] }
 0x2dd   : > { %vm2586_vm3 = vcmp.lt.s32.totalorder %v2522_v2, 1024 }
 0x2de   : > { %v2967_v21 = vadd.f32 %v2966_v61, %v2904_v37  ;;  %v2835_v28 = vadd.f32 %v2834_v41, %v2772_v13  ;;  %vm2588_vm4 = vcmp.lt.s32.totalorder %v2524_v59, 1024  ;;  %v2465_v59 = vadd.s32 456, %v5580_v32 }
 0x2e0   : > { %v2968_v54 = vadd.f32 %v2967_v21, %v2905_v45 }
 0x2e9   : > { %v3588_v36 = vpop.f32.mrb[12].mxu1 }
 0x2ea   : > { %v2007_v50 = vpop.f32.mrb[13].mxu1  ;;  %v2016_v53 = vadd.f32 %v3588_v36, %v5016_v46  ;;  %v2460_v36 = vadd.s32 416, %v5580_v32 }
 0x2eb   : > { %v2008_v43 = vadd.f32 %v5016_v46, %v2007_v50  ;;  %v3589_v44 = vpop.f32.mrb[14].mxu1  ;;  %v2462_v50 = vadd.s32 432, %v5580_v32 }
 0x2ec   : > { %v2019_v47 = vadd.f32 %v3589_v44, %v5016_v46  ;;  %v2010_v62 = vpop.f32.mrb[15].mxu1  ;;  %v2775_v14 = vsel %vm2583_vm14, %v2016_v53, 0.0 }
 0x2ed   : > { %v2773_v22 = vsel %vm2581_vm13, %v2008_v43, 0.0  ;;  %v2011_v38 = vadd.f32 %v5016_v46, %v2010_v62  ;;  %v2908_v15 = vmul.f32 %v2775_v14, %v2775_v14  ;;  %v2527_v44 = vadd.s32 %v4955_v20, %v2462_v50 }
 0x2ee   : > { %v2836_v39 = vadd.f32 %v2835_v28, %v2773_v22  ;;  %v2906_v4 = vmul.f32 %v2773_v22, %v2773_v22  ;;  %v3425_v19 = vpack.c.bf16 %v2019_v47, %v2016_v53  ;;  %v2776_v30 = vsel %vm2584_vm1, %v2019_v47, 0.0 }
 0x2ef   : > { %v3420_v48 = vpack.c.bf16 %v2011_v38, %v2008_v43  ;;  %v2774_v24 = vsel %vm2582_vm15, %v2011_v38, 0.0  ;;  %v2909_v29 = vmul.f32 %v2776_v30, %v2776_v30  ;;  %v2525_v53 = vadd.s32 %v4955_v20, %v2460_v36 }
 0x2f0   : > { %v2969_v10 = vadd.f32 %v2968_v54, %v2906_v4  ;;  %3489 = vst [vmem:[%s5064_s18 + $0xb8] sm:$0xff] %v3425_v19   ;;  %v2837_v34 = vadd.f32 %v2836_v39, %v2774_v24  ;;  %v2907_v60 = vmul.f32 %v2774_v24, %v2774_v24  ;;  %v2463_v43 = vadd.s32 440, %v5580_v32 }
 0x2f1   : > { %3488 = vst [vmem:[%s5064_s18 + $0xb0] sm:$0xff] %v3420_v48   ;;  %v2526_v47 = vadd.s32 %v4955_v20, %v2461_v9  ;;  %vm2589_vm5 = vcmp.lt.s32.totalorder %v2525_v53, 1024  ;;  %vm2591_vm6 = vcmp.lt.s32.totalorder %v2527_v44, 1024 }
 0x2f2   : > { %v2838_v57 = vadd.f32 %v2837_v34, %v2775_v14  ;;  %v2970_v56 = vadd.f32 %v2969_v10, %v2907_v60  ;;  %v2528_v38 = vadd.s32 %v4955_v20, %v2463_v43 }
 0x2f3   : > { %vm2590_vm7 = vcmp.lt.s32.totalorder %v2526_v47, 1024 }
 0x2f4   : > { %v2971_v1 = vadd.f32 %v2970_v56, %v2908_v15  ;;  %v2839_v7 = vadd.f32 %v2838_v57, %v2776_v30  ;;  %vm2592_vm8 = vcmp.lt.s32.totalorder %v2528_v38, 1024  ;;  %v2469_v38 = vadd.s32 488, %v5580_v32 }
 0x2f6   : > { %v2972_v25 = vadd.f32 %v2971_v1, %v2909_v29 }
 0x2ff   : > { %v3592_v52 = vpop.f32.mrb[16].mxu1 }
 0x300   : > { %v2023_v35 = vpop.f32.mrb[17].mxu1  ;;  %v2032_v11 = vadd.f32 %v3592_v52, %v5016_v46  ;;  %v2464_v52 = vadd.s32 448, %v5580_v32 }
 0x301   : > { %v2024_v12 = vadd.f32 %v5016_v46, %v2023_v35  ;;  %v3593_v17 = vpop.f32.mrb[18].mxu1  ;;  %v2466_v35 = vadd.s32 464, %v5580_v32 }
 0x302   : > { %v2035_v49 = vadd.f32 %v5282_v40, %v3593_v17  ;;  %v2026_v3 = vpop.f32.mrb[19].mxu1  ;;  %v2779_v46 = vsel %vm2587_vm0, %v2032_v11, 0.0 }
 0x303   : > { %v2777_v63 = vsel %vm2585_vm2, %v2024_v12, 0.0  ;;  %v2027_v27 = vadd.f32 %v5282_v40, %v2026_v3  ;;  %v2912_v0 = vmul.f32 %v2779_v46, %v2779_v46  ;;  %v2531_v17 = vadd.s32 %v4955_v20, %v2466_v35 }
 0x304   : > { %v2840_v18 = vadd.f32 %v2839_v7, %v2777_v63  ;;  %v2910_v13 = vmul.f32 %v2777_v63, %v2777_v63  ;;  %v3435_v37 = vpack.c.bf16 %v2035_v49, %v2032_v11  ;;  %v2780_v54 = vsel %vm2588_vm4, %v2035_v49, 0.0 }
 0x305   : > { %v3430_v41 = vpack.c.bf16 %v2027_v27, %v2024_v12  ;;  %v2778_v61 = vsel %vm2586_vm3, %v2027_v27, 0.0  ;;  %v2913_v6 = vmul.f32 %v2780_v54, %v2780_v54  ;;  %v2529_v11 = vadd.s32 %v4955_v20, %v2464_v52 }
 0x306   : > { %v2973_v45 = vadd.f32 %v2972_v25, %v2910_v13  ;;  %3491 = vst [vmem:[%s5064_s18 + $0xc8] sm:$0xff] %v3435_v37   ;;  %v2841_v21 = vadd.f32 %v2840_v18, %v2778_v61  ;;  %v2911_v28 = vmul.f32 %v2778_v61, %v2778_v61  ;;  %v2467_v12 = vadd.s32 472, %v5580_v32 }
 0x307   : > { %3490 = vst [vmem:[%s5064_s18 + $0xc0] sm:$0xff] %v3430_v41   ;;  %v2530_v49 = vadd.s32 %v4955_v20, %v2465_v59  ;;  %vm2593_vm9 = vcmp.lt.s32.totalorder %v2529_v11, 1024  ;;  %vm2595_vm10 = vcmp.lt.s32.totalorder %v2531_v17, 1024 }
 0x308   : > { %v2842_v5 = vadd.f32 %v2841_v21, %v2779_v46  ;;  %v2974_v23 = vadd.f32 %v2973_v45, %v2911_v28  ;;  %v2532_v27 = vadd.s32 %v4955_v20, %v2467_v12 }
 0x309   : > { %vm2594_vm11 = vcmp.lt.s32.totalorder %v2530_v49, 1024 }
 0x30a   : > { %v2975_v55 = vadd.f32 %v2974_v23, %v2912_v0  ;;  %v2843_v26 = vadd.f32 %v2842_v5, %v2780_v54  ;;  %vm2596_vm12 = vcmp.lt.s32.totalorder %v2532_v27, 1024 }
 0x30c   : > { %v2976_v42 = vadd.f32 %v2975_v55, %v2913_v6 }
 0x315   : > { %v3596_v62 = vpop.f32.mrb[20].mxu1 }
 0x316   : > { %v2039_v22 = vpop.f32.mrb[21].mxu1  ;;  %v2048_v39 = vadd.f32 %v5282_v40, %v3596_v62  ;;  %v2468_v62 = vadd.s32 480, %v5580_v32 }
 0x317   : > { %v2040_v4 = vadd.f32 %v5282_v40, %v2039_v22  ;;  %v3597_v19 = vpop.f32.mrb[22].mxu1  ;;  %v2470_v22 = vadd.s32 496, %v5580_v32 }
 0x318   : > { %v2051_v14 = vadd.f32 %v5282_v40, %v3597_v19  ;;  %v2042_v48 = vpop.f32.mrb[23].mxu1  ;;  %v2783_v15 = vsel %vm2591_vm6, %v2048_v39, 0.0 }
 0x319   : > { %v2781_v24 = vsel %vm2589_vm5, %v2040_v4, 0.0  ;;  %v2043_v10 = vadd.f32 %v5282_v40, %v2042_v48  ;;  %v2916_v31 = vmul.f32 %v2783_v15, %v2783_v15  ;;  %v2535_v19 = vadd.s32 %v4955_v20, %v2470_v22 }
 0x31a   : > { %v2844_v34 = vadd.f32 %v2843_v26, %v2781_v24  ;;  %v2914_v60 = vmul.f32 %v2781_v24, %v2781_v24  ;;  %v3445_v30 = vpack.c.bf16 %v2051_v14, %v2048_v39  ;;  %v2784_v25 = vsel %vm2592_vm8, %v2051_v14, 0.0 }
 0x31b   : > { %v3440_v57 = vpack.c.bf16 %v2043_v10, %v2040_v4  ;;  %v2782_v56 = vsel %vm2590_vm7, %v2043_v10, 0.0  ;;  %v2917_v51 = vmul.f32 %v2784_v25, %v2784_v25  ;;  %v2533_v39 = vadd.s32 %v4955_v20, %v2468_v62 }
 0x31c   : > { %v2977_v29 = vadd.f32 %v2976_v42, %v2914_v60  ;;  %3493 = vst [vmem:[%s5064_s18 + $0xd8] sm:$0xff] %v3445_v30   ;;  %v2845_v1 = vadd.f32 %v2844_v34, %v2782_v56  ;;  %v2915_v7 = vmul.f32 %v2782_v56, %v2782_v56  ;;  %v2471_v4 = vadd.s32 504, %v5580_v32 }
 0x31d   : > { %3492 = vst [vmem:[%s5064_s18 + $0xd0] sm:$0xff] %v3440_v57   ;;  %v2534_v14 = vadd.s32 %v4955_v20, %v2469_v38  ;;  %vm2597_vm13 = vcmp.lt.s32.totalorder %v2533_v39, 1024  ;;  %vm2599_vm14 = vcmp.lt.s32.totalorder %v2535_v19, 1024 }
 0x31e   : > { %v2846_v8 = vadd.f32 %v2845_v1, %v2783_v15  ;;  %v2978_v16 = vadd.f32 %v2977_v29, %v2915_v7  ;;  %v2536_v10 = vadd.s32 %v4955_v20, %v2471_v4 }
 0x31f   : > { %vm2598_vm15 = vcmp.lt.s32.totalorder %v2534_v14, 1024 }
 0x320   : > { %v2979_v58 = vadd.f32 %v2978_v16, %v2916_v31  ;;  %v2847_v33 = vadd.f32 %v2846_v8, %v2784_v25  ;;  %vm2600_vm1 = vcmp.lt.s32.totalorder %v2536_v10, 1024 }
 0x322   : > { %v2980_v2 = vadd.f32 %v2979_v58, %v2917_v51 }
 0x32b   : > { %v3600_v3 = vpop.f32.mrb[24].mxu1 }
 0x32c   : > { %v2055_v63 = vpop.f32.mrb[25].mxu1  ;;  %v2064_v18 = vadd.f32 %v5282_v40, %v3600_v3 }
 0x32d   : > { %v2056_v13 = vadd.f32 %v5282_v40, %v2055_v63  ;;  %v3601_v37 = vpop.f32.mrb[26].mxu1 }
 0x32e   : > { %v2067_v46 = vadd.f32 %v5282_v40, %v3601_v37  ;;  %v2058_v41 = vpop.f32.mrb[27].mxu1  ;;  %v2787_v0 = vsel %vm2595_vm10, %v2064_v18, 0.0 }
 0x32f   : > { %v2785_v61 = vsel %vm2593_vm9, %v2056_v13, 0.0  ;;  %v2059_v45 = vadd.f32 %v5282_v40, %v2058_v41  ;;  %v2920_v36 = vmul.f32 %v2787_v0, %v2787_v0 }
 0x330   : > { %v2848_v21 = vadd.f32 %v2847_v33, %v2785_v61  ;;  %v2918_v28 = vmul.f32 %v2785_v61, %v2785_v61  ;;  %v3455_v54 = vpack.c.bf16 %v2067_v46, %v2064_v18  ;;  %v2788_v42 = vsel %vm2596_vm12, %v2067_v46, 0.0 }
 0x331   : > { %v3450_v5 = vpack.c.bf16 %v2059_v45, %v2056_v13  ;;  %v2786_v23 = vsel %vm2594_vm11, %v2059_v45, 0.0  ;;  %v2921_v53 = vmul.f32 %v2788_v42, %v2788_v42 }
 0x332   : > { %v2981_v6 = vadd.f32 %v2980_v2, %v2918_v28  ;;  %3495 = vst [vmem:[%s5064_s18 + $0xe8] sm:$0xff] %v3455_v54   ;;  %v2849_v55 = vadd.f32 %v2848_v21, %v2786_v23  ;;  %v2919_v26 = vmul.f32 %v2786_v23, %v2786_v23 }
 0x333   : > { %3494 = vst [vmem:[%s5064_s18 + $0xe0] sm:$0xff] %v3450_v5  }
 0x334   : > { %v2850_v50 = vadd.f32 %v2849_v55, %v2787_v0  ;;  %v2982_v9 = vadd.f32 %v2981_v6, %v2919_v26 }
 0x336   : > { %v2983_v43 = vadd.f32 %v2982_v9, %v2920_v36  ;;  %v2851_v44 = vadd.f32 %v2850_v50, %v2788_v42 }
 0x338   : > { %v2984_v47 = vadd.f32 %v2983_v43, %v2921_v53 }
 0x341   : > { %v3604_v48 = vpop.f32.mrb[28].mxu1 }
 0x342   : > { %v2071_v24 = vpop.f32.mrb[29].mxu1  ;;  %v2080_v34 = vadd.f32 %v5282_v40, %v3604_v48 }
 0x343   : > { %v2072_v60 = vadd.f32 %v5282_v40, %v2071_v24  ;;  %v3605_v30 = vpop.f32.mrb[30].mxu1 }
 0x344   : > { %v2083_v32 = vadd.f32 %v5282_v40, %v3605_v30  ;;  %v2074_v15 = vpop.f32.mrb[31].mxu1  ;;  %v2791_v7 = vsel %vm2599_vm14, %v2080_v34, 0.0 }
 0x345   : > { %v2789_v57 = vsel %vm2597_vm13, %v2072_v60, 0.0  ;;  %v2075_v56 = vadd.f32 %v5282_v40, %v2074_v15  ;;  %v2924_v58 = vmul.f32 %v2791_v7, %v2791_v7 }
 0x346   : > { %v2852_v29 = vadd.f32 %v2851_v44, %v2789_v57  ;;  %v2922_v1 = vmul.f32 %v2789_v57, %v2789_v57  ;;  %v3465_v20 = vpack.c.bf16 %v2083_v32, %v2080_v34  ;;  %v2792_v51 = vsel %vm2600_vm1, %v2083_v32, 0.0 }
 0x347   : > { %v3460_v25 = vpack.c.bf16 %v2075_v56, %v2072_v60  ;;  %v2790_v31 = vsel %vm2598_vm15, %v2075_v56, 0.0 }
 0x348   : > { %v2985_v8 = vadd.f32 %v2984_v47, %v2922_v1  ;;  %3497 = vst [vmem:[%s5064_s18 + $0xf8] sm:$0xff] %v3465_v20   ;;  %v2853_v40 = vadd.f32 %v2852_v29, %v2790_v31  ;;  %v2923_v16 = vmul.f32 %v2790_v31, %v2790_v31 }
 0x349   : > { %3496 = vst [vmem:[%s5064_s18 + $0xf0] sm:$0xff] %v3460_v25  }
 0x34a   : > { %v2854_v33 = vadd.f32 %v2853_v40, %v2791_v7  ;;  %v2986_v2 = vadd.f32 %v2985_v8, %v2923_v16 }
 0x34b   : > { %3727 = shalt.err (!%p3724_p3)
}
 0x34c   : > { %s3728_s17 = scalar_lea.hbm %s5333_s10, 4096  ;;  %s3732_s20 = scalar_lea.hbm %s5416_s5, 8192 }
 0x34d   : > { %p3729_p4 = scmp.ne.s32.totalorder %s5333_s10, %s3728_s17  ;;  %p3733_p9 = scmp.lt.u32.totalorder %s5333_s10, %s5416_s5 }
 0x34e   : > { %p3734_p10 = scmp.lt.u32.totalorder %s3732_s20, %s3728_s17  ;;  %p3736_p12 = scmp.lt.u32.totalorder %s3728_s17, %s5333_s10 }
 0x34f   : > { %p3730_p7 = pnand %p3729_p4, %p3890_p5 }
 0x350   : > { %p3735_p11 = por %p3734_p10, %p3733_p9 }
 0x351   : > { %p3731_p8 = pneg %p3730_p7 }
 0x352   : > { %p3737_p13 = por %p3736_p12, %p3735_p11 }
 0x354   : > { %p3738_p0 = pnand %p3737_p13, %p3731_p8 }
 0x356   : > { %3741 = shalt.err (!%p3738_p0)
}
 0x357   : > { %s3814_s9 = smov 64   ;;  %s3815_s12 = smov 4   ;;  %v2925_v52 = vmul.f32 %v2792_v51, %v2792_v51  ;;  %v2855_v35 = vadd.f32 %v2854_v33, %v2792_v51  ;;  %v2987_v59 = vadd.f32 %v2986_v2, %v2924_v58  ;;  %vm2995_vm2 = vcmask 1040384  }
 0x358   : > { %3614 = dma.vmem_to_hbm [thread:$0]  (%p3890_p5), %s5335_s28, 4096, %s5333_s10, %s2999_s11, %s3814_s9, %s3814_s9, %s3815_s12  }
 0x359   : > { %v2856_v11 = vrot.slane %v2855_v35, 4  ;;  %v2988_v12 = vadd.f32 %v2987_v59, %v2925_v52  ;;  %s3129_s13 = sshll.u32 %s5001_s14, 1  ;;  %s3239_s15 = sshll.u32 %s3873_s25, 5 }
 0x35a   : > { %s256_s28 = scalar_lea.vmem [#allocation4], %s3129_s13  ;;  %s5368_s17 = scalar_lea.hbm %s5417_s6, %s3239_s15 }
 0x35b   : > { %v2857_v17 = vadd.f32 %v2856_v11, %v2855_v35  ;;  %v2989_v49 = vrot.slane %v2988_v12, 4  ;;  %s3033_s10 = sshll.u32 %s256_s28, 4  ;;  %s3004_s18 = scalar_lea.sflag [#allocation5], %s5001_s14  ;;  %s5370_s10 = int_to_ptr.vmem [resolvable:$true] %s3033_s10 }
 0x35c   : > { %s3742_s19 = scalar_lea.vmem %s5370_s10, 32  ;;  %s3816_s25 = smov [#allocation4]  }
 0x35d   : > { %v2858_v3 = vrot.slane %v2857_v17, 2  ;;  %v2990_v63 = vadd.f32 %v2989_v49, %v2988_v12  ;;  %p3743_p1 = scmp.ne.s32.totalorder %s5370_s10, %s3742_s19  ;;  %s3746_s20 = sshll.u32 %s3816_s25, 4  ;;  %s3747_s20 = int_to_ptr.vmem [resolvable:$false] %s3746_s20 }
 0x35e   : > { %s3748_s26 = scalar_lea.vmem %s3747_s20, 64  ;;  %p3749_p4 = scmp.lt.s32.totalorder %s5370_s10, %s3747_s20 }
 0x35f   : > { %v2859_v27 = vadd.f32 %v2858_v3, %v2857_v17  ;;  %v2991_v18 = vrot.slane %v2990_v63, 2  ;;  %p3744_p2 = pnand %p3743_p1, %p3890_p5  ;;  %p3750_p7 = scmp.lt.s32.totalorder %s3748_s26, %s3742_s19 }
 0x361   : > { %v2860_v13 = vrot.slane %v2859_v27, 1  ;;  %v2992_v37 = vadd.f32 %v2991_v18, %v2990_v63  ;;  %p3745_p3 = pneg %p3744_p2  ;;  %p3751_p8 = por %p3750_p7, %p3749_p4 }
 0x363   : > { %v2993_v46 = vrot.slane %v2992_v37, 1  ;;  %v2861_v41 = vadd.f32 %v2860_v13, %v2859_v27  ;;  %p3752_p9 = pnand %p3751_p8, %p3745_p3 }
 0x365   : > { %v2994_v61 = vadd.f32 %v2993_v46, %v2992_v37 }
 0x367   : > { %v2996_v45 = vsel %vm2995_vm2, %v2861_v41, %v2994_v61 }
 0x368   : > { %2997 = vst [vmem:[%s256_s28] sm:$0x3] %v2996_v45 }
 0x369   : > { %3755 = shalt.err (!%p3752_p9)
}
 0x36a   : > { %s3756_s14 = scalar_lea.hbm %s5368_s17, 32  ;;  %s3760_s12 = scalar_lea.hbm %s5417_s6, 64 }
 0x36b   : > { %p3757_p10 = scmp.ne.s32.totalorder %s5368_s17, %s3756_s14  ;;  %p3761_p13 = scmp.lt.u32.totalorder %s5368_s17, %s5417_s6 }
 0x36c   : > { %p3762_p0 = scmp.lt.u32.totalorder %s3760_s12, %s3756_s14  ;;  %p3764_p2 = scmp.lt.u32.totalorder %s3756_s14, %s5368_s17 }
 0x36d   : > { %p3758_p11 = pnand %p3757_p10, %p3890_p5 }
 0x36e   : > { %p3763_p1 = por %p3762_p0, %p3761_p13 }
 0x36f   : > { %p3759_p12 = pneg %p3758_p11 }
 0x370   : > { %p3765_p3 = por %p3764_p2, %p3763_p1 }
 0x372   : > { %p3766_p4 = pnand %p3765_p3, %p3759_p12 }
 0x374   : > { %3769 = shalt.err (!%p3766_p4)
}
 0x375   : > { %3615 = dma.vmem_to_hbm [thread:$0]  (%p3890_p5), %s5370_s10, 32, %s5368_s17, %s3004_s18  }
 0x376 PF: > { %p3625_p7 = scmp.ge.s32.totalorder %s3808_s24, 2  ;;  %s3045_s28 = sand.u32 1, %s3796_s21  }
 0x377   : > { %s3046_s11 = scalar_lea.sflag [#allocation3], %s3045_s28 }
 0x378   : > { %p3619_p8 = pnand %p3625_p7, %p3894_p6 }
 0x37a   : > { %3787 = dma.done.wait (!%p3619_p8), %s3046_s11, 4096  }
 0x37b   : > { %3789 = vsyncadd (!%p3619_p8), %s3046_s11, 4294963200  ;;  %s3055_s16 = scalar_lea.sflag [#allocation5], %s3045_s28 }
 0x37c   : > { %3791 = dma.done.wait (!%p3619_p8), %s3055_s16, 32  }
 0x37d   : > { %3793 = vsyncadd (!%p3619_p8), %s3055_s16, 4294967264  ;;  %p20_p5 = scmp.ge.s32.totalorder %s3877_s27, 4   ;;  %s5587_s21 = smov %s3800_s22 }
 0x37e   : > { %s5588_s22 = smov %s3804_s23  ;;  %s5589_s23 = smov %s3888_s30 }
 0x37f   : > { %s5590_s24 = smov %s3877_s27  ;;  %22 = sbr.rel (!%p20_p5) target bundleno = 5 (0x5), region = 92 }
 0x386   :  { %3060 = vsyncpa [#allocation3], 1 }
 0x387   :  { %3062 = vsyncpa [#allocation3 + $0x1], 1 }
 0x388   :  { %3063 = vsyncpa [#allocation5], 1 }
 0x389   :  { %3065 = vsyncpa [#allocation5 + $0x1], 1 }

</bundles_post_ra>
